<compile_context>
chip_gen: v5e
topology: v5e:2x2
jax: 0.10.0
libtpu: 0.0.40
codegen_flags: <defaults>
</compile_context>

<pallas_src>
import functools

import jax
import jax.numpy as jnp
from jax import lax
from jax.experimental import pallas as pl
from jax.experimental.pallas import tpu as pltpu

_HIGHEST = lax.Precision.HIGHEST


def _round_up(x, m):
    return ((x + m - 1) // m) * m


def _block_diag_repeat(w, nb):
    """(r, k) -> (nb*r, nb*k) block-diagonal with `w` repeated on the diagonal."""
    r, k = w.shape
    eye = jnp.eye(nb, dtype=w.dtype)
    return (eye[:, None, :, None] * w[None, :, None, :]).reshape(nb * r, nb * k)


def _block_diag_stack(ws):
    """(nb, r, k) -> (nb*r, nb*k) block-diagonal with ws[i] as the i-th block."""
    nb, r, k = ws.shape
    eye = jnp.eye(nb, dtype=ws.dtype)
    return (eye[:, None, :, None] * ws[:, :, None, :]).reshape(nb * r, nb * k)


# ----------------------------------------------------------------------------
# Kernel 1: projections A, B (single block-diagonal matmul), legacy dim-0
# (batch) softmax of B, and accumulation of the global descriptors over HW
# tiles.  Grid: (n_split, tiles_per_core); the HW axis is a reduction into a
# resident (1, b*c_m, b*c_n) output block per split.
# ----------------------------------------------------------------------------
def _gd_kernel(x_ref, w_ref, ba_ref, g_ref, *, nb, c_m, c_n, hw,
               tiles_per_core, needs_mask):
    t = pl.program_id(1)

    @pl.when(t == 0)
    def _init():
        g_ref[...] = jnp.zeros_like(g_ref)

    tile = x_ref.shape[-1]
    # One block-diagonal projection matmul covers every batch element:
    # rows [0, nb*c_m) are the stacked ConvA outputs, the rest are ConvB.
    p = jnp.dot(w_ref[...], x_ref[...], precision=_HIGHEST,
                preferred_element_type=jnp.float32)            # (nb*(c_m+c_n), T)
    a_all = p[: nb * c_m, :] + ba_ref[...]                      # + ConvA bias
    b_all = p[nb * c_m:, :]                                     # ConvB bias cancels

    # Legacy F.softmax default on a 3-D tensor -> softmax over the batch dim.
    b_parts = [b_all[i * c_n:(i + 1) * c_n, :] for i in range(nb)]
    m = functools.reduce(jnp.maximum, b_parts)                  # (c_n, T)
    e_all = jnp.exp(b_all - jnp.concatenate([m] * nb, axis=0))
    s = functools.reduce(lambda u, v: u + v,
                         [e_all[i * c_n:(i + 1) * c_n, :] for i in range(nb)])
    attn = e_all / jnp.concatenate([s] * nb, axis=0)            # exact divide

    if needs_mask:
        # Zero out the zero-padded spatial columns so they contribute nothing
        # to the gd reduction (correct even for a nonzero ConvA bias).
        gt = pl.program_id(0) * tiles_per_core + t
        col = gt * tile + lax.broadcasted_iota(jnp.int32, attn.shape, 1)
        attn = jnp.where(col < hw, attn, 0.0)

    # One wide contraction over the spatial tile; the off-diagonal (i != j)
    # batch blocks are discarded in the wrapper (b is tiny, M/N << MXU tile).
    g_ref[0] = g_ref[0] + lax.dot_general(
        a_all, attn, (((1,), (1,)), ((), ())),
        precision=_HIGHEST, preferred_element_type=jnp.float32)


# ----------------------------------------------------------------------------
# Kernel 2: projection V (block-diagonal matmul), batch softmax, and the fused
# (Wr @ gd) @ attention_vectors + bias, written as lane-dense (b*c, T) tiles.
# Grid: (n_t,), tiles are independent ("parallel").
# ----------------------------------------------------------------------------
def _out_kernel(x_ref, gd_ref, wv_ref, br_ref, o_ref, *, nb, c_n):
    p = jnp.dot(wv_ref[...], x_ref[...], precision=_HIGHEST,
                preferred_element_type=jnp.float32)            # (nb*c_n, T)
    v_parts = [p[i * c_n:(i + 1) * c_n, :] for i in range(nb)]
    m = functools.reduce(jnp.maximum, v_parts)
    e_all = jnp.exp(p - jnp.concatenate([m] * nb, axis=0))
    s = functools.reduce(lambda u, v: u + v,
                         [e_all[i * c_n:(i + 1) * c_n, :] for i in range(nb)])
    av = e_all / jnp.concatenate([s] * nb, axis=0)              # exact divide

    # gd_ref is the per-batch block-diagonal of (Wr @ gd_b): a single matmul
    # emits the stacked (nb*c, T) output tile, and br broadcasts from (nb*c, 1).
    o_ref[...] = (jnp.dot(gd_ref[...], av, precision=_HIGHEST,
                          preferred_element_type=jnp.float32)
                  + br_ref[...])


def double_attention(x_nchw, params, tile_cap=4096):
    b, c, h, w = x_nchw.shape
    hw = h * w
    wa, ba, wb, bb, wv, bv, wr, br = params
    c_m, c_n = wa.shape[0], wb.shape[0]
    del bb, bv  # constant across batch -> exact no-ops under the dim-0 softmax

    f32 = jnp.float32
    # Free reshape: batch and channel stacked on the sublane axis, HW on lanes.
    x2 = x_nchw.astype(f32).reshape(b * c, hw)

    # Spatial tile: 128-aligned, capped; zero-pad hw up to a tile multiple so
    # arbitrary H*W stays pipelined (no silent single-giant-tile fallback).
    # TODO(synk): cap could be generation-gated (larger on 128 MiB-VMEM chips).
    tile_cap = max(128, (tile_cap // 128) * 128)
    tile = min(tile_cap, _round_up(hw, 128))
    hw_pad = _round_up(hw, tile)
    n_t = hw_pad // tile
    needs_mask = hw_pad != hw
    if needs_mask:
        x2 = jnp.pad(x2, ((0, 0), (0, hw_pad - hw)))

    # Split kernel 1's reduction across a leading parallel axis when possible
    # so both v7x TensorCores work; harmless (serial) on single-TC v5e/v6e.
    n_split = 2 if (n_t >= 2 and n_t % 2 == 0) else 1
    tiles_per_core = n_t // n_split

    # Per-batch block-diagonal projection weights -> one matmul per kernel.
    w_ab = jnp.concatenate(
        [_block_diag_repeat(wa.astype(f32), b),
         _block_diag_repeat(wb.astype(f32), b)], axis=0)        # (b*(c_m+c_n), b*c)
    ba_all = jnp.concatenate([ba.astype(f32)] * b, axis=0)      # (b*c_m, 1)
    wv_bd = _block_diag_repeat(wv.astype(f32), b)               # (b*c_n, b*c)
    br_all = jnp.concatenate([br.astype(f32)] * b, axis=0)      # (b*c, 1)

    vmem_limit = 32 * 1024 * 1024  # safe on v5e / v6e / v7x at these tiles

    # ---- kernel 1: A/B projections, batch softmax, gd accumulation ----
    cost1 = pl.CostEstimate(
        flops=int(2 * hw_pad * (b * (c_m + c_n) * b * c + b * c_m * b * c_n)),
        transcendentals=int(b * c_n * hw_pad),
        bytes_accessed=int(4 * (x2.size + w_ab.size + ba_all.size
                                + n_split * b * c_m * b * c_n)))
    g_partial = pl.pallas_call(
        functools.partial(_gd_kernel, nb=b, c_m=c_m, c_n=c_n, hw=hw,
                          tiles_per_core=tiles_per_core, needs_mask=needs_mask),
        out_shape=jax.ShapeDtypeStruct((n_split, b * c_m, b * c_n), f32),
        grid=(n_split, tiles_per_core),
        in_specs=[
            pl.BlockSpec((b * c, tile), lambda s, t: (0, s * tiles_per_core + t)),
            pl.BlockSpec((b * (c_m + c_n), b * c), lambda s, t: (0, 0)),
            pl.BlockSpec((b * c_m, 1), lambda s, t: (0, 0)),
        ],
        out_specs=pl.BlockSpec((1, b * c_m, b * c_n), lambda s, t: (s, 0, 0)),
        compiler_params=pltpu.CompilerParams(
            dimension_semantics=("parallel", "arbitrary"),
            vmem_limit_bytes=vmem_limit),
        cost_estimate=cost1,
    )(x2, w_ab, ba_all)

    # Tiny XLA glue: sum per-core partials, pull the per-batch diagonal blocks,
    # and fold the 1x1 reconstruct conv into gd (exact by associativity).
    g_full = jnp.sum(g_partial, axis=0)                         # (b*c_m, b*c_n)
    gd = jnp.stack([g_full[i * c_m:(i + 1) * c_m, i * c_n:(i + 1) * c_n]
                    for i in range(b)])                         # (b, c_m, c_n)
    gd2 = jnp.einsum('cm,bmk->bck', wr.astype(f32), gd, precision=_HIGHEST)
    gd2_bd = _block_diag_stack(gd2)                             # (b*c, b*c_n)

    # ---- kernel 2: V projection, batch softmax, fused output ----
    cost2 = pl.CostEstimate(
        flops=int(2 * hw_pad * (b * c_n * b * c + b * c * b * c_n)),
        transcendentals=int(b * c_n * hw_pad),
        bytes_accessed=int(4 * (x2.size + gd2_bd.size + wv_bd.size
                                + br_all.size + b * c * hw_pad)))
    out2 = pl.pallas_call(
        functools.partial(_out_kernel, nb=b, c_n=c_n),
        out_shape=jax.ShapeDtypeStruct((b * c, hw_pad), f32),
        grid=(n_t,),
        in_specs=[
            pl.BlockSpec((b * c, tile), lambda t: (0, t)),
            pl.BlockSpec((b * c, b * c_n), lambda t: (0, 0)),
            pl.BlockSpec((b * c_n, b * c), lambda t: (0, 0)),
            pl.BlockSpec((b * c, 1), lambda t: (0, 0)),
        ],
        out_specs=pl.BlockSpec((b * c, tile), lambda t: (0, t)),
        compiler_params=pltpu.CompilerParams(
            dimension_semantics=("parallel",),
            vmem_limit_bytes=vmem_limit),
        cost_estimate=cost2,
    )(x2, gd2_bd, wv_bd, br_all)

    if needs_mask:
        out2 = out2[:, :hw]
    return out2.reshape(b, c, h, w)


def init_params(key, c1, c2, c3):
    """Deterministic kaiming_normal(mode='fan_out') init, zero biases."""
    k1, k2, k3, k4 = jax.random.split(key, 4)
    wa = jax.random.normal(k1, (c2, c1), jnp.float32) * jnp.sqrt(2.0 / c2)
    wb = jax.random.normal(k2, (c3, c1), jnp.float32) * jnp.sqrt(2.0 / c3)
    wv = jax.random.normal(k3, (c3, c1), jnp.float32) * jnp.sqrt(2.0 / c3)
    wr = jax.random.normal(k4, (c1, c2), jnp.float32) * jnp.sqrt(2.0 / c1)
    ba = jnp.zeros((c2, 1), jnp.float32)
    bb = jnp.zeros((c3, 1), jnp.float32)
    bv = jnp.zeros((c3, 1), jnp.float32)
    br = jnp.zeros((c1, 1), jnp.float32)
    return wa, ba, wb, bb, wv, bv, wr, br


def reference(x_nchw, params):
    """Pure-JAX reference matching the PyTorch forward semantics."""
    b, c, h, w = x_nchw.shape
    wa, ba, wb, bb, wv, bv, wr, br = params
    hp = lax.Precision.HIGHEST
    x = x_nchw.reshape(b, c, h * w)
    A = jnp.einsum('mc,bcn->bmn', wa, x, precision=hp) + ba[None]
    B = jnp.einsum('kc,bcn->bkn', wb, x, precision=hp) + bb[None]
    V = jnp.einsum('kc,bcn->bkn', wv, x, precision=hp) + bv[None]
    am = jax.nn.softmax(B, axis=0)   # implicit-dim softmax on 3-D -> dim 0
    av = jax.nn.softmax(V, axis=0)
    gd = jnp.einsum('bmn,bkn->bmk', A, am, precision=hp)
    z = jnp.einsum('bmk,bkn->bmn', gd, av, precision=hp)
    out = jnp.einsum('cm,bmn->bcn', wr, z, precision=hp) + br[None]
    return out.reshape(b, c, h, w)


if __name__ == "__main__":
    # Small shapes consistent with the module: c1=4 in-channels, c_m=c_n=32.
    b, c1, h, w = 2, 4, 16, 16
    c2 = c3 = 32

    key = jax.random.PRNGKey(0)
    kx, kp = jax.random.split(key)
    x = jax.random.normal(kx, (b, c1, h, w), jnp.float32)
    params = init_params(kp, c1, c2, c3)

    fwd = jax.jit(double_attention)
    out = jax.block_until_ready(fwd(x, params))

    assert out.shape == (b, c1, h, w)
    assert bool(jnp.all(jnp.isfinite(out)))

    ref = reference(x, params)
    max_err = jnp.max(jnp.abs(out - ref))
    assert bool(jnp.allclose(out, ref, rtol=1e-2, atol=1e-2)), (
        f"mismatch vs reference (max abs err {max_err})")

    print("KERNEL_OK")
</pallas_src>

<mosaic_0001>
module attributes {stable_mosaic.version = 11 : i64} {
  func.func @_gd_kernel(%arg0: i32, %arg1: i32, %arg2: memref<8x256xf32, #tpu.memory_space<vmem>>, %arg3: memref<128x8xf32, #tpu.memory_space<vmem>>, %arg4: memref<64x1xf32, #tpu.memory_space<vmem>>, %arg5: memref<1x64x64xf32, #tpu.memory_space<vmem>>) attributes {dimension_semantics = [#tpu.dimension_semantics<parallel>, #tpu.dimension_semantics<arbitrary>], iteration_bounds = array<i64: 1, 1>, scalar_prefetch = 0 : i64, scratch_operands = 0 : i64, tpu.core_type = #tpu.core_type<tc>, window_params = [{transform_indices = @transform_0, window_bounds = array<i64: 8, 256>}, {pipeline_mode = #tpu.pipeline_mode<synchronous>, transform_indices = @transform_1, window_bounds = array<i64: 128, 8>}, {pipeline_mode = #tpu.pipeline_mode<synchronous>, transform_indices = @transform_2, window_bounds = array<i64: 64, 1>}, {transform_indices = @transform_3, window_bounds = array<i64: 1, 64, 64>}]} {
    %c0_i32 = arith.constant 0 : i32
    %0 = arith.cmpi eq, %arg1, %c0_i32 : i32
    %1 = arith.extui %0 : i1 to i32
    %c0_i32_0 = arith.constant 0 : i32
    %2 = arith.cmpi ne, %1, %c0_i32_0 : i32
    scf.if %2 {
      %cst_13 = arith.constant 0.000000e+00 : f32
      %29 = vector.broadcast %cst_13 : f32 to vector<1x64x64xf32>
      %c0_14 = arith.constant 0 : index
      %c0_15 = arith.constant 0 : index
      %c0_16 = arith.constant 0 : index
      %30 = vector.load %arg5[%c0_14, %c0_15, %c0_16] : memref<1x64x64xf32, #tpu.memory_space<vmem>>, vector<1x64x64xf32>
      tpu.vector_store %arg5[%c0_14, %c0_15, %c0_16], %29 {strides = array<i32>} : memref<1x64x64xf32, #tpu.memory_space<vmem>>, vector<1x64x64xf32>,
    } else {
    }
    %c0 = arith.constant 0 : index
    %c0_1 = arith.constant 0 : index
    %3 = vector.load %arg3[%c0, %c0_1] : memref<128x8xf32, #tpu.memory_space<vmem>>, vector<128x8xf32>
    %c0_2 = arith.constant 0 : index
    %c0_3 = arith.constant 0 : index
    %4 = vector.load %arg2[%c0_2, %c0_3] : memref<8x256xf32, #tpu.memory_space<vmem>>, vector<8x256xf32>
    %cst = arith.constant dense<0.000000e+00> : vector<128x256xf32>
    %5 = tpu.matmul %3, %4, %cst {dimension_numbers = #tpu.dot_dimension_numbers<[1], [0], [0], [1], [0, 0, 1, 1], [], []>, precision = #tpu.contract_precision<fp32>} : vector<128x8xf32>, vector<8x256xf32>, vector<128x256xf32> -> vector<128x256xf32>
    %6 = vector.extract_strided_slice %5 {offsets = [0, 0], sizes = [64, 256], strides = [1, 1]} : vector<128x256xf32> to vector<64x256xf32>
    %c0_4 = arith.constant 0 : index
    %c0_5 = arith.constant 0 : index
    %7 = vector.load %arg4[%c0_4, %c0_5] : memref<64x1xf32, #tpu.memory_space<vmem>>, vector<64x1xf32>
    %8 = vector.broadcast %7 : vector<64x1xf32> to vector<64x256xf32>
    %9 = arith.addf %6, %8 : vector<64x256xf32>
    %10 = vector.extract_strided_slice %5 {offsets = [64, 0], sizes = [64, 256], strides = [1, 1]} : vector<128x256xf32> to vector<64x256xf32>
    %11 = vector.extract_strided_slice %10 {offsets = [0, 0], sizes = [32, 256], strides = [1, 1]} : vector<64x256xf32> to vector<32x256xf32>
    %12 = vector.extract_strided_slice %10 {offsets = [32, 0], sizes = [32, 256], strides = [1, 1]} : vector<64x256xf32> to vector<32x256xf32>
    %13 = arith.maximumf %11, %12 : vector<32x256xf32>
    %14 = tpu.concatenate %13, %13 in 0 : vector<32x256xf32>, vector<32x256xf32> -> vector<64x256xf32>
    %15 = arith.subf %10, %14 : vector<64x256xf32>
    %16 = math.exp %15 : vector<64x256xf32>
    %17 = vector.extract_strided_slice %16 {offsets = [0, 0], sizes = [32, 256], strides = [1, 1]} : vector<64x256xf32> to vector<32x256xf32>
    %18 = vector.extract_strided_slice %16 {offsets = [32, 0], sizes = [32, 256], strides = [1, 1]} : vector<64x256xf32> to vector<32x256xf32>
    %19 = arith.addf %17, %18 : vector<32x256xf32>
    %20 = tpu.concatenate %19, %19 in 0 : vector<32x256xf32>, vector<32x256xf32> -> vector<64x256xf32>
    %21 = arith.divf %16, %20 : vector<64x256xf32>
    %c0_6 = arith.constant 0 : index
    %c0_7 = arith.constant 0 : index
    %c0_8 = arith.constant 0 : index
    %22 = vector.load %arg5[%c0_6, %c0_7, %c0_8] : memref<1x64x64xf32, #tpu.memory_space<vmem>>, vector<1x64x64xf32>
    %23 = vector.shape_cast %22 : vector<1x64x64xf32> to vector<64x64xf32>
    %cst_9 = arith.constant dense<0.000000e+00> : vector<64x64xf32>
    %24 = tpu.matmul %9, %21, %cst_9 {dimension_numbers = #tpu.dot_dimension_numbers<[1], [1], [0], [0], [0, 0, 1, 0], [], []>, precision = #tpu.contract_precision<fp32>} : vector<64x256xf32>, vector<64x256xf32>, vector<64x64xf32> -> vector<64x64xf32>
    %25 = arith.addf %23, %24 : vector<64x64xf32>
    %c0_10 = arith.constant 0 : index
    %c0_11 = arith.constant 0 : index
    %c0_12 = arith.constant 0 : index
    %26 = vector.load %arg5[%c0_10, %c0_11, %c0_12] : memref<1x64x64xf32, #tpu.memory_space<vmem>>, vector<1x64x64xf32>
    %27 = vector.shape_cast %26 : vector<1x64x64xf32> to vector<64x64xf32>
    %28 = vector.shape_cast %25 : vector<64x64xf32> to vector<1x64x64xf32>
    tpu.vector_store %arg5[%c0_10, %c0_11, %c0_12], %28 {strides = array<i32>} : memref<1x64x64xf32, #tpu.memory_space<vmem>>, vector<1x64x64xf32>,
    return
  }
  func.func @transform_0(%arg0: i32, %arg1: i32) -> (i32, i32) {
    %c1_i32 = arith.constant 1 : i32
    %0 = arith.muli %arg0, %c1_i32 : i32
    %1 = arith.addi %0, %arg1 : i32
    %c0_i32 = arith.constant 0 : i32
    %c0_i32_0 = arith.constant 0 : i32
    return %c0_i32, %1 : i32, i32
  }
  func.func @transform_1(%arg0: i32, %arg1: i32) -> (i32, i32) {
    %c0_i32 = arith.constant 0 : i32
    %c0_i32_0 = arith.constant 0 : i32
    %c0_i32_1 = arith.constant 0 : i32
    return %c0_i32, %c0_i32_0 : i32, i32
  }
  func.func @transform_2(%arg0: i32, %arg1: i32) -> (i32, i32) {
    %c0_i32 = arith.constant 0 : i32
    %c0_i32_0 = arith.constant 0 : i32
    %c0_i32_1 = arith.constant 0 : i32
    return %c0_i32, %c0_i32_0 : i32, i32
  }
  func.func @transform_3(%arg0: i32, %arg1: i32) -> (i32, i32, i32) {
    %c0_i32 = arith.constant 0 : i32
    %c0_i32_0 = arith.constant 0 : i32
    %c0_i32_1 = arith.constant 0 : i32
    return %arg0, %c0_i32, %c0_i32_0 : i32, i32, i32
  }
}

module attributes {stable_mosaic.version = 11 : i64} {
  func.func @_out_kernel(%arg0: i32, %arg1: memref<8x256xf32, #tpu.memory_space<vmem>>, %arg2: memref<8x64xf32, #tpu.memory_space<vmem>>, %arg3: memref<64x8xf32, #tpu.memory_space<vmem>>, %arg4: memref<8x1xf32, #tpu.memory_space<vmem>>, %arg5: memref<8x256xf32, #tpu.memory_space<vmem>>) attributes {dimension_semantics = [#tpu.dimension_semantics<parallel>], iteration_bounds = array<i64: 1>, scalar_prefetch = 0 : i64, scratch_operands = 0 : i64, tpu.core_type = #tpu.core_type<tc>, window_params = [{transform_indices = @transform_0, window_bounds = array<i64: 8, 256>}, {pipeline_mode = #tpu.pipeline_mode<synchronous>, transform_indices = @transform_1, window_bounds = array<i64: 8, 64>}, {pipeline_mode = #tpu.pipeline_mode<synchronous>, transform_indices = @transform_2, window_bounds = array<i64: 64, 8>}, {pipeline_mode = #tpu.pipeline_mode<synchronous>, transform_indices = @transform_3, window_bounds = array<i64: 8, 1>}, {transform_indices = @transform_4, window_bounds = array<i64: 8, 256>}]} {
    %c0 = arith.constant 0 : index
    %c0_0 = arith.constant 0 : index
    %0 = vector.load %arg3[%c0, %c0_0] : memref<64x8xf32, #tpu.memory_space<vmem>>, vector<64x8xf32>
    %c0_1 = arith.constant 0 : index
    %c0_2 = arith.constant 0 : index
    %1 = vector.load %arg1[%c0_1, %c0_2] : memref<8x256xf32, #tpu.memory_space<vmem>>, vector<8x256xf32>
    %cst = arith.constant dense<0.000000e+00> : vector<64x256xf32>
    %2 = tpu.matmul %0, %1, %cst {dimension_numbers = #tpu.dot_dimension_numbers<[1], [0], [0], [1], [0, 0, 1, 1], [], []>, precision = #tpu.contract_precision<fp32>} : vector<64x8xf32>, vector<8x256xf32>, vector<64x256xf32> -> vector<64x256xf32>
    %3 = vector.extract_strided_slice %2 {offsets = [0, 0], sizes = [32, 256], strides = [1, 1]} : vector<64x256xf32> to vector<32x256xf32>
    %4 = vector.extract_strided_slice %2 {offsets = [32, 0], sizes = [32, 256], strides = [1, 1]} : vector<64x256xf32> to vector<32x256xf32>
    %5 = arith.maximumf %3, %4 : vector<32x256xf32>
    %6 = tpu.concatenate %5, %5 in 0 : vector<32x256xf32>, vector<32x256xf32> -> vector<64x256xf32>
    %7 = arith.subf %2, %6 : vector<64x256xf32>
    %8 = math.exp %7 : vector<64x256xf32>
    %9 = vector.extract_strided_slice %8 {offsets = [0, 0], sizes = [32, 256], strides = [1, 1]} : vector<64x256xf32> to vector<32x256xf32>
    %10 = vector.extract_strided_slice %8 {offsets = [32, 0], sizes = [32, 256], strides = [1, 1]} : vector<64x256xf32> to vector<32x256xf32>
    %11 = arith.addf %9, %10 : vector<32x256xf32>
    %12 = tpu.concatenate %11, %11 in 0 : vector<32x256xf32>, vector<32x256xf32> -> vector<64x256xf32>
    %13 = arith.divf %8, %12 : vector<64x256xf32>
    %c0_3 = arith.constant 0 : index
    %c0_4 = arith.constant 0 : index
    %14 = vector.load %arg2[%c0_3, %c0_4] : memref<8x64xf32, #tpu.memory_space<vmem>>, vector<8x64xf32>
    %cst_5 = arith.constant dense<0.000000e+00> : vector<8x256xf32>
    %15 = tpu.matmul %14, %13, %cst_5 {dimension_numbers = #tpu.dot_dimension_numbers<[1], [0], [0], [1], [0, 0, 1, 1], [], []>, precision = #tpu.contract_precision<fp32>} : vector<8x64xf32>, vector<64x256xf32>, vector<8x256xf32> -> vector<8x256xf32>
    %c0_6 = arith.constant 0 : index
    %c0_7 = arith.constant 0 : index
    %16 = vector.load %arg4[%c0_6, %c0_7] : memref<8x1xf32, #tpu.memory_space<vmem>>, vector<8x1xf32>
    %17 = vector.broadcast %16 : vector<8x1xf32> to vector<8x256xf32>
    %18 = arith.addf %15, %17 : vector<8x256xf32>
    %c0_8 = arith.constant 0 : index
    %c0_9 = arith.constant 0 : index
    %19 = vector.load %arg5[%c0_8, %c0_9] : memref<8x256xf32, #tpu.memory_space<vmem>>, vector<8x256xf32>
    tpu.vector_store %arg5[%c0_8, %c0_9], %18 {strides = array<i32>} : memref<8x256xf32, #tpu.memory_space<vmem>>, vector<8x256xf32>,
    return
  }
  func.func @transform_0(%arg0: i32) -> (i32, i32) {
    %c0_i32 = arith.constant 0 : i32
    %c0_i32_0 = arith.constant 0 : i32
    return %c0_i32, %arg0 : i32, i32
  }
  func.func @transform_1(%arg0: i32) -> (i32, i32) {
    %c0_i32 = arith.constant 0 : i32
    %c0_i32_0 = arith.constant 0 : i32
    %c0_i32_1 = arith.constant 0 : i32
    return %c0_i32, %c0_i32_0 : i32, i32
  }
  func.func @transform_2(%arg0: i32) -> (i32, i32) {
    %c0_i32 = arith.constant 0 : i32
    %c0_i32_0 = arith.constant 0 : i32
    %c0_i32_1 = arith.constant 0 : i32
    return %c0_i32, %c0_i32_0 : i32, i32
  }
  func.func @transform_3(%arg0: i32) -> (i32, i32) {
    %c0_i32 = arith.constant 0 : i32
    %c0_i32_0 = arith.constant 0 : i32
    %c0_i32_1 = arith.constant 0 : i32
    return %c0_i32, %c0_i32_0 : i32, i32
  }
  func.func @transform_4(%arg0: i32) -> (i32, i32) {
    %c0_i32 = arith.constant 0 : i32
    %c0_i32_0 = arith.constant 0 : i32
    return %c0_i32, %arg0 : i32, i32
  }
}

</mosaic_0001>

<bundles_post_ra>
// kernel: double_attention.3
= control target key start
LH: loop header
LB: loop body
LE: loop exit
PB: predicated region body
PF: predicated region fallthrough
CT: control target
= control target key end

     0   :  { %vm27_vm0 = vcmask 64512   ;;  %s2201_s0 = inlined_call_operand.vmem [shape: f32[8,256], index: 0, kind: input, shape index: {}]   ;;  %s2202_s2 = inlined_call_operand.vmem [shape: f32[64,8], index: 2, kind: input, shape index: {}]   ;;  %s2203_s1 = inlined_call_operand.vmem [shape: f32[8,64], index: 1, kind: input, shape index: {}]   ;;  %s2204_s3 = inlined_call_operand.vmem [shape: f32[8,1], index: 3, kind: input, shape index: {}]   ;;  %s2205_s4 = inlined_call_operand.vmem [shape: f32[8,256], index: 4, kind: output, shape index: {}]  }
   0x1   :  { %v25_v0 = vld [vmem:[%s2201_s0] sm:$0xff]  ;;  %v26_v1 = vld [vmem:[%s2201_s0 + $0x8] sm:$0xff]  ;;  %v19_v9 = vld [vmem:[%s2202_s2 + $0x10] sm:$0xff] }
   0x2   :  { %v17_v2 = vld [vmem:[%s2202_s2] sm:$0xff]  ;;  %v67_v3 = vand.u32 4294901760, %v25_v0  ;;  %v18_v5 = vld [vmem:[%s2202_s2 + $0x8] sm:$0xff]  ;;  %v430_v6 = vand.u32 4294901760, %v26_v1  ;;  %v35_v17 = vsel %vm27_vm0, %v19_v9, 0  ;;  %v20_v27 = vld [vmem:[%s2202_s2 + $0x18] sm:$0xff] }
   0x3   :  { %v29_v4 = vsel %vm27_vm0, %v17_v2, 0  ;;  %v32_v8 = vsel %vm27_vm0, %v18_v5, 0  ;;  %v1575_v23 = vand.u32 4294901760, %v35_v17  ;;  %v38_v30 = vsel %vm27_vm0, %v20_v27, 0  ;;  %v21_v34 = vld [vmem:[%s2202_s2 + $0x20] sm:$0xff]  ;;  %v22_v41 = vld [vmem:[%s2202_s2 + $0x28] sm:$0xff] }
   0x4   :  { %v1550_v7 = vand.u32 4294901760, %v29_v4  ;;  %v150_v10 = vsub.f32 %v25_v0, %v67_v3  ;;  %263 = vmatpush.msra.mxu3 %v67_v3  ;;  %68 = vmatpush.msra.mxu0 %v67_v3  ;;  %v1556_v11 = vand.u32 4294901760, %v32_v8  ;;  %v513_v12 = vsub.f32 %v26_v1, %v430_v6  ;;  %v23_v48 = vld [vmem:[%s2202_s2 + $0x30] sm:$0xff]  ;;  %v24_v55 = vld [vmem:[%s2202_s2 + $0x38] sm:$0xff] }
   0x5   :  { %v1587_v29 = vsub.f32 %v35_v17, %v1575_v23  ;;  %v1597_v33 = vand.u32 4294901760, %v38_v30  ;;  %v41_v37 = vsel %vm27_vm0, %v21_v34, 0  ;;  %v44_v44 = vsel %vm27_vm0, %v22_v41, 0 }
   0x6   :  { %v1559_v13 = vsub.f32 %v29_v4, %v1550_v7  ;;  %205 = vmatpush.msra.mxu2 %v150_v10  ;;  %v151_v14 = vand.u32 4294901760, %v150_v10  ;;  %v1562_v15 = vsub.f32 %v32_v8, %v1556_v11  ;;  %v514_v16 = vand.u32 4294901760, %v513_v12 }
   0x7   :  { %v1595_v32 = vand.u32 4294901760, %v1587_v29  ;;  %v1607_v36 = vsub.f32 %v38_v30, %v1597_v33  ;;  %v1615_v40 = vand.u32 4294901760, %v41_v37  ;;  %v1632_v47 = vand.u32 4294901760, %v44_v44 }
   0x8   :  { %208 = vmatmul.f32.vlgmr.msra.gmra.mxu2 %v1559_v13  ;;  %v1567_v18 = vand.u32 4294901760, %v1559_v13  ;;  %v152_v19 = vsub.f32 %v150_v10, %v151_v14  ;;  %331 = vmatpush.msrb.mxu0 %v151_v14  ;;  %v515_v20 = vsub.f32 %v513_v12, %v514_v16  ;;  %v1573_v22 = vand.u32 4294901760, %v1562_v15 }
   0x9   :  { %431 = vmatpush.msrb.mxu2 %v430_v6  ;;  %v88_v35 = vsub.f32 %v1587_v29, %v1595_v32  ;;  %v1613_v39 = vand.u32 4294901760, %v1607_v36  ;;  %v1624_v43 = vsub.f32 %v41_v37, %v1615_v40  ;;  %v1641_v50 = vsub.f32 %v44_v44, %v1632_v47 }
   0xa   :  { %267 = vmatmul.f32.vlgmr.msra.gmra.mxu3 %v1567_v18  ;;  %v72_v21 = vsub.f32 %v1559_v13, %v1567_v18  ;;  %v153_v24 = vand.u32 4294901760, %v152_v19  ;;  %v516_v25 = vand.u32 4294901760, %v515_v20  ;;  %v80_v28 = vsub.f32 %v1562_v15, %v1573_v22 }
   0xb   :  { %694 = vmatpush.msra.mxu2 %v514_v16  ;;  %v89_v38 = vand.u32 4294901760, %v88_v35  ;;  %v96_v42 = vsub.f32 %v1607_v36, %v1613_v39  ;;  %v1630_v46 = vand.u32 4294901760, %v1624_v43  ;;  %v47_v51 = vsel %vm27_vm0, %v23_v48, 0 }
   0xc   :  { %v1577_v26 = vand.u32 4294901760, %v72_v21  ;;  %154 = vmatpush.msra.mxu1 %v153_v24  ;;  %517 = vmatpush.msrb.mxu3 %v516_v25  ;;  %v1592_v31 = vand.u32 4294901760, %v80_v28  ;;  %v1647_v53 = vand.u32 4294901760, %v1641_v50  ;;  %v1649_v54 = vand.u32 4294901760, %v47_v51 }
   0xd   :  { %156 = vmatmul.f32.vlgmr.msra.gmra.mxu1 %v1550_v7  ;;  %v97_v45 = vand.u32 4294901760, %v96_v42  ;;  %v104_v49 = vsub.f32 %v1624_v43, %v1630_v46  ;;  %v50_v58 = vsel %vm27_vm0, %v24_v55, 0 }
   0xe   :  { %74 = vmatmul.f32.vlgmr.msra.gmra.mxu0 %v1577_v26  ;;  %381 = vmatpush.msrb.mxu1 %v67_v3  ;;  %v112_v56 = vsub.f32 %v1641_v50, %v1647_v53  ;;  %v1658_v57 = vsub.f32 %v47_v51, %v1649_v54  ;;  %v1666_v61 = vand.u32 4294901760, %v50_v58 }
   0xf   :  { %568 = vmatpush.msra.mxu0 %v513_v12  ;;  %744 = vmatpush.msra.mxu3 %v430_v6  ;;  %v105_v52 = vand.u32 4294901760, %v104_v49 }
  0x10   :  { %213 = vmatmul.f32.gmra.mxu2 %v1562_v15  ;;  %626 = vmatpush.msra.mxu1 %v430_v6  ;;  %v113_v59 = vand.u32 4294901760, %v112_v56  ;;  %v1664_v60 = vand.u32 4294901760, %v1658_v57  ;;  %v1672_v63 = vsub.f32 %v50_v58, %v1666_v61 }
  0x12   :  { %273 = vmatmul.f32.gmra.mxu3 %v1573_v22  ;;  %v120_v62 = vsub.f32 %v1658_v57, %v1664_v60  ;;  %v1677_v1 = vand.u32 4294901760, %v1672_v63 }
  0x14   :  { %v121_v0 = vand.u32 4294901760, %v120_v62  ;;  %v128_v2 = vsub.f32 %v1672_v63, %v1677_v1 }
  0x15   :  { %160 = vmatmul.f32.gmra.mxu1 %v1556_v11 }
  0x16   :  { %82 = vmatmul.f32.gmra.mxu0 %v1592_v31  ;;  %v129_v3 = vand.u32 4294901760, %v128_v2 }
  0x18   :  { %218 = vmatmul.f32.gmra.mxu2 %v1587_v29 }
  0x1a   :  { %279 = vmatmul.f32.gmra.mxu3 %v1595_v32 }
  0x1d   :  { %164 = vmatmul.f32.gmra.mxu1 %v1575_v23 }
  0x1e   :  { %90 = vmatmul.f32.gmra.mxu0 %v89_v38 }
  0x20   :  { %223 = vmatmul.f32.gmra.mxu2 %v1607_v36 }
  0x22   :  { %285 = vmatmul.f32.gmra.mxu3 %v1613_v39 }
  0x25   :  { %168 = vmatmul.f32.gmra.mxu1 %v1597_v33 }
  0x26   :  { %98 = vmatmul.f32.gmra.mxu0 %v97_v45 }
  0x28   :  { %228 = vmatmul.f32.gmra.mxu2 %v1624_v43 }
  0x2a   :  { %291 = vmatmul.f32.gmra.mxu3 %v1630_v46 }
  0x2d   :  { %172 = vmatmul.f32.gmra.mxu1 %v1615_v40 }
  0x2e   :  { %106 = vmatmul.f32.gmra.mxu0 %v105_v52 }
  0x30   :  { %233 = vmatmul.f32.gmra.mxu2 %v1641_v50 }
  0x32   :  { %297 = vmatmul.f32.gmra.mxu3 %v1647_v53 }
  0x35   :  { %176 = vmatmul.f32.gmra.mxu1 %v1632_v47 }
  0x36   :  { %114 = vmatmul.f32.gmra.mxu0 %v113_v59 }
  0x38   :  { %238 = vmatmul.f32.gmra.mxu2 %v1658_v57 }
  0x3a   :  { %303 = vmatmul.f32.gmra.mxu3 %v1664_v60 }
  0x3d   :  { %180 = vmatmul.f32.gmra.mxu1 %v1649_v54 }
  0x3e   :  { %122 = vmatmul.f32.gmra.mxu0 %v121_v0 }
  0x40   :  { %243 = vmatmul.f32.gmra.mxu2 %v1672_v63 }
  0x42   :  { %309 = vmatmul.f32.gmra.mxu3 %v1677_v1 }
  0x45   :  { %184 = vmatmul.f32.gmra.mxu1 %v1666_v61 }
  0x46   :  { %130 = vmatmul.f32.gmra.mxu0 %v129_v3 }
  0x48   :  { %437 = vmatmul.f32.vlgmr.msrb.gmra.mxu2 %v1577_v26 }
  0x4a   :  { %519 = vmatmul.f32.vlgmr.msrb.gmra.mxu3 %v1550_v7 }
  0x4d   :  { %383 = vmatmul.f32.vlgmr.msrb.gmra.mxu1 %v1550_v7 }
  0x4e   :  { %333 = vmatmul.f32.vlgmr.msrb.gmra.mxu0 %v1550_v7 }
  0x50   :  { %445 = vmatmul.f32.gmra.mxu2 %v1592_v31 }
  0x52   :  { %523 = vmatmul.f32.gmra.mxu3 %v1556_v11 }
  0x55   :  { %387 = vmatmul.f32.gmra.mxu1 %v1556_v11 }
  0x56   :  { %337 = vmatmul.f32.gmra.mxu0 %v1556_v11 }
  0x58   :  { %453 = vmatmul.f32.gmra.mxu2 %v89_v38 }
  0x5a   :  { %527 = vmatmul.f32.gmra.mxu3 %v1575_v23 }
  0x5d   :  { %391 = vmatmul.f32.gmra.mxu1 %v1575_v23 }
  0x5e   :  { %341 = vmatmul.f32.gmra.mxu0 %v1575_v23 }
  0x60   :  { %461 = vmatmul.f32.gmra.mxu2 %v97_v45 }
  0x62   :  { %531 = vmatmul.f32.gmra.mxu3 %v1597_v33 }
  0x65   :  { %395 = vmatmul.f32.gmra.mxu1 %v1597_v33 }
  0x66   :  { %345 = vmatmul.f32.gmra.mxu0 %v1597_v33 }
  0x68   :  { %469 = vmatmul.f32.gmra.mxu2 %v105_v52 }
  0x6a   :  { %535 = vmatmul.f32.gmra.mxu3 %v1615_v40 }
  0x6d   :  { %399 = vmatmul.f32.gmra.mxu1 %v1615_v40 }
  0x6e   :  { %349 = vmatmul.f32.gmra.mxu0 %v1615_v40 }
  0x70   :  { %477 = vmatmul.f32.gmra.mxu2 %v113_v59 }
  0x72   :  { %539 = vmatmul.f32.gmra.mxu3 %v1632_v47 }
  0x75   :  { %403 = vmatmul.f32.gmra.mxu1 %v1632_v47 }
  0x76   :  { %353 = vmatmul.f32.gmra.mxu0 %v1632_v47 }
  0x78   :  { %485 = vmatmul.f32.gmra.mxu2 %v121_v0 }
  0x7a   :  { %543 = vmatmul.f32.gmra.mxu3 %v1649_v54 }
  0x7d   :  { %407 = vmatmul.f32.gmra.mxu1 %v1649_v54 }
  0x7e   :  { %357 = vmatmul.f32.gmra.mxu0 %v1649_v54 }
  0x80   :  { %493 = vmatmul.f32.gmra.mxu2 %v129_v3 }
  0x82   :  { %547 = vmatmul.f32.gmra.mxu3 %v1666_v61 }
  0x85   :  { %411 = vmatmul.f32.gmra.mxu1 %v1666_v61 }
  0x86   :  { %361 = vmatmul.f32.gmra.mxu0 %v1666_v61 }
  0x88   :  { %696 = vmatmul.f32.vlgmr.msra.gmra.mxu2 %v1550_v7 }
  0x8a   :  { %746 = vmatmul.f32.vlgmr.msra.gmra.mxu3 %v1550_v7  ;;  %v1715_v5 = vpop.f32.mrf.mxu1 }
  0x8b   :  { %v1713_v4 = vpop.f32.mrf.mxu0  ;;  %v1717_v6 = vpop.f32.mrf.mxu2 }
  0x8d   :  { %v1719_v8 = vpop.f32.mrf.mxu3  ;;  %630 = vmatmul.f32.vlgmr.msra.gmra.mxu1 %v1567_v18 }
  0x8e   :  { %571 = vmatmul.f32.vlgmr.msra.gmra.mxu0 %v1559_v13 }
  0x90   :  { %700 = vmatmul.f32.gmra.mxu2 %v1556_v11 }
  0x92   :  { %750 = vmatmul.f32.gmra.mxu3 %v1556_v11  ;;  %v1727_v10 = vpop.f32.mrf.mxu1 }
  0x93   :  { %v1725_v9 = vpop.f32.mrf.mxu0  ;;  %v1729_v7 = vpop.f32.mrf.mxu2 }
  0x95   :  { %v1731_v12 = vpop.f32.mrf.mxu3  ;;  %636 = vmatmul.f32.gmra.mxu1 %v1573_v22 }
  0x96   :  { %576 = vmatmul.f32.gmra.mxu0 %v1562_v15 }
  0x98   :  { %704 = vmatmul.f32.gmra.mxu2 %v1575_v23 }
  0x9a   :  { %754 = vmatmul.f32.gmra.mxu3 %v1575_v23  ;;  %v1739_v14 = vpop.f32.mrf.mxu1 }
  0x9b   :  { %v1737_v13 = vpop.f32.mrf.mxu0  ;;  %v1741_v11 = vpop.f32.mrf.mxu2 }
  0x9d   :  { %v1743_v16 = vpop.f32.mrf.mxu3  ;;  %642 = vmatmul.f32.gmra.mxu1 %v1595_v32 }
  0x9e   :  { %581 = vmatmul.f32.gmra.mxu0 %v1587_v29 }
  0xa0   :  { %708 = vmatmul.f32.gmra.mxu2 %v1597_v33 }
  0xa2   :  { %758 = vmatmul.f32.gmra.mxu3 %v1597_v33  ;;  %v169_v17 = vpop.f32.mrf.mxu1 }
  0xa3   :  { %v99_v15 = vpop.f32.mrf.mxu0  ;;  %v224_v19 = vpop.f32.mrf.mxu2 }
  0xa4   :  { %v170_v18 = vadd.f32 %v169_v17, %v99_v15 }
  0xa5   :  { %v286_v20 = vpop.f32.mrf.mxu3  ;;  %648 = vmatmul.f32.gmra.mxu1 %v1613_v39 }
  0xa6   :  { %v225_v21 = vadd.f32 %v224_v19, %v170_v18  ;;  %586 = vmatmul.f32.gmra.mxu0 %v1607_v36  ;;  %v162_v19 = vadd.f32 %v1727_v10, %v1725_v9 }
  0xa8   :  { %v1751_v22 = vadd.f32 %v286_v20, %v225_v21  ;;  %712 = vmatmul.f32.gmra.mxu2 %v1615_v40 }
  0xaa   :  { %762 = vmatmul.f32.gmra.mxu3 %v1615_v40  ;;  %v173_v24 = vpop.f32.mrf.mxu1 }
  0xab   :  { %v107_v23 = vpop.f32.mrf.mxu0  ;;  %v229_v26 = vpop.f32.mrf.mxu2 }
  0xac   :  { %v174_v25 = vadd.f32 %v173_v24, %v107_v23  ;;  %v215_v24 = vadd.f32 %v1729_v7, %v162_v19 }
  0xad   :  { %v292_v27 = vpop.f32.mrf.mxu3  ;;  %654 = vmatmul.f32.gmra.mxu1 %v1630_v46 }
  0xae   :  { %v230_v28 = vadd.f32 %v229_v26, %v174_v25  ;;  %591 = vmatmul.f32.gmra.mxu0 %v1624_v43 }
  0xb0   :  { %v293_v29 = vadd.f32 %v292_v27, %v230_v28  ;;  %716 = vmatmul.f32.gmra.mxu2 %v1632_v47  ;;  %v275_v28 = vadd.f32 %v1731_v12, %v215_v24 }
  0xb2   :  { %766 = vmatmul.f32.gmra.mxu3 %v1632_v47  ;;  %v177_v31 = vpop.f32.mrf.mxu1 }
  0xb3   :  { %v115_v30 = vpop.f32.mrf.mxu0  ;;  %v234_v33 = vpop.f32.mrf.mxu2 }
  0xb4   :  { %v178_v32 = vadd.f32 %v177_v31, %v115_v30 }
  0xb5   :  { %v298_v34 = vpop.f32.mrf.mxu3  ;;  %660 = vmatmul.f32.gmra.mxu1 %v1647_v53 }
  0xb6   :  { %v235_v35 = vadd.f32 %v234_v33, %v178_v32  ;;  %596 = vmatmul.f32.gmra.mxu0 %v1641_v50 }
  0xb8   :  { %v1761_v36 = vadd.f32 %v298_v34, %v235_v35  ;;  %720 = vmatmul.f32.gmra.mxu2 %v1649_v54 }
  0xba   :  { %770 = vmatmul.f32.gmra.mxu3 %v1649_v54  ;;  %v181_v38 = vpop.f32.mrf.mxu1 }
  0xbb   :  { %v123_v37 = vpop.f32.mrf.mxu0  ;;  %v239_v40 = vpop.f32.mrf.mxu2 }
  0xbc   :  { %v182_v39 = vadd.f32 %v181_v38, %v123_v37 }
  0xbd   :  { %v304_v41 = vpop.f32.mrf.mxu3  ;;  %666 = vmatmul.f32.gmra.mxu1 %v1664_v60 }
  0xbe   :  { %v240_v42 = vadd.f32 %v239_v40, %v182_v39  ;;  %601 = vmatmul.f32.gmra.mxu0 %v1658_v57 }
  0xc0   :  { %v1767_v43 = vadd.f32 %v304_v41, %v240_v42  ;;  %724 = vmatmul.f32.gmra.mxu2 %v1666_v61 }
  0xc2   :  { %774 = vmatmul.f32.gmra.mxu3 %v1666_v61  ;;  %v185_v45 = vpop.f32.mrf.mxu1 }
  0xc3   :  { %v131_v44 = vpop.f32.mrf.mxu0  ;;  %v1771_v46 = vpop.f32.mrf.mxu2 }
  0xc4   :  { %v186_v41 = vadd.f32 %v185_v45, %v131_v44 }
  0xc5   :  { %v1773_v47 = vpop.f32.mrf.mxu3  ;;  %672 = vmatmul.f32.gmra.mxu1 %v1677_v1 }
  0xc6   :  { %606 = vmatmul.f32.gmra.mxu0 %v1672_v63  ;;  %v158_v63 = vadd.f32 %v1715_v5, %v1713_v4 }
  0xc8   :  { %v210_v2 = vadd.f32 %v1717_v6, %v158_v63 }
  0xca   :  { %v384_v49 = vpop.f32.mrf.mxu1  ;;  %v269_v18 = vadd.f32 %v1719_v8, %v210_v2  ;;  %v166_v8 = vadd.f32 %v1739_v14, %v1737_v13 }
  0xcb   :  { %v334_v48 = vpop.f32.mrf.mxu0  ;;  %v438_v50 = vpop.f32.mrf.mxu2 }
  0xcc   :  { %v335_v20 = vadd.f32 %v334_v48, %v269_v18  ;;  %v220_v7 = vadd.f32 %v1741_v11, %v166_v8 }
  0xcd   :  { %v520_v51 = vpop.f32.mrf.mxu3 }
  0xce   :  { %v1777_v52 = vadd.f32 %v520_v51, %v438_v50  ;;  %v385_v26 = vadd.f32 %v384_v49, %v335_v20  ;;  %v281_v13 = vadd.f32 %v1743_v16, %v220_v7 }
  0xd2   :  { %v388_v54 = vpop.f32.mrf.mxu1 }
  0xd3   :  { %v338_v53 = vpop.f32.mrf.mxu0  ;;  %v446_v55 = vpop.f32.mrf.mxu2 }
  0xd4   :  { %v339_v31 = vadd.f32 %v338_v53, %v275_v28 }
  0xd5   :  { %v524_v56 = vpop.f32.mrf.mxu3 }
  0xd6   :  { %v1779_v57 = vadd.f32 %v524_v56, %v446_v55  ;;  %v389_v39 = vadd.f32 %v388_v54, %v339_v31  ;;  %v245_v56 = vadd.f32 %v1771_v46, %v186_v41 }
  0xda   :  { %v392_v59 = vpop.f32.mrf.mxu1 }
  0xdb   :  { %v342_v58 = vpop.f32.mrf.mxu0  ;;  %v454_v60 = vpop.f32.mrf.mxu2 }
  0xdc   :  { %v343_v42 = vadd.f32 %v342_v58, %v281_v13 }
  0xdd   :  { %v528_v61 = vpop.f32.mrf.mxu3 }
  0xde   :  { %v1781_v62 = vadd.f32 %v528_v61, %v454_v60  ;;  %v393_v16 = vadd.f32 %v392_v59, %v343_v42 }
  0xe2   :  { %v1785_v1 = vpop.f32.mrf.mxu1 }
  0xe3   :  { %v346_v0 = vpop.f32.mrf.mxu0  ;;  %v462_v3 = vpop.f32.mrf.mxu2 }
  0xe4   :  { %v347_v2 = vadd.f32 %v346_v0, %v1751_v22 }
  0xe5   :  { %v532_v15 = vpop.f32.mrf.mxu3 }
  0xe6   :  { %v1788_v17 = vadd.f32 %v532_v15, %v462_v3 }
  0xea   :  { %v400_v23 = vpop.f32.mrf.mxu1 }
  0xeb   :  { %v350_v21 = vpop.f32.mrf.mxu0  ;;  %v470_v5 = vpop.f32.mrf.mxu2 }
  0xec   :  { %v351_v4 = vadd.f32 %v350_v21, %v293_v29 }
  0xed   :  { %v536_v25 = vpop.f32.mrf.mxu3 }
  0xee   :  { %v401_v27 = vadd.f32 %v400_v23, %v351_v4  ;;  %v1794_v6 = vadd.f32 %v536_v25, %v470_v5 }
  0xf0   :  { %v778_v30 = vmax.f32 %v385_v26, %v401_v27 }
  0xf2   :  { %v786_v9 = vsub.f32 %v385_v26, %v778_v30  ;;  %v794_v10 = vsub.f32 %v401_v27, %v778_v30  ;;  %v404_v33 = vpop.f32.mrf.mxu1 }
  0xf3   :  { %v354_v32 = vpop.f32.mrf.mxu0  ;;  %v478_v37 = vpop.f32.mrf.mxu2 }
  0xf4   :  { %v802_v29 = vmul.f32 1.442695, %v786_v9  ;;  %v818_v34 = vmul.f32 1.442695, %v794_v10  ;;  %v355_v35 = vadd.f32 %v354_v32, %v1761_v36 }
  0xf5   :  { %v540_v38 = vpop.f32.mrf.mxu3 }
  0xf6   :  { %v405_v40 = vadd.f32 %v404_v33, %v355_v35  ;;  %v1801_v12 = vadd.f32 %v540_v38, %v478_v37  ;;  %1463 = vpow2.f32 %v802_v29 }
  0xf7   :  { %1465 = vpow2.f32 %v818_v34 }
  0xf8   :  { %v780_v14 = vmax.f32 %v389_v39, %v405_v40 }
  0xfa   :  { %v788_v48 = vsub.f32 %v389_v39, %v780_v14  ;;  %v796_v49 = vsub.f32 %v405_v40, %v780_v14  ;;  %v408_v50 = vpop.f32.mrf.mxu1 }
  0xfb   :  { %v358_v11 = vpop.f32.mrf.mxu0  ;;  %v486_v55 = vpop.f32.mrf.mxu2 }
  0xfc   :  { %v806_v51 = vmul.f32 1.442695, %v788_v48  ;;  %v822_v53 = vmul.f32 1.442695, %v796_v49  ;;  %v359_v36 = vadd.f32 %v358_v11, %v1767_v43  ;;  %v1805_v54 = vpop.eup %1463  ;;  %v311_v43 = vadd.f32 %v1773_v47, %v245_v56 }
  0xfd   :  { %v544_v60 = vpop.f32.mrf.mxu3  ;;  %v1808_v61 = vpop.eup %1465  ;;  %v397_v47 = vadd.f32 %v1785_v1, %v347_v2 }
  0xfe   :  { %1467 = vpow2.f32 %v806_v51  ;;  %v409_v44 = vadd.f32 %v408_v50, %v359_v36  ;;  %v1810_v45 = vadd.f32 %v544_v60, %v486_v55  ;;  %v1814_v63 = vadd.f32 %v1808_v61, %v1805_v54 }
  0xff   :  { %1469 = vpow2.f32 %v822_v53 }
 0x100   :  { %v782_v58 = vmax.f32 %v393_v16, %v409_v44  ;;  %1471 = vrcp.f32 %v1814_v63  ;;  %v853_v51 = vand.u32 2147483648, %v1814_v63  ;;  %vm847_vm6 = vweird.f32 %v1814_v63 }
 0x102   :  { %v790_v3 = vsub.f32 %v393_v16, %v782_v58  ;;  %v798_v46 = vsub.f32 %v409_v44, %v782_v58  ;;  %v412_v18 = vpop.f32.mrf.mxu1 }
 0x103   :  { %v362_v15 = vpop.f32.mrf.mxu0  ;;  %v1820_v23 = vpop.f32.mrf.mxu2 }
 0x104   :  { %v1818_v19 = vpop.eup %1467  ;;  %v810_v59 = vmul.f32 1.442695, %v790_v3  ;;  %v826_v20 = vmul.f32 1.442695, %v798_v46  ;;  %v363_v21 = vadd.f32 %v362_v15, %v311_v43  ;;  %v851_v15 = vand.u32 2147483647, %v1814_v63 }
 0x105   :  { %v1822_v24 = vpop.eup %1469  ;;  %v1825_v4 = vpop.f32.mrf.mxu3 }
 0x106   :  { %v1830_v22 = vadd.f32 %v1822_v24, %v1818_v19  ;;  %1473 = vpow2.f32 %v810_v59  ;;  %v413_v0 = vadd.f32 %v412_v18, %v363_v21  ;;  %v1833_v27 = vpop.eup %1471  ;;  %vm852_vm12 = vcmp.eq.f32.partialorder %v851_v15, 8.507059e+37 }
 0x107   :  { %1475 = vpow2.f32 %v826_v20  ;;  %v843_v29 = vmul.f32 %v1833_v27, %v1814_v63  ;;  %vm848_vm2 = vweird.f32 %v1833_v27 }
 0x108   :  { %1477 = vrcp.f32 %v1830_v22  ;;  %v784_v5 = vmax.f32 %v397_v47, %v413_v0  ;;  %vm877_vm3 = vweird.f32 %v1830_v22  ;;  %v883_v56 = vand.u32 2147483648, %v1830_v22  ;;  %vm1888_vm8 = vmor %vm847_vm6, %vm848_vm2 }
 0x109   :  { %v844_v37 = vsub.f32 1.0, %v843_v29  ;;  %v881_v2 = vand.u32 2147483647, %v1830_v22 }
 0x10a   :  { %v792_v25 = vsub.f32 %v397_v47, %v784_v5  ;;  %v800_v26 = vsub.f32 %v413_v0, %v784_v5  ;;  %v1837_v8 = vpop.f32.mrf.mxu1  ;;  %v884_v0 = vor.u32 1.1754944e-38, %v883_v56  ;;  %v854_v5 = vor.u32 1.1754944e-38, %v853_v51 }
 0x10b   :  { %v1835_v28 = vpop.f32.mrf.mxu0  ;;  %v1841_v9 = vpop.f32.mrf.mxu2  ;;  %v845_v11 = vmul.f32 %v1833_v27, %v844_v37  ;;  %vm882_vm11 = vcmp.eq.f32.partialorder %v881_v2, 8.507059e+37 }
 0x10c   :  { %v1839_v30 = vpop.eup %1473  ;;  %v814_v1 = vmul.f32 1.442695, %v792_v25  ;;  %v830_v31 = vmul.f32 1.442695, %v800_v26 }
 0x10d   :  { %v1476_v10 = vpop.eup %1475  ;;  %v1843_v32 = vpop.f32.mrf.mxu3  ;;  %v846_v60 = vadd.f32 %v1833_v27, %v845_v11 }
 0x10e   :  { %v1478_v33 = vpop.eup %1477  ;;  %v838_v7 = vadd.f32 %v1476_v10, %v1839_v30  ;;  %1479 = vpow2.f32 %v814_v1 }
 0x10f   :  { %1481 = vpow2.f32 %v830_v31  ;;  %v873_v34 = vmul.f32 %v1478_v33, %v1830_v22  ;;  %vm878_vm1 = vweird.f32 %v1478_v33  ;;  %v850_v63 = vsel %vm1888_vm8, %v1833_v27, %v846_v60 }
 0x110   :  { %1483 = vrcp.f32 %v838_v7  ;;  %v913_v55 = vand.u32 2147483648, %v838_v7  ;;  %v911_v43 = vand.u32 2147483647, %v838_v7  ;;  %vm1876_vm5 = vmor %vm877_vm3, %vm878_vm1  ;;  %vm907_vm7 = vweird.f32 %v838_v7 }
 0x111   :  { %v874_v35 = vsub.f32 1.0, %v873_v34  ;;  %v855_v29 = vsel %vm852_vm12, %v854_v5, %v850_v63  ;;  %vm977_vm1 = vcmask 523264  }
 0x112   :  { %v1851_v39 = vpop.f32.mrf.mxu1  ;;  %v914_v22 = vor.u32 1.1754944e-38, %v913_v55  ;;  %vm912_vm10 = vcmp.eq.f32.partialorder %v911_v43, 8.507059e+37 }
 0x113   :  { %v1849_v38 = vpop.f32.mrf.mxu0  ;;  %v1855_v13 = vpop.f32.mrf.mxu2  ;;  %v875_v42 = vmul.f32 %v1478_v33, %v874_v35 }
 0x114   :  { %v1853_v40 = vpop.eup %1479  ;;  %v578_v21 = vadd.f32 %v1849_v38, %v1779_v57 }
 0x115   :  { %v1857_v14 = vpop.eup %1481  ;;  %v1859_v41 = vpop.f32.mrf.mxu3  ;;  %v876_v36 = vadd.f32 %v1478_v33, %v875_v42 }
 0x116   :  { %v1484_v48 = vpop.eup %1483  ;;  %v840_v49 = vadd.f32 %v1857_v14, %v1853_v40 }
 0x117   :  { %v903_v50 = vmul.f32 %v1484_v48, %v838_v7  ;;  %vm908_vm4 = vweird.f32 %v1484_v48  ;;  %v880_v20 = vsel %vm1876_vm5, %v1478_v33, %v876_v36  ;;  %v573_v36 = vadd.f32 %v1835_v28, %v1777_v52 }
 0x118   :  { %1485 = vrcp.f32 %v840_v49  ;;  %vm909_vm9 = vmor %vm907_vm7, %vm908_vm4  ;;  %v885_v31 = vsel %vm882_vm11, %v884_v0, %v880_v20  ;;  %v943_v34 = vand.u32 2147483648, %v840_v49  ;;  %v941_v11 = vand.u32 2147483647, %v840_v49 }
 0x119   :  { %v904_v53 = vsub.f32 1.0, %v903_v50  ;;  %v964_v27 = vmul.f32 %v1822_v24, %v885_v31  ;;  %vm937_vm14 = vweird.f32 %v840_v49  ;;  %v632_v52 = vadd.f32 %v1837_v8, %v573_v36 }
 0x11a   :  { %v1871_v44 = vpop.f32.mrf.mxu1  ;;  %v944_v55 = vor.u32 1.1754944e-38, %v943_v34  ;;  %vm942_vm0 = vcmp.eq.f32.partialorder %v941_v11, 8.507059e+37 }
 0x11b   :  { %v1869_v16 = vpop.f32.mrf.mxu0  ;;  %v905_v58 = vmul.f32 %v1484_v48, %v904_v53  ;;  %v1874_v3 = vpop.f32.mrf.mxu2  ;;  %v1909_v60 = vand.u32 4294901760, %v964_v27 }
 0x11d   :  { %v1882_v18 = vpop.f32.mrf.mxu3  ;;  %v906_v59 = vadd.f32 %v1484_v48, %v905_v58 }
 0x11e   :  { %v1486_v47 = vpop.eup %1485 }
 0x11f   :  { %v933_v25 = vmul.f32 %v1486_v47, %v840_v49  ;;  %v910_v26 = vsel %vm909_vm9, %v1484_v48, %v906_v59  ;;  %vm938_vm13 = vweird.f32 %v1486_v47  ;;  %v962_v48 = vmul.f32 %v1808_v61, %v855_v29 }
 0x120   :  { %v915_v1 = vsel %vm912_vm10, %v914_v22, %v910_v26  ;;  %vm939_vm15 = vmor %vm937_vm14, %vm938_vm13  ;;  %v1923_v59 = vsub.f32 %v964_v27, %v1909_v60  ;;  %v638_v26 = vadd.f32 %v1851_v39, %v578_v21 }
 0x121   :  { %v934_v33 = vsub.f32 1.0, %v933_v25  ;;  %v966_v7 = vmul.f32 %v1476_v10, %v915_v1  ;;  %v1911_v58 = vand.u32 4294901760, %v962_v48  ;;  %v916_v2 = vmul.f32 %v1839_v30, %v915_v1 }
 0x122   :  { %v1897_v37 = vpop.f32.mrf.mxu1  ;;  %v856_v30 = vmul.f32 %v1805_v54, %v855_v29  ;;  %v1036_v25 = vand.u32 4294901760, %v1923_v59 }
 0x123   :  { %v1895_v35 = vpop.f32.mrf.mxu0  ;;  %v935_v42 = vmul.f32 %v1486_v47, %v934_v33  ;;  %v1900_v50 = vpop.f32.mrf.mxu2  ;;  %v1905_v10 = vand.u32 4294901760, %v966_v7  ;;  %v1938_v0 = vsub.f32 %v962_v48, %v1911_v58 }
 0x124   :  { %v1037_v48 = vsub.f32 %v1923_v59, %v1036_v25 }
 0x125   :  { %v1903_v51 = vpop.f32.mrf.mxu3  ;;  %v936_v53 = vadd.f32 %v1486_v47, %v935_v42  ;;  %v1915_v43 = vsub.f32 %v966_v7, %v1905_v10  ;;  %v1042_v39 = vand.u32 4294901760, %v1938_v0 }
 0x127   :  { %v940_v56 = vsel %vm939_vm15, %v1486_v47, %v936_v53  ;;  %v1030_v57 = vand.u32 4294901760, %v1915_v43 }
 0x128   :  { %v945_v24 = vsel %vm942_vm0, %v944_v55, %v940_v56 }
 0x129   :  { %v968_v61 = vmul.f32 %v1857_v14, %v945_v24  ;;  %v946_v49 = vmul.f32 %v1853_v40, %v945_v24  ;;  %v886_v14 = vmul.f32 %v1818_v19, %v885_v31  ;;  %v1940_v19 = vand.u32 4294901760, %v916_v2 }
 0x12a   :  { %v655_v15 = vpop.f32.mrf.mxu1  ;;  %v1031_v33 = vsub.f32 %v1915_v43, %v1030_v57 }
 0x12b   :  { %v592_v28 = vpop.f32.mrf.mxu0  ;;  %v1920_v46 = vand.u32 4294901760, %v968_v61  ;;  %v1925_v20 = vand.u32 4294901760, %v946_v49  ;;  %v713_v47 = vpop.f32.mrf.mxu2  ;;  %v1950_v5 = vand.u32 4294901760, %v886_v14  ;;  %v1966_v7 = vsub.f32 %v916_v2, %v1940_v19 }
 0x12c   :  { %v593_v40 = vadd.f32 %v592_v28, %v1794_v6  ;;  %v698_v6 = vadd.f32 %v1841_v9, %v632_v52  ;;  %v1955_v9 = vand.u32 4294901760, %v856_v30  ;;  %v1032_v2 = vand.u32 4294901760, %v1031_v33 }
 0x12d   :  { %990 = vmatpush.msrb.mxu0 %v1920_v46  ;;  %1122 = vmatpush.msrb.mxu3 %v1920_v46  ;;  %v1935_v8 = vsub.f32 %v968_v61, %v1920_v46  ;;  %v763_v22 = vpop.f32.mrf.mxu3  ;;  %v1948_v63 = vsub.f32 %v946_v49, %v1925_v20  ;;  %v1977_v53 = vsub.f32 %v886_v14, %v1950_v5  ;;  %v1054_v28 = vand.u32 4294901760, %v1966_v7 }
 0x12e   :  { %v656_v38 = vadd.f32 %v655_v15, %v593_v40  ;;  %v748_v29 = vadd.f32 %v1843_v32, %v698_v6  ;;  %v702_v32 = vadd.f32 %v1855_v13, %v638_v26  ;;  %v1984_v61 = vsub.f32 %v856_v30, %v1955_v9 }
 0x12f   :  { %992 = vmatpush.msrb.mxu0 %v1905_v10  ;;  %1085 = vmatpush.msrb.mxu2 %v1935_v8  ;;  %v1024_v54 = vand.u32 4294901760, %v1935_v8  ;;  %v1048_v36 = vand.u32 4294901760, %v1948_v63  ;;  %v583_v49 = vadd.f32 %v1869_v16, %v1781_v62  ;;  %v1043_v13 = vsub.f32 %v1938_v0, %v1042_v39 }
 0x130   :  { %1124 = vmatpush.msrb.mxu3 %v1905_v10  ;;  %v714_v1 = vadd.f32 %v713_v47, %v656_v38  ;;  %v1038_v62 = vand.u32 4294901760, %v1037_v48  ;;  %v1060_v21 = vand.u32 4294901760, %v1977_v53  ;;  %v1055_v38 = vsub.f32 %v1966_v7, %v1054_v28 }
 0x131   :  { %994 = vmatpush.msrb.mxu0 %v1909_v60  ;;  %1088 = vmatpush.msrb.mxu2 %v1915_v43  ;;  %v1025_v31 = vsub.f32 %v1935_v8, %v1024_v54  ;;  %v1049_v16 = vsub.f32 %v1948_v63, %v1048_v36  ;;  %v1044_v6 = vand.u32 4294901760, %v1043_v13  ;;  %v1066_v26 = vand.u32 4294901760, %v1984_v61 }
 0x132   :  { %1126 = vmatpush.msrb.mxu3 %v1909_v60  ;;  %v764_v34 = vadd.f32 %v763_v22, %v714_v1  ;;  %v661_v27 = vpop.f32.mrf.mxu1  ;;  %v644_v22 = vadd.f32 %v1871_v44, %v583_v49  ;;  %v752_v1 = vadd.f32 %v1859_v41, %v702_v32  ;;  %v1056_v48 = vand.u32 4294901760, %v1055_v38 }
 0x133   :  { %996 = vmatpush.msrb.mxu0 %v1911_v58  ;;  %1091 = vmatpush.msrb.mxu2 %v1923_v59  ;;  %v597_v42 = vpop.f32.mrf.mxu0  ;;  %v1026_v11 = vand.u32 4294901760, %v1025_v31  ;;  %v717_v24 = vpop.f32.mrf.mxu2  ;;  %v1050_v33 = vand.u32 4294901760, %v1049_v16 }
 0x134   :  { %v779_v55 = vmax.f32 %v748_v29, %v764_v34  ;;  %1128 = vmatpush.msrb.mxu3 %v1911_v58  ;;  %v598_v56 = vadd.f32 %v597_v42, %v1801_v12 }
 0x135   :  { %998 = vmatpush.msrb.mxu0 %v1925_v20  ;;  %1027 = vmatpush.msrb.mxu1 %v1026_v11  ;;  %v767_v52 = vpop.f32.mrf.mxu3 }
 0x136   :  { %v787_v15 = vsub.f32 %v748_v29, %v779_v55  ;;  %v795_v12 = vsub.f32 %v764_v34, %v779_v55  ;;  %1094 = vmatpush.msrb.mxu2 %v1938_v0  ;;  %1130 = vmatpush.msrb.mxu3 %v1925_v20  ;;  %v662_v14 = vadd.f32 %v661_v27, %v598_v56  ;;  %v970_v56 = vld [vmem:[%s2203_s1] sm:$0xff] }
 0x137   :  { %1000 = vmatpush.msrb.mxu0 %v1940_v19  ;;  %1033 = vmatpush.msrb.mxu1 %v1032_v2  ;;  %v1061_v34 = vsub.f32 %v1977_v53, %v1060_v21  ;;  %v706_v27 = vadd.f32 %v1874_v3, %v644_v22  ;;  %v1067_v55 = vsub.f32 %v1984_v61, %v1066_v26 }
 0x138   :  { %v804_v40 = vmul.f32 1.442695, %v787_v15  ;;  %v820_v47 = vmul.f32 1.442695, %v795_v12  ;;  %1097 = vmatpush.msrb.mxu2 %v1948_v63  ;;  %1132 = vmatpush.msrb.mxu3 %v1940_v19  ;;  %v718_v30 = vadd.f32 %v717_v24, %v662_v14  ;;  %v979_v15 = vsel %vm977_vm1, %v970_v56, 0 }
 0x139   :  { %1002 = vmatpush.msrb.mxu0 %v1950_v5  ;;  %1039 = vmatpush.msrb.mxu1 %v1038_v62  ;;  %v1068_v43 = vand.u32 4294901760, %v1067_v55 }
 0x13a   :  { %1487 = vpow2.f32 %v804_v40  ;;  %1100 = vmatpush.msrb.mxu2 %v1966_v7  ;;  %1134 = vmatpush.msrb.mxu3 %v1950_v5  ;;  %v768_v31 = vadd.f32 %v767_v52, %v718_v30  ;;  %v667_v29 = vpop.f32.mrf.mxu1 }
 0x13b   :  { %1489 = vpow2.f32 %v820_v47  ;;  %1004 = vmatpush.msrb.mxu0 %v1955_v9  ;;  %1045 = vmatpush.msrb.mxu1 %v1044_v6  ;;  %v602_v44 = vpop.f32.mrf.mxu0  ;;  %v721_v11 = vpop.f32.mrf.mxu2 }
 0x13c   :  { %v781_v42 = vmax.f32 %v752_v1, %v768_v31  ;;  %1103 = vmatpush.msrb.mxu2 %v1977_v53  ;;  %1136 = vmatpush.msrb.mxu3 %v1955_v9  ;;  %v603_v41 = vadd.f32 %v602_v44, %v1810_v45  ;;  %v588_v45 = vadd.f32 %v1895_v35, %v1788_v17 }
 0x13d   :  { %1155 = vmatpush.msra.mxu0 %v1024_v54  ;;  %1051 = vmatpush.msrb.mxu1 %v1050_v33  ;;  %v771_v32 = vpop.f32.mrf.mxu3  ;;  %v1062_v54 = vand.u32 4294901760, %v1061_v34  ;;  %v549_v17 = vadd.f32 %v1825_v4, %v1820_v23  ;;  %v756_v35 = vadd.f32 %v1882_v18, %v706_v27  ;;  %v2048_v18 = vand.u32 4294901760, %v979_v15 }
 0x13e   :  { %v789_v24 = vsub.f32 %v752_v1, %v781_v42  ;;  %v797_v3 = vsub.f32 %v768_v31, %v781_v42  ;;  %1106 = vmatpush.msrb.mxu2 %v1984_v61  ;;  %v668_v8 = vadd.f32 %v667_v29, %v603_v41 }
 0x13f   :  { %1159 = vmatpush.msra.mxu0 %v1030_v57  ;;  %1057 = vmatpush.msrb.mxu1 %v1056_v48  ;;  %v650_v57 = vadd.f32 %v1897_v37, %v588_v45  ;;  %v2079_v38 = vsub.f32 %v979_v15, %v2048_v18 }
 0x140   :  { %v2032_v49 = vpop.eup %1487  ;;  %v808_v2 = vmul.f32 1.442695, %v789_v24  ;;  %v824_v52 = vmul.f32 1.442695, %v797_v3  ;;  %v722_v13 = vadd.f32 %v721_v11, %v668_v8 }
 0x141   :  { %v2034_v12 = vpop.eup %1489  ;;  %1163 = vmatpush.msra.mxu0 %v1036_v25  ;;  %1063 = vmatpush.msrb.mxu1 %v1062_v54  ;;  %v710_v0 = vadd.f32 %v1900_v50, %v650_v57 }
 0x142   :  { %v2044_v14 = vadd.f32 %v2034_v12, %v2032_v49  ;;  %1491 = vpow2.f32 %v808_v2  ;;  %v772_v62 = vadd.f32 %v771_v32, %v722_v13  ;;  %v673_v4 = vpop.f32.mrf.mxu1  ;;  %1109 = vmatmul.f32.vlgmr.msrb.gmra.mxu2 %v2079_v38 }
 0x143   :  { %1493 = vpow2.f32 %v824_v52  ;;  %1167 = vmatpush.msra.mxu0 %v1042_v39  ;;  %1069 = vmatpush.msrb.mxu1 %v1068_v43  ;;  %v607_v23 = vpop.f32.mrf.mxu0  ;;  %v725_v37 = vpop.f32.mrf.mxu2  ;;  %v760_v6 = vadd.f32 %v1903_v51, %v710_v0 }
 0x144   :  { %1495 = vrcp.f32 %v2044_v14  ;;  %v783_v59 = vmax.f32 %v756_v35, %v772_v62  ;;  %v608_v25 = vadd.f32 %v607_v23, %v549_v17  ;;  %1071 = vmatmul.f32.vlgmr.msrb.gmra.mxu1 %v2048_v18  ;;  %v868_v31 = vand.u32 2147483648, %v2044_v14 }
 0x145   :  { %1198 = vmatpush.msra.mxu1 %v1920_v46  ;;  %1171 = vmatpush.msra.mxu0 %v1048_v36  ;;  %v775_v47 = vpop.f32.mrf.mxu3  ;;  %vm862_vm3 = vweird.f32 %v2044_v14 }
 0x146   :  { %v791_v39 = vsub.f32 %v756_v35, %v783_v59  ;;  %v799_v16 = vsub.f32 %v772_v62, %v783_v59  ;;  %v674_v40 = vadd.f32 %v673_v4, %v608_v25  ;;  %v869_v41 = vor.u32 1.1754944e-38, %v868_v31 }
 0x147   :  { %1200 = vmatpush.msra.mxu1 %v1905_v10  ;;  %1175 = vmatpush.msra.mxu0 %v1054_v28 }
 0x148   :  { %v2059_v30 = vpop.eup %1491  ;;  %v812_v46 = vmul.f32 1.442695, %v791_v39  ;;  %v828_v22 = vmul.f32 1.442695, %v799_v16  ;;  %v726_v63 = vadd.f32 %v725_v37, %v674_v40 }
 0x149   :  { %1202 = vmatpush.msra.mxu1 %v1909_v60  ;;  %v2062_v36 = vpop.eup %1493  ;;  %1179 = vmatpush.msra.mxu0 %v1060_v21 }
 0x14a   :  { %v1496_v50 = vpop.eup %1495  ;;  %v2069_v10 = vadd.f32 %v2062_v36, %v2059_v30  ;;  %1497 = vpow2.f32 %v812_v46  ;;  %v776_v7 = vadd.f32 %v775_v47, %v726_v63 }
 0x14b   :  { %1204 = vmatpush.msra.mxu1 %v1911_v58  ;;  %1499 = vpow2.f32 %v828_v22  ;;  %1183 = vmatpush.msra.mxu0 %v1066_v26  ;;  %v858_v60 = vmul.f32 %v1496_v50, %v2044_v14  ;;  %vm863_vm2 = vweird.f32 %v1496_v50 }
 0x14c   :  { %1501 = vrcp.f32 %v2069_v10  ;;  %v785_v53 = vmax.f32 %v760_v6, %v776_v7  ;;  %vm864_vm4 = vmor %vm862_vm3, %vm863_vm2  ;;  %v896_v3 = vand.u32 2147483647, %v2069_v10  ;;  %vm892_vm7 = vweird.f32 %v2069_v10 }
 0x14d   :  { %1206 = vmatpush.msra.mxu1 %v1925_v20  ;;  %v859_v51 = vsub.f32 1.0, %v858_v60  ;;  %v2086_v20 = vand.u32 4294901760, %v2079_v38 }
 0x14e   :  { %v793_v28 = vsub.f32 %v760_v6, %v785_v53  ;;  %v801_v21 = vsub.f32 %v776_v7, %v785_v53  ;;  %vm897_vm9 = vcmp.eq.f32.partialorder %v896_v3, 8.507059e+37 }
 0x14f   :  { %1208 = vmatpush.msra.mxu1 %v1940_v19  ;;  %v860_v58 = vmul.f32 %v1496_v50, %v859_v51  ;;  %v866_v19 = vand.u32 2147483647, %v2044_v14  ;;  %1140 = vmatmul.f32.vlgmr.msrb.gmra.mxu3 %v2086_v20 }
 0x150   :  { %v2081_v1 = vpop.eup %1497  ;;  %v816_v61 = vmul.f32 1.442695, %v793_v28  ;;  %v832_v26 = vmul.f32 1.442695, %v801_v21 }
 0x151   :  { %1210 = vmatpush.msra.mxu1 %v1950_v5  ;;  %v1500_v44 = vpop.eup %1499  ;;  %v861_v33 = vadd.f32 %v1496_v50, %v860_v58  ;;  %v1008_v5 = vsub.f32 %v2079_v38, %v2086_v20  ;;  %vm867_vm5 = vcmp.eq.f32.partialorder %v866_v19, 8.507059e+37 }
 0x152   :  { %v1502_v29 = vpop.eup %1501  ;;  %v839_v34 = vadd.f32 %v1500_v44, %v2081_v1  ;;  %1503 = vpow2.f32 %v816_v61 }
 0x153   :  { %1212 = vmatpush.msra.mxu1 %v1955_v9  ;;  %1505 = vpow2.f32 %v832_v26  ;;  %v888_v42 = vmul.f32 %v1502_v29, %v2069_v10  ;;  %v2098_v11 = vand.u32 4294901760, %v1008_v5  ;;  %v865_v48 = vsel %vm864_vm4, %v1496_v50, %v861_v33 }
 0x154   :  { %1214 = vmatmul.f32.vlgmr.msra.gmra.mxu1 %v2048_v18  ;;  %1507 = vrcp.f32 %v839_v34  ;;  %v898_v9 = vand.u32 2147483648, %v2069_v10  ;;  %v870_v32 = vsel %vm867_vm5, %v869_v41, %v865_v48  ;;  %vm893_vm6 = vweird.f32 %v1502_v29 }
 0x155   :  { %v889_v27 = vsub.f32 1.0, %v888_v42  ;;  %1010 = vmatmul.f32.vlgmr.msrb.gmra.mxu0 %v2098_v11  ;;  %v963_v56 = vmul.f32 %v2034_v12, %v870_v32  ;;  %v2104_v45 = vmul.f32 %v2032_v49, %v870_v32  ;;  %vm894_vm8 = vmor %vm892_vm7, %vm893_vm6  ;;  %v928_v43 = vand.u32 2147483648, %v839_v34 }
 0x156   :  { %v899_v17 = vor.u32 1.1754944e-38, %v898_v9  ;;  %v926_v62 = vand.u32 2147483647, %v839_v34  ;;  %vm922_vm11 = vweird.f32 %v839_v34  ;;  %v1511_v33 = vmov 0  }
 0x157   :  { %v890_v55 = vmul.f32 %v1502_v29, %v889_v27  ;;  %v929_v59 = vor.u32 1.1754944e-38, %v928_v43  ;;  %v2121_v53 = vand.u32 4294901760, %v963_v56  ;;  %1462 = vset.pattern.permute.xlu0 %v1511_v33  ;;  %v2152_v42 = vand.u32 4294901760, %v2104_v45 }
 0x158   :  { %v1504_v24 = vpop.eup %1503  ;;  %vm927_vm13 = vcmp.eq.f32.partialorder %v926_v62, 8.507059e+37 }
 0x159   :  { %v1506_v8 = vpop.eup %1505  ;;  %v891_v54 = vadd.f32 %v1502_v29, %v890_v55  ;;  %v2134_v61 = vsub.f32 %v963_v56, %v2121_v53 }
 0x15a   :  { %v1508_v2 = vpop.eup %1507  ;;  %v841_v52 = vadd.f32 %v1506_v8, %v1504_v24 }
 0x15b   :  { %v918_v13 = vmul.f32 %v1508_v2, %v839_v34  ;;  %v895_v15 = vsel %vm894_vm8, %v1502_v29, %v891_v54  ;;  %vm923_vm10 = vweird.f32 %v1508_v2  ;;  %v1279_v9 = vand.u32 4294901760, %v2134_v61 }
 0x15c   :  { %1509 = vrcp.f32 %v841_v52  ;;  %v900_v12 = vsel %vm897_vm9, %v899_v17, %v895_v15  ;;  %vm924_vm12 = vmor %vm922_vm11, %vm923_vm10  ;;  %v958_v47 = vand.u32 2147483648, %v841_v52  ;;  %v956_v46 = vand.u32 2147483647, %v841_v52 }
 0x15d   :  { %v919_v35 = vsub.f32 1.0, %v918_v13  ;;  %v965_v49 = vmul.f32 %v2062_v36, %v900_v12  ;;  %v2110_v57 = vmul.f32 %v2059_v30, %v900_v12  ;;  %1185 = vmatmul.f32.vlgmr.msra.gmra.mxu0 %v2048_v18  ;;  %vm952_vm15 = vweird.f32 %v841_v52 }
 0x15e   :  { %v959_v36 = vor.u32 1.1754944e-38, %v958_v47  ;;  %vm957_vm1 = vcmp.eq.f32.partialorder %v956_v46, 8.507059e+37  ;;  %v1302_v54 = vsub.f32 %v2104_v45, %v2152_v42 }
 0x15f   :  { %v920_v14 = vmul.f32 %v1508_v2, %v919_v35  ;;  %v2116_v6 = vand.u32 4294901760, %v965_v49  ;;  %v2147_v34 = vand.u32 4294901760, %v2110_v57 }
 0x160   :  { %v1303_v35 = vand.u32 4294901760, %v1302_v54 }
 0x161   :  { %v921_v23 = vadd.f32 %v1508_v2, %v920_v14  ;;  %v2126_v21 = vsub.f32 %v965_v49, %v2116_v6  ;;  %v1296_v56 = vsub.f32 %v2110_v57, %v2147_v34 }
 0x162   :  { %v1510_v4 = vpop.eup %1509  ;;  %v1304_v57 = vsub.f32 %v1302_v54, %v1303_v35 }
 0x163   :  { %v948_v25 = vmul.f32 %v1510_v4, %v841_v52  ;;  %v925_v37 = vsel %vm924_vm12, %v1508_v2, %v921_v23  ;;  %vm953_vm14 = vweird.f32 %v1510_v4  ;;  %v1273_v5 = vand.u32 4294901760, %v2126_v21 }
 0x164   :  { %v930_v0 = vsel %vm927_vm13, %v929_v59, %v925_v37  ;;  %vm954_vm0 = vmor %vm952_vm15, %vm953_vm14  ;;  %v1297_v15 = vand.u32 4294901760, %v1296_v56  ;;  %v1305_v62 = vand.u32 4294901760, %v1304_v57 }
 0x165   :  { %v949_v39 = vsub.f32 1.0, %v948_v25  ;;  %v967_v16 = vmul.f32 %v1500_v44, %v930_v0  ;;  %v931_v40 = vmul.f32 %v2081_v1, %v930_v0  ;;  %v971_v44 = vld [vmem:[%s2204_s3] sm:$0xff]  ;;  %v1274_v55 = vsub.f32 %v2126_v21, %v1273_v5 }
 0x166   :  { %974 = vperm.xlu0 %1462, %v971_v44   ;;  %v1298_v43 = vsub.f32 %v1296_v56, %v1297_v15 }
 0x167   :  { %v950_v30 = vmul.f32 %v1510_v4, %v949_v39  ;;  %v2114_v63 = vand.u32 4294901760, %v967_v16  ;;  %v2136_v26 = vand.u32 4294901760, %v931_v40  ;;  %v1275_v52 = vand.u32 4294901760, %v1274_v55 }
 0x168   :  { %v1299_v14 = vand.u32 4294901760, %v1298_v43 }
 0x169   :  { %v951_v22 = vadd.f32 %v1510_v4, %v950_v30  ;;  %v2119_v60 = vsub.f32 %v967_v16, %v2114_v63  ;;  %v1290_v48 = vsub.f32 %v931_v40, %v2136_v26 }
 0x16b   :  { %v955_v50 = vsel %vm954_vm0, %v1510_v4, %v951_v22  ;;  %v1267_v31 = vand.u32 4294901760, %v2119_v60  ;;  %v1291_v2 = vand.u32 4294901760, %v1290_v48 }
 0x16c   :  { %v960_v10 = vsel %vm957_vm1, %v959_v36, %v955_v50 }
 0x16d   :  { %v969_v7 = vmul.f32 %v1506_v8, %v960_v10  ;;  %v961_v51 = vmul.f32 %v1504_v24, %v960_v10  ;;  %v1268_v27 = vsub.f32 %v2119_v60, %v1267_v31  ;;  %v1280_v8 = vsub.f32 %v2134_v61, %v1279_v9 }
 0x16e   :  { %v1292_v17 = vsub.f32 %v1290_v48, %v1291_v2 }
 0x16f   :  { %v2123_v28 = vand.u32 4294901760, %v969_v7  ;;  %v2128_v58 = vand.u32 4294901760, %v961_v51  ;;  %v1269_v3 = vand.u32 4294901760, %v1268_v27  ;;  %v1281_v45 = vand.u32 4294901760, %v1280_v8 }
 0x170   :  { %v1293_v49 = vand.u32 4294901760, %v1292_v17 }
 0x171   :  { %1227 = vmatpush.msra.mxu2 %v2123_v28  ;;  %1359 = vmatpush.msrb.mxu1 %v2123_v28  ;;  %v1260_v1 = vsub.f32 %v969_v7, %v2123_v28  ;;  %v2144_v29 = vsub.f32 %v961_v51, %v2128_v58 }
 0x173   :  { %1229 = vmatpush.msra.mxu2 %v2114_v63  ;;  %1322 = vmatpush.msrb.mxu0 %v1260_v1  ;;  %v1261_v19 = vand.u32 4294901760, %v1260_v1  ;;  %v1285_v24 = vand.u32 4294901760, %v2144_v29 }
 0x174   :  { %1361 = vmatpush.msrb.mxu1 %v2114_v63 }
 0x175   :  { %1231 = vmatpush.msra.mxu2 %v2116_v6  ;;  %1325 = vmatpush.msrb.mxu0 %v2119_v60  ;;  %v1262_v41 = vsub.f32 %v1260_v1, %v1261_v19  ;;  %v1286_v13 = vsub.f32 %v2144_v29, %v1285_v24 }
 0x176   :  { %1363 = vmatpush.msrb.mxu1 %v2116_v6 }
 0x177   :  { %1233 = vmatpush.msra.mxu2 %v2121_v53  ;;  %1328 = vmatpush.msrb.mxu0 %v2126_v21  ;;  %v1263_v32 = vand.u32 4294901760, %v1262_v41  ;;  %v1287_v12 = vand.u32 4294901760, %v1286_v13 }
 0x178   :  { %1365 = vmatpush.msrb.mxu1 %v2121_v53 }
 0x179   :  { %1235 = vmatpush.msra.mxu2 %v2128_v58  ;;  %1264 = vmatpush.msra.mxu3 %v1263_v32 }
 0x17a   :  { %1331 = vmatpush.msrb.mxu0 %v2134_v61  ;;  %1367 = vmatpush.msrb.mxu1 %v2128_v58 }
 0x17b   :  { %1237 = vmatpush.msra.mxu2 %v2136_v26  ;;  %1270 = vmatpush.msra.mxu3 %v1269_v3 }
 0x17c   :  { %1334 = vmatpush.msrb.mxu0 %v2144_v29  ;;  %1369 = vmatpush.msrb.mxu1 %v2136_v26 }
 0x17d   :  { %1239 = vmatpush.msra.mxu2 %v2147_v34  ;;  %1276 = vmatpush.msra.mxu3 %v1275_v52 }
 0x17e   :  { %1337 = vmatpush.msrb.mxu0 %v1290_v48  ;;  %1371 = vmatpush.msrb.mxu1 %v2147_v34 }
 0x17f   :  { %1241 = vmatpush.msra.mxu2 %v2152_v42  ;;  %1282 = vmatpush.msra.mxu3 %v1281_v45 }
 0x180   :  { %1340 = vmatpush.msrb.mxu0 %v1296_v56  ;;  %1373 = vmatpush.msrb.mxu1 %v2152_v42 }
 0x181   :  { %1392 = vmatpush.msrb.mxu2 %v1261_v19  ;;  %1288 = vmatpush.msra.mxu3 %v1287_v12 }
 0x182   :  { %1343 = vmatpush.msrb.mxu0 %v1302_v54  ;;  %1247 = vmatmul.f32.vlgmr.msra.gmra.mxu2 %v2098_v11 }
 0x183   :  { %1396 = vmatpush.msrb.mxu2 %v1267_v31  ;;  %1294 = vmatpush.msra.mxu3 %v1293_v49 }
 0x184   :  { %1346 = vmatmul.f32.vlgmr.msrb.gmra.mxu0 %v2079_v38  ;;  %1377 = vmatmul.f32.vlgmr.msrb.gmra.mxu1 %v2086_v20 }
 0x185   :  { %1400 = vmatpush.msrb.mxu2 %v1273_v5  ;;  %1300 = vmatpush.msra.mxu3 %v1299_v14 }
 0x187   :  { %1404 = vmatpush.msrb.mxu2 %v1279_v9  ;;  %1306 = vmatpush.msra.mxu3 %v1305_v62 }
 0x188   :  { %1308 = vmatmul.f32.vlgmr.msra.gmra.mxu3 %v2048_v18 }
 0x189   :  { %1435 = vmatpush.msrb.mxu3 %v2123_v28  ;;  %1408 = vmatpush.msrb.mxu2 %v1285_v24 }
 0x18b   :  { %1437 = vmatpush.msrb.mxu3 %v2114_v63  ;;  %1412 = vmatpush.msrb.mxu2 %v1291_v2 }
 0x18d   :  { %1439 = vmatpush.msrb.mxu3 %v2116_v6  ;;  %1416 = vmatpush.msrb.mxu2 %v1297_v15 }
 0x18f   :  { %1441 = vmatpush.msrb.mxu3 %v2121_v53  ;;  %1420 = vmatpush.msrb.mxu2 %v1303_v35 }
 0x190   :  { %1422 = vmatmul.f32.vlgmr.msrb.gmra.mxu2 %v2048_v18 }
 0x191   :  { %1443 = vmatpush.msrb.mxu3 %v2128_v58 }
 0x193   :  { %1445 = vmatpush.msrb.mxu3 %v2136_v26 }
 0x195   :  { %1447 = vmatpush.msrb.mxu3 %v2147_v34 }
 0x197   :  { %1449 = vmatpush.msrb.mxu3 %v2152_v42 }
 0x198   :  { %1451 = vmatmul.f32.vlgmr.msrb.gmra.mxu3 %v2048_v18 }
 0x1c1   :  { %v1072_v20 = vpop.f32.mrf.mxu1 }
 0x1c5   :  { %v1110_v4 = vpop.f32.mrf.mxu2 }
 0x1d1   :  { %v1215_v16 = vpop.f32.mrf.mxu1 }
 0x1d2   :  { %v1011_v38 = vpop.f32.mrf.mxu0  ;;  %v1141_v25 = vpop.f32.mrf.mxu3 }
 0x1d8   :  { %v975_v11 = vpop.permute.xlu0 %974 }
 0x1d9   :  { %v1012_v23 = vadd.f32 %v1011_v38, %v975_v11 }
 0x1da   :  { %v1186_v0 = vpop.f32.mrf.mxu0 }
 0x1db   :  { %v1073_v59 = vadd.f32 %v1072_v20, %v1012_v23 }
 0x1dd   :  { %v1111_v37 = vadd.f32 %v1110_v4, %v1073_v59 }
 0x1df   :  { %v1142_v39 = vadd.f32 %v1141_v25, %v1111_v37 }
 0x1e1   :  { %v1187_v40 = vadd.f32 %v1186_v0, %v1142_v39 }
 0x1e3   :  { %v1216_v47 = vadd.f32 %v1215_v16, %v1187_v40 }
 0x1e5   :  { %1455 = vst [vmem:[%s2205_s4] sm:$0xff] %v1216_v47 }
 0x201   :  { %v1347_v22 = vpop.f32.mrf.mxu0  ;;  %v1378_v50 = vpop.f32.mrf.mxu1 }
 0x205   :  { %v1248_v30 = vpop.f32.mrf.mxu2 }
 0x206   :  { %v1249_v46 = vadd.f32 %v1248_v30, %v975_v11 }
 0x20b   :  { %v1309_v18 = vpop.f32.mrf.mxu3 }
 0x20c   :  { %v1310_v63 = vadd.f32 %v1309_v18, %v1249_v46 }
 0x20e   :  { %v1348_v36 = vadd.f32 %v1347_v22, %v1310_v63 }
 0x210   :  { %v1379_v6 = vadd.f32 %v1378_v50, %v1348_v36 }
 0x213   :  { %v1423_v10 = vpop.f32.mrf.mxu2 }
 0x214   :  { %v1424_v7 = vadd.f32 %v1423_v10, %v1379_v6 }
 0x21b   :  { %v1452_v60 = vpop.f32.mrf.mxu3 }
 0x21c   :  { %v1453_v53 = vadd.f32 %v1452_v60, %v1424_v7 }
 0x21e   :  { %1456 = vst [vmem:[%s2205_s4 + $0x8] sm:$0xff] %v1453_v53 }

// kernel: double_attention.2
= control target key start
LH: loop header
LB: loop body
LE: loop exit
PB: predicated region body
PF: predicated region fallthrough
CT: control target
= control target key end

     0   :  { %vm67_vm0 = vcmask 64512   ;;  %s4021_s0 = inlined_call_operand.vmem [shape: f32[8,256], index: 0, kind: input, shape index: {}]   ;;  %s4022_s1 = inlined_call_operand.vmem [shape: f32[128,8], index: 1, kind: input, shape index: {}]   ;;  %s4023_s2 = inlined_call_operand.vmem [shape: f32[64,1], index: 2, kind: input, shape index: {}]   ;;  %s4024_s3 = inlined_call_operand.vmem [shape: f32[1,64,64], index: 3, kind: output, shape index: {}]  }
   0x1   :  { %v65_v0 = vld [vmem:[%s4021_s0] sm:$0xff]  ;;  %v50_v4 = vld [vmem:[%s4022_s1 + $0x8] sm:$0xff]  ;;  %v51_v7 = vld [vmem:[%s4022_s1 + $0x10] sm:$0xff] }
   0x2   :  { %v49_v1 = vld [vmem:[%s4022_s1] sm:$0xff]  ;;  %v131_v2 = vand.u32 4294901760, %v65_v0  ;;  %v72_v6 = vsel %vm67_vm0, %v50_v4, 0  ;;  %v66_v11 = vld [vmem:[%s4021_s0 + $0x8] sm:$0xff]  ;;  %v75_v14 = vsel %vm67_vm0, %v51_v7, 0  ;;  %v52_v23 = vld [vmem:[%s4022_s1 + $0x18] sm:$0xff] }
   0x3   :  { %v69_v3 = vsel %vm67_vm0, %v49_v1, 0  ;;  %v2628_v9 = vand.u32 4294901760, %v72_v6  ;;  %v2650_v19 = vand.u32 4294901760, %v75_v14  ;;  %v742_v20 = vand.u32 4294901760, %v66_v11  ;;  %v53_v33 = vld [vmem:[%s4022_s1 + $0x20] sm:$0xff]  ;;  %v54_v41 = vld [vmem:[%s4022_s1 + $0x28] sm:$0xff] }
   0x4   :  { %v2622_v5 = vand.u32 4294901760, %v69_v3  ;;  %v278_v8 = vsub.f32 %v65_v0, %v131_v2  ;;  %463 = vmatpush.msra.mxu3 %v131_v2  ;;  %132 = vmatpush.msra.mxu0 %v131_v2  ;;  %v78_v27 = vsel %vm67_vm0, %v52_v23, 0  ;;  %v81_v37 = vsel %vm67_vm0, %v53_v33, 0  ;;  %v55_v48 = vld [vmem:[%s4022_s1 + $0x30] sm:$0xff]  ;;  %v56_v55 = vld [vmem:[%s4022_s1 + $0x38] sm:$0xff]  ;;  %v57_v62 = vld [vmem:[%s4022_s1 + $0x40] sm:$0xff] }
   0x5   :  { %v2637_v13 = vsub.f32 %v72_v6, %v2628_v9  ;;  %v2662_v25 = vsub.f32 %v75_v14, %v2650_v19  ;;  %v889_v26 = vsub.f32 %v66_v11, %v742_v20  ;;  %v2672_v31 = vand.u32 4294901760, %v78_v27  ;;  %v58_v6 = vld [vmem:[%s4022_s1 + $0x48] sm:$0xff] }
   0x6   :  { %v2631_v10 = vsub.f32 %v69_v3, %v2622_v5  ;;  %365 = vmatpush.msra.mxu2 %v278_v8  ;;  %v279_v12 = vand.u32 4294901760, %v278_v8  ;;  %v2692_v40 = vand.u32 4294901760, %v81_v37  ;;  %v84_v44 = vsel %vm67_vm0, %v54_v41, 0 }
   0x7   :  { %v2648_v18 = vand.u32 4294901760, %v2637_v13  ;;  %v890_v28 = vand.u32 4294901760, %v889_v26  ;;  %v2670_v30 = vand.u32 4294901760, %v2662_v25  ;;  %v2682_v36 = vsub.f32 %v78_v27, %v2672_v31 }
   0x8   :  { %368 = vmatmul.f32.vlgmr.msra.gmra.mxu2 %v2631_v10  ;;  %v2642_v15 = vand.u32 4294901760, %v2631_v10  ;;  %v280_v16 = vsub.f32 %v278_v8, %v279_v12  ;;  %579 = vmatpush.msrb.mxu0 %v279_v12  ;;  %v2702_v43 = vsub.f32 %v81_v37, %v2692_v40  ;;  %v2712_v47 = vand.u32 4294901760, %v84_v44 }
   0x9   :  { %743 = vmatpush.msrb.mxu2 %v742_v20  ;;  %v144_v24 = vsub.f32 %v2637_v13, %v2648_v18  ;;  %v891_v32 = vsub.f32 %v889_v26, %v890_v28  ;;  %v152_v35 = vsub.f32 %v2662_v25, %v2670_v30  ;;  %v2690_v39 = vand.u32 4294901760, %v2682_v36 }
   0xa   :  { %467 = vmatmul.f32.vlgmr.msra.gmra.mxu3 %v2642_v15  ;;  %v136_v17 = vsub.f32 %v2631_v10, %v2642_v15  ;;  %v281_v21 = vand.u32 4294901760, %v280_v16  ;;  %v2710_v46 = vand.u32 4294901760, %v2702_v43  ;;  %v2722_v50 = vsub.f32 %v84_v44, %v2712_v47 }
   0xb   :  { %v2667_v29 = vand.u32 4294901760, %v144_v24  ;;  %1190 = vmatpush.msra.mxu2 %v890_v28  ;;  %v892_v34 = vand.u32 4294901760, %v891_v32  ;;  %v2687_v38 = vand.u32 4294901760, %v152_v35  ;;  %v160_v42 = vsub.f32 %v2682_v36, %v2690_v39  ;;  %v60_v28 = vld [vmem:[%s4022_s1 + $0x58] sm:$0xff] }
   0xc   :  { %v2652_v22 = vand.u32 4294901760, %v136_v17  ;;  %282 = vmatpush.msra.mxu1 %v281_v21  ;;  %v168_v49 = vsub.f32 %v2702_v43, %v2710_v46  ;;  %v87_v51 = vsel %vm67_vm0, %v55_v48, 0  ;;  %v2730_v53 = vand.u32 4294901760, %v2722_v50  ;;  %v59_v17 = vld [vmem:[%s4022_s1 + $0x50] sm:$0xff] }
   0xd   :  { %284 = vmatmul.f32.vlgmr.msra.gmra.mxu1 %v2622_v5  ;;  %893 = vmatpush.msrb.mxu3 %v892_v34  ;;  %v2707_v45 = vand.u32 4294901760, %v160_v42  ;;  %v2732_v54 = vand.u32 4294901760, %v87_v51  ;;  %v90_v58 = vsel %vm67_vm0, %v56_v55, 0  ;;  %v93_v1 = vsel %vm67_vm0, %v57_v62, 0  ;;  %v61_v42 = vld [vmem:[%s4022_s1 + $0x60] sm:$0xff] }
   0xe   :  { %138 = vmatmul.f32.vlgmr.msra.gmra.mxu0 %v2652_v22  ;;  %661 = vmatpush.msrb.mxu1 %v131_v2  ;;  %v2727_v52 = vand.u32 4294901760, %v168_v49  ;;  %v176_v56 = vsub.f32 %v2722_v50, %v2730_v53  ;;  %v2752_v61 = vand.u32 4294901760, %v90_v58  ;;  %v2772_v4 = vand.u32 4294901760, %v93_v1 }
   0xf   :  { %976 = vmatpush.msra.mxu0 %v889_v26  ;;  %1272 = vmatpush.msra.mxu3 %v742_v20  ;;  %v2742_v57 = vsub.f32 %v87_v51, %v2732_v54  ;;  %v96_v11 = vsel %vm67_vm0, %v58_v6, 0  ;;  %v99_v23 = vsel %vm67_vm0, %v59_v17, 0  ;;  %v102_v34 = vsel %vm67_vm0, %v60_v28, 0  ;;  %v63_v17 = vld [vmem:[%s4022_s1 + $0x70] sm:$0xff] }
  0x10   :  { %373 = vmatmul.f32.gmra.mxu2 %v2637_v13  ;;  %1074 = vmatpush.msra.mxu1 %v742_v20  ;;  %v2747_v59 = vand.u32 4294901760, %v176_v56  ;;  %v2762_v0 = vsub.f32 %v90_v58, %v2752_v61  ;;  %v2782_v8 = vsub.f32 %v93_v1, %v2772_v4  ;;  %v2792_v16 = vand.u32 4294901760, %v96_v11  ;;  %v62_v58 = vld [vmem:[%s4022_s1 + $0x68] sm:$0xff] }
  0x11   :  { %v2750_v60 = vand.u32 4294901760, %v2742_v57  ;;  %v2812_v27 = vand.u32 4294901760, %v99_v23  ;;  %v2832_v41 = vand.u32 4294901760, %v102_v34  ;;  %v105_v49 = vsel %vm67_vm0, %v61_v42, 0 }
  0x12   :  { %473 = vmatmul.f32.gmra.mxu3 %v2648_v18  ;;  %v2770_v3 = vand.u32 4294901760, %v2762_v0  ;;  %v2790_v14 = vand.u32 4294901760, %v2782_v8  ;;  %v2802_v21 = vsub.f32 %v96_v11, %v2792_v16  ;;  %v2852_v56 = vand.u32 4294901760, %v105_v49 }
  0x13   :  { %v184_v63 = vsub.f32 %v2742_v57, %v2750_v60  ;;  %v2822_v33 = vsub.f32 %v99_v23, %v2812_v27  ;;  %v2842_v48 = vsub.f32 %v102_v34, %v2832_v41  ;;  %v108_v1 = vsel %vm67_vm0, %v62_v58, 0 }
  0x14   :  { %v192_v7 = vsub.f32 %v2762_v0, %v2770_v3  ;;  %v200_v20 = vsub.f32 %v2782_v8, %v2790_v14  ;;  %v2810_v26 = vand.u32 4294901760, %v2802_v21  ;;  %v2872_v11 = vand.u32 4294901760, %v108_v1 }
  0x15   :  { %288 = vmatmul.f32.gmra.mxu1 %v2628_v9  ;;  %v2767_v2 = vand.u32 4294901760, %v184_v63  ;;  %4047 = vst [vmem:[#allocation2_spill] sm:$0xff] %v2822_v33  ;;  %v2830_v37 = vand.u32 4294901760, %v2822_v33  ;;  %v2850_v55 = vand.u32 4294901760, %v2842_v48  ;;  %v2862_v63 = vsub.f32 %v105_v49, %v2852_v56 }
  0x16   :  { %146 = vmatmul.f32.gmra.mxu0 %v2667_v29  ;;  %v2787_v12 = vand.u32 4294901760, %v192_v7  ;;  %v2807_v24 = vand.u32 4294901760, %v200_v20  ;;  %v208_v32 = vsub.f32 %v2802_v21, %v2810_v26  ;;  %4049 = vst [vmem:[#allocation4_spill] sm:$0xff] %v2842_v48  ;;  %v2882_v23 = vsub.f32 %v108_v1, %v2872_v11 }
  0x17   :  { %4048 = vst [vmem:[#allocation3_spill] sm:$0xff] %v2830_v37  ;;  %v216_v44 = vsub.f32 %v2822_v33, %v2830_v37  ;;  %v224_v62 = vsub.f32 %v2842_v48, %v2850_v55  ;;  %v2870_v7 = vand.u32 4294901760, %v2862_v63  ;;  %v111_v28 = vsel %vm67_vm0, %v63_v17, 0 }
  0x18   :  { %378 = vmatmul.f32.gmra.mxu2 %v2662_v25  ;;  %v2827_v35 = vand.u32 4294901760, %v208_v32  ;;  %4050 = vst [vmem:[#allocation5_spill] sm:$0xff] %v2850_v55  ;;  %v2890_v34 = vand.u32 4294901760, %v2882_v23  ;;  %v2892_v42 = vand.u32 4294901760, %v111_v28 }
  0x19   :  { %v2847_v51 = vand.u32 4294901760, %v216_v44  ;;  %4051 = vst [vmem:[#allocation6_spill] sm:$0xff] %v2862_v63  ;;  %v2867_v6 = vand.u32 4294901760, %v224_v62  ;;  %v232_v20 = vsub.f32 %v2862_v63, %v2870_v7  ;;  %v64_v44 = vld [vmem:[%s4022_s1 + $0x78] sm:$0xff] }
  0x1a   :  { %479 = vmatmul.f32.gmra.mxu3 %v2670_v30  ;;  %4052 = vst [vmem:[#allocation7_spill] sm:$0xff] %v2870_v7  ;;  %v240_v49 = vsub.f32 %v2882_v23, %v2890_v34  ;;  %v2902_v58 = vsub.f32 %v111_v28, %v2892_v42  ;;  %v114_v62 = vsel %vm67_vm0, %v64_v44, 0 }
  0x1b   :  { %4053 = vst [vmem:[#allocation8_spill] sm:$0xff] %v2882_v23  ;;  %v2887_v32 = vand.u32 4294901760, %v232_v20  ;;  %v2912_v20 = vand.u32 4294901760, %v114_v62 }
  0x1c   :  { %4054 = vst [vmem:[#allocation9_spill] sm:$0xff] %v2890_v34  ;;  %v2907_v1 = vand.u32 4294901760, %v240_v49  ;;  %v2910_v17 = vand.u32 4294901760, %v2902_v58 }
  0x1d   :  { %292 = vmatmul.f32.gmra.mxu1 %v2650_v19  ;;  %4055 = vst [vmem:[#allocation10_spill] sm:$0xff] %v2902_v58  ;;  %v2919_v44 = vsub.f32 %v114_v62, %v2912_v20 }
  0x1e   :  { %154 = vmatmul.f32.gmra.mxu0 %v2687_v38  ;;  %4056 = vst [vmem:[#allocation11_spill] sm:$0xff] %v2910_v17  ;;  %v248_v28 = vsub.f32 %v2902_v58, %v2910_v17 }
  0x1f   :  { %4057 = vst [vmem:[#allocation12_spill] sm:$0xff] %v2919_v44 }
  0x20   :  { %383 = vmatmul.f32.gmra.mxu2 %v2682_v36  ;;  %v2923_v49 = vand.u32 4294901760, %v248_v28 }
  0x22   :  { %485 = vmatmul.f32.gmra.mxu3 %v2690_v39 }
  0x25   :  { %296 = vmatmul.f32.gmra.mxu1 %v2672_v31 }
  0x26   :  { %162 = vmatmul.f32.gmra.mxu0 %v2707_v45 }
  0x28   :  { %388 = vmatmul.f32.gmra.mxu2 %v2702_v43 }
  0x2a   :  { %491 = vmatmul.f32.gmra.mxu3 %v2710_v46 }
  0x2d   :  { %300 = vmatmul.f32.gmra.mxu1 %v2692_v40 }
  0x2e   :  { %170 = vmatmul.f32.gmra.mxu0 %v2727_v52 }
  0x30   :  { %393 = vmatmul.f32.gmra.mxu2 %v2722_v50 }
  0x32   :  { %497 = vmatmul.f32.gmra.mxu3 %v2730_v53 }
  0x35   :  { %304 = vmatmul.f32.gmra.mxu1 %v2712_v47 }
  0x36   :  { %178 = vmatmul.f32.gmra.mxu0 %v2747_v59 }
  0x38   :  { %398 = vmatmul.f32.gmra.mxu2 %v2742_v57 }
  0x3a   :  { %503 = vmatmul.f32.gmra.mxu3 %v2750_v60 }
  0x3d   :  { %308 = vmatmul.f32.gmra.mxu1 %v2732_v54 }
  0x3e   :  { %186 = vmatmul.f32.gmra.mxu0 %v2767_v2 }
  0x40   :  { %403 = vmatmul.f32.gmra.mxu2 %v2762_v0 }
  0x42   :  { %509 = vmatmul.f32.gmra.mxu3 %v2770_v3 }
  0x45   :  { %312 = vmatmul.f32.gmra.mxu1 %v2752_v61 }
  0x46   :  { %194 = vmatmul.f32.gmra.mxu0 %v2787_v12 }
  0x48   :  { %408 = vmatmul.f32.gmra.mxu2 %v2782_v8 }
  0x4a   :  { %515 = vmatmul.f32.gmra.mxu3 %v2790_v14 }
  0x4d   :  { %316 = vmatmul.f32.gmra.mxu1 %v2772_v4 }
  0x4e   :  { %202 = vmatmul.f32.gmra.mxu0 %v2807_v24 }
  0x50   :  { %413 = vmatmul.f32.gmra.mxu2 %v2802_v21 }
  0x52   :  { %521 = vmatmul.f32.gmra.mxu3 %v2810_v26 }
  0x55   :  { %320 = vmatmul.f32.gmra.mxu1 %v2792_v16 }
  0x56   :  { %210 = vmatmul.f32.gmra.mxu0 %v2827_v35 }
  0x58   :  { %418 = vmatmul.f32.gmra.mxu2 %v2822_v33 }
  0x5a   :  { %527 = vmatmul.f32.gmra.mxu3 %v2830_v37 }
  0x5d   :  { %324 = vmatmul.f32.gmra.mxu1 %v2812_v27 }
  0x5e   :  { %218 = vmatmul.f32.gmra.mxu0 %v2847_v51 }
  0x60   :  { %423 = vmatmul.f32.gmra.mxu2 %v2842_v48  ;;  %v1341_v48 = vld [vmem:[%s4023_s2 + $0x18] sm:$0xff] }
  0x62   :  { %533 = vmatmul.f32.gmra.mxu3 %v2850_v55 }
  0x65   :  { %328 = vmatmul.f32.gmra.mxu1 %v2832_v41 }
  0x66   :  { %226 = vmatmul.f32.gmra.mxu0 %v2867_v6 }
  0x68   :  { %428 = vmatmul.f32.gmra.mxu2 %v2862_v63 }
  0x6a   :  { %539 = vmatmul.f32.gmra.mxu3 %v2870_v7  ;;  %v1338_v7 = vld [vmem:[%s4023_s2] sm:$0xff] }
  0x6d   :  { %332 = vmatmul.f32.gmra.mxu1 %v2852_v56 }
  0x6e   :  { %234 = vmatmul.f32.gmra.mxu0 %v2887_v32 }
  0x70   :  { %433 = vmatmul.f32.gmra.mxu2 %v2882_v23  ;;  %v2590_v23 = vmov 0  }
  0x71   :  { %2539 = vset.pattern.permute.xlu0 %v2590_v23  ;;  %2540 = vset.pattern.permute.xlu1 %v2590_v23 }
  0x72   :  { %545 = vmatmul.f32.gmra.mxu3 %v2890_v34  ;;  %v2926_v34 = vand.u32 4294901760, %v2919_v44  ;;  %1348 = vperm.xlu0 %2539, %v1338_v7  }
  0x73   :  { %2541 = vset.pattern.permute.xlu2 %v2590_v23 }
  0x74   :  { %4058 = vst [vmem:[#allocation13_spill] sm:$0xff] %v2926_v34  ;;  %v256_v62 = vsub.f32 %v2919_v44, %v2926_v34 }
  0x75   :  { %336 = vmatmul.f32.gmra.mxu1 %v2872_v11 }
  0x76   :  { %242 = vmatmul.f32.gmra.mxu0 %v2907_v1  ;;  %v2937_v28 = vand.u32 4294901760, %v256_v62  ;;  %v1340_v62 = vld [vmem:[%s4023_s2 + $0x10] sm:$0xff] }
  0x77   :  { %1358 = vperm.xlu1 %2540, %v1340_v62  }
  0x78   :  { %438 = vmatmul.f32.gmra.mxu2 %v2902_v58 }
  0x7a   :  { %551 = vmatmul.f32.gmra.mxu3 %v2910_v17  ;;  %v1339_v17 = vld [vmem:[%s4023_s2 + $0x8] sm:$0xff] }
  0x7b   :  { %1353 = vperm.xlu0 %2539, %v1339_v17  }
  0x7d   :  { %340 = vmatmul.f32.gmra.mxu1 %v2892_v42 }
  0x7e   :  { %250 = vmatmul.f32.gmra.mxu0 %v2923_v49 }
  0x7f   :  { %1363 = vperm.xlu1 %2540, %v1341_v48  }
  0x80   :  { %443 = vmatmul.f32.gmra.mxu2 %v2919_v44 }
  0x82   :  { %557 = vmatmul.f32.gmra.mxu3 %v2926_v34 }
  0x85   :  { %344 = vmatmul.f32.gmra.mxu1 %v2912_v20 }
  0x86   :  { %258 = vmatmul.f32.gmra.mxu0 %v2937_v28 }
  0x88   :  { %749 = vmatmul.f32.vlgmr.msrb.gmra.mxu2 %v2652_v22 }
  0x8a   :  { %895 = vmatmul.f32.vlgmr.msrb.gmra.mxu3 %v2622_v5  ;;  %v285_v23 = vpop.f32.mrf.mxu1 }
  0x8b   :  { %v139_v7 = vpop.f32.mrf.mxu0  ;;  %v369_v58 = vpop.f32.mrf.mxu2 }
  0x8c   :  { %v286_v44 = vadd.f32 %v285_v23, %v139_v7 }
  0x8d   :  { %v468_v34 = vpop.f32.mrf.mxu3  ;;  %663 = vmatmul.f32.vlgmr.msrb.gmra.mxu1 %v2622_v5 }
  0x8e   :  { %v370_v63 = vadd.f32 %v369_v58, %v286_v44  ;;  %581 = vmatmul.f32.vlgmr.msrb.gmra.mxu0 %v2622_v5 }
  0x90   :  { %v2951_v17 = vadd.f32 %v468_v34, %v370_v63  ;;  %757 = vmatmul.f32.gmra.mxu2 %v2667_v29 }
  0x92   :  { %899 = vmatmul.f32.gmra.mxu3 %v2628_v9  ;;  %v289_v7 = vpop.f32.mrf.mxu1 }
  0x93   :  { %v147_v22 = vpop.f32.mrf.mxu0  ;;  %v374_v55 = vpop.f32.mrf.mxu2 }
  0x94   :  { %v290_v23 = vadd.f32 %v289_v7, %v147_v22 }
  0x95   :  { %v474_v62 = vpop.f32.mrf.mxu3  ;;  %667 = vmatmul.f32.gmra.mxu1 %v2628_v9 }
  0x96   :  { %v375_v58 = vadd.f32 %v374_v55, %v290_v23  ;;  %585 = vmatmul.f32.gmra.mxu0 %v2628_v9 }
  0x98   :  { %v2960_v63 = vadd.f32 %v474_v62, %v375_v58  ;;  %765 = vmatmul.f32.gmra.mxu2 %v2687_v38 }
  0x9a   :  { %903 = vmatmul.f32.gmra.mxu3 %v2650_v19  ;;  %v293_v34 = vpop.f32.mrf.mxu1 }
  0x9b   :  { %v155_v29 = vpop.f32.mrf.mxu0  ;;  %v379_v22 = vpop.f32.mrf.mxu2 }
  0x9c   :  { %v294_v44 = vadd.f32 %v293_v34, %v155_v29 }
  0x9d   :  { %v480_v7 = vpop.f32.mrf.mxu3  ;;  %671 = vmatmul.f32.gmra.mxu1 %v2650_v19 }
  0x9e   :  { %v380_v37 = vadd.f32 %v379_v22, %v294_v44  ;;  %589 = vmatmul.f32.gmra.mxu0 %v2650_v19  ;;  %v1344_v22 = vld [vmem:[%s4023_s2 + $0x30] sm:$0xff] }
  0x9f   :  { %1378 = vperm.xlu0 %2539, %v1344_v22  }
  0xa0   :  { %v2966_v48 = vadd.f32 %v480_v7, %v380_v37  ;;  %773 = vmatmul.f32.gmra.mxu2 %v2707_v45 }
  0xa2   :  { %907 = vmatmul.f32.gmra.mxu3 %v2672_v31  ;;  %v297_v38 = vpop.f32.mrf.mxu1 }
  0xa3   :  { %v163_v55 = vpop.f32.mrf.mxu0  ;;  %v384_v62 = vpop.f32.mrf.mxu2 }
  0xa4   :  { %v298_v23 = vadd.f32 %v297_v38, %v163_v55 }
  0xa5   :  { %v486_v58 = vpop.f32.mrf.mxu3  ;;  %675 = vmatmul.f32.gmra.mxu1 %v2672_v31 }
  0xa6   :  { %v385_v33 = vadd.f32 %v384_v62, %v298_v23  ;;  %593 = vmatmul.f32.gmra.mxu0 %v2672_v31 }
  0xa8   :  { %v2972_v29 = vadd.f32 %v486_v58, %v385_v33  ;;  %781 = vmatmul.f32.gmra.mxu2 %v2727_v52  ;;  %v1342_v58 = vld [vmem:[%s4023_s2 + $0x20] sm:$0xff] }
  0xa9   :  { %1368 = vperm.xlu2 %2541, %v1342_v58  }
  0xaa   :  { %911 = vmatmul.f32.gmra.mxu3 %v2692_v40  ;;  %v301_v45 = vpop.f32.mrf.mxu1 }
  0xab   :  { %v171_v37 = vpop.f32.mrf.mxu0  ;;  %v389_v44 = vpop.f32.mrf.mxu2 }
  0xac   :  { %v302_v34 = vadd.f32 %v301_v45, %v171_v37  ;;  %v1345_v37 = vld [vmem:[%s4023_s2 + $0x38] sm:$0xff] }
  0xad   :  { %v492_v7 = vpop.f32.mrf.mxu3  ;;  %679 = vmatmul.f32.gmra.mxu1 %v2692_v40  ;;  %1383 = vperm.xlu1 %2540, %v1345_v37  }
  0xae   :  { %v390_v55 = vadd.f32 %v389_v44, %v302_v34  ;;  %597 = vmatmul.f32.gmra.mxu0 %v2692_v40 }
  0xb0   :  { %v2981_v33 = vadd.f32 %v492_v7, %v390_v55  ;;  %789 = vmatmul.f32.gmra.mxu2 %v2747_v59 }
  0xb2   :  { %915 = vmatmul.f32.gmra.mxu3 %v2712_v47  ;;  %v305_v38 = vpop.f32.mrf.mxu1 }
  0xb3   :  { %v179_v52 = vpop.f32.mrf.mxu0  ;;  %v394_v62 = vpop.f32.mrf.mxu2 }
  0xb4   :  { %v306_v23 = vadd.f32 %v305_v38, %v179_v52  ;;  %v1343_v52 = vld [vmem:[%s4023_s2 + $0x28] sm:$0xff] }
  0xb5   :  { %v498_v45 = vpop.f32.mrf.mxu3  ;;  %683 = vmatmul.f32.gmra.mxu1 %v2712_v47  ;;  %1373 = vperm.xlu2 %2541, %v1343_v52  }
  0xb6   :  { %v395_v34 = vadd.f32 %v394_v62, %v306_v23  ;;  %601 = vmatmul.f32.gmra.mxu0 %v2712_v47 }
  0xb8   :  { %v2993_v59 = vadd.f32 %v498_v45, %v395_v34  ;;  %797 = vmatmul.f32.gmra.mxu2 %v2767_v2 }
  0xba   :  { %919 = vmatmul.f32.gmra.mxu3 %v2732_v54  ;;  %v309_v22 = vpop.f32.mrf.mxu1 }
  0xbb   :  { %v187_v44 = vpop.f32.mrf.mxu0  ;;  %v399_v55 = vpop.f32.mrf.mxu2 }
  0xbc   :  { %v310_v7 = vadd.f32 %v309_v22, %v187_v44 }
  0xbd   :  { %v504_v38 = vpop.f32.mrf.mxu3  ;;  %687 = vmatmul.f32.gmra.mxu1 %v2732_v54 }
  0xbe   :  { %v400_v23 = vadd.f32 %v399_v55, %v310_v7  ;;  %605 = vmatmul.f32.gmra.mxu0 %v2732_v54 }
  0xc0   :  { %v3002_v62 = vadd.f32 %v504_v38, %v400_v23  ;;  %805 = vmatmul.f32.gmra.mxu2 %v2787_v12 }
  0xc2   :  { %923 = vmatmul.f32.gmra.mxu3 %v2752_v61  ;;  %v313_v58 = vpop.f32.mrf.mxu1 }
  0xc3   :  { %v195_v2 = vpop.f32.mrf.mxu0  ;;  %v404_v45 = vpop.f32.mrf.mxu2 }
  0xc4   :  { %v314_v37 = vadd.f32 %v313_v58, %v195_v2 }
  0xc5   :  { %v510_v34 = vpop.f32.mrf.mxu3  ;;  %691 = vmatmul.f32.gmra.mxu1 %v2752_v61 }
  0xc6   :  { %v405_v44 = vadd.f32 %v404_v45, %v314_v37  ;;  %609 = vmatmul.f32.gmra.mxu0 %v2752_v61 }
  0xc8   :  { %v3008_v22 = vadd.f32 %v510_v34, %v405_v44  ;;  %813 = vmatmul.f32.gmra.mxu2 %v2807_v24 }
  0xca   :  { %927 = vmatmul.f32.gmra.mxu3 %v2772_v4  ;;  %v317_v12 = vpop.f32.mrf.mxu1 }
  0xcb   :  { %v203_v7 = vpop.f32.mrf.mxu0  ;;  %v409_v52 = vpop.f32.mrf.mxu2 }
  0xcc   :  { %v318_v55 = vadd.f32 %v317_v12, %v203_v7 }
  0xcd   :  { %v516_v38 = vpop.f32.mrf.mxu3  ;;  %695 = vmatmul.f32.gmra.mxu1 %v2772_v4 }
  0xce   :  { %v410_v23 = vadd.f32 %v409_v52, %v318_v55  ;;  %613 = vmatmul.f32.gmra.mxu0 %v2772_v4 }
  0xd0   :  { %v3014_v2 = vadd.f32 %v516_v38, %v410_v23  ;;  %821 = vmatmul.f32.gmra.mxu2 %v2827_v35 }
  0xd2   :  { %931 = vmatmul.f32.gmra.mxu3 %v2792_v16  ;;  %v321_v24 = vpop.f32.mrf.mxu1 }
  0xd3   :  { %v211_v58 = vpop.f32.mrf.mxu0  ;;  %v414_v45 = vpop.f32.mrf.mxu2 }
  0xd4   :  { %v322_v37 = vadd.f32 %v321_v24, %v211_v58 }
  0xd5   :  { %v522_v34 = vpop.f32.mrf.mxu3  ;;  %699 = vmatmul.f32.gmra.mxu1 %v2792_v16 }
  0xd6   :  { %v415_v44 = vadd.f32 %v414_v45, %v322_v37  ;;  %617 = vmatmul.f32.gmra.mxu0 %v2792_v16 }
  0xd8   :  { %v3020_v7 = vadd.f32 %v522_v34, %v415_v44  ;;  %829 = vmatmul.f32.gmra.mxu2 %v2847_v51 }
  0xda   :  { %935 = vmatmul.f32.gmra.mxu3 %v2812_v27  ;;  %v325_v35 = vpop.f32.mrf.mxu1 }
  0xdb   :  { %v219_v12 = vpop.f32.mrf.mxu0  ;;  %v419_v52 = vpop.f32.mrf.mxu2 }
  0xdc   :  { %v326_v55 = vadd.f32 %v325_v35, %v219_v12 }
  0xdd   :  { %v528_v38 = vpop.f32.mrf.mxu3  ;;  %703 = vmatmul.f32.gmra.mxu1 %v2812_v27 }
  0xde   :  { %v420_v23 = vadd.f32 %v419_v52, %v326_v55  ;;  %621 = vmatmul.f32.gmra.mxu0 %v2812_v27 }
  0xe0   :  { %v3026_v58 = vadd.f32 %v528_v38, %v420_v23  ;;  %837 = vmatmul.f32.gmra.mxu2 %v2867_v6 }
  0xe2   :  { %939 = vmatmul.f32.gmra.mxu3 %v2832_v41  ;;  %v329_v51 = vpop.f32.mrf.mxu1 }
  0xe3   :  { %v227_v24 = vpop.f32.mrf.mxu0  ;;  %v424_v45 = vpop.f32.mrf.mxu2 }
  0xe4   :  { %v330_v37 = vadd.f32 %v329_v51, %v227_v24 }
  0xe5   :  { %v534_v34 = vpop.f32.mrf.mxu3  ;;  %707 = vmatmul.f32.gmra.mxu1 %v2832_v41 }
  0xe6   :  { %v425_v44 = vadd.f32 %v424_v45, %v330_v37  ;;  %625 = vmatmul.f32.gmra.mxu0 %v2832_v41 }
  0xe8   :  { %v3032_v12 = vadd.f32 %v534_v34, %v425_v44  ;;  %845 = vmatmul.f32.gmra.mxu2 %v2887_v32 }
  0xea   :  { %943 = vmatmul.f32.gmra.mxu3 %v2852_v56  ;;  %v333_v6 = vpop.f32.mrf.mxu1 }
  0xeb   :  { %v235_v35 = vpop.f32.mrf.mxu0  ;;  %v429_v52 = vpop.f32.mrf.mxu2 }
  0xec   :  { %v334_v55 = vadd.f32 %v333_v6, %v235_v35 }
  0xed   :  { %v540_v38 = vpop.f32.mrf.mxu3  ;;  %711 = vmatmul.f32.gmra.mxu1 %v2852_v56 }
  0xee   :  { %v430_v23 = vadd.f32 %v429_v52, %v334_v55  ;;  %629 = vmatmul.f32.gmra.mxu0 %v2852_v56 }
  0xf0   :  { %v3038_v24 = vadd.f32 %v540_v38, %v430_v23  ;;  %853 = vmatmul.f32.gmra.mxu2 %v2907_v1 }
  0xf2   :  { %947 = vmatmul.f32.gmra.mxu3 %v2872_v11  ;;  %v337_v32 = vpop.f32.mrf.mxu1 }
  0xf3   :  { %v243_v51 = vpop.f32.mrf.mxu0  ;;  %v434_v45 = vpop.f32.mrf.mxu2 }
  0xf4   :  { %v338_v37 = vadd.f32 %v337_v32, %v243_v51 }
  0xf5   :  { %v546_v34 = vpop.f32.mrf.mxu3  ;;  %715 = vmatmul.f32.gmra.mxu1 %v2872_v11 }
  0xf6   :  { %v435_v44 = vadd.f32 %v434_v45, %v338_v37  ;;  %633 = vmatmul.f32.gmra.mxu0 %v2872_v11 }
  0xf8   :  { %v3044_v35 = vadd.f32 %v546_v34, %v435_v44  ;;  %861 = vmatmul.f32.gmra.mxu2 %v2923_v49 }
  0xfa   :  { %951 = vmatmul.f32.gmra.mxu3 %v2892_v42  ;;  %v341_v1 = vpop.f32.mrf.mxu1 }
  0xfb   :  { %v251_v6 = vpop.f32.mrf.mxu0  ;;  %v439_v52 = vpop.f32.mrf.mxu2 }
  0xfc   :  { %v342_v55 = vadd.f32 %v341_v1, %v251_v6 }
  0xfd   :  { %v552_v38 = vpop.f32.mrf.mxu3  ;;  %719 = vmatmul.f32.gmra.mxu1 %v2892_v42 }
  0xfe   :  { %v440_v23 = vadd.f32 %v439_v52, %v342_v55  ;;  %637 = vmatmul.f32.gmra.mxu0 %v2892_v42 }
 0x100   :  { %v3050_v51 = vadd.f32 %v552_v38, %v440_v23  ;;  %869 = vmatmul.f32.gmra.mxu2 %v2937_v28 }
 0x102   :  { %955 = vmatmul.f32.gmra.mxu3 %v2912_v20  ;;  %v345_v49 = vpop.f32.mrf.mxu1 }
 0x103   :  { %v259_v32 = vpop.f32.mrf.mxu0  ;;  %v444_v45 = vpop.f32.mrf.mxu2 }
 0x104   :  { %v346_v37 = vadd.f32 %v345_v49, %v259_v32 }
 0x105   :  { %v558_v34 = vpop.f32.mrf.mxu3  ;;  %723 = vmatmul.f32.gmra.mxu1 %v2912_v20 }
 0x106   :  { %v445_v44 = vadd.f32 %v444_v45, %v346_v37  ;;  %641 = vmatmul.f32.gmra.mxu0 %v2912_v20 }
 0x108   :  { %v3056_v6 = vadd.f32 %v558_v34, %v445_v44  ;;  %1192 = vmatmul.f32.vlgmr.msra.gmra.mxu2 %v2622_v5 }
 0x10a   :  { %1274 = vmatmul.f32.vlgmr.msra.gmra.mxu3 %v2622_v5  ;;  %v664_v28 = vpop.f32.mrf.mxu1 }
 0x10b   :  { %v582_v1 = vpop.f32.mrf.mxu0  ;;  %v750_v52 = vpop.f32.mrf.mxu2 }
 0x10c   :  { %v583_v55 = vadd.f32 %v582_v1, %v2951_v17 }
 0x10d   :  { %v896_v38 = vpop.f32.mrf.mxu3  ;;  %1078 = vmatmul.f32.vlgmr.msra.gmra.mxu1 %v2642_v15 }
 0x10e   :  { %v3061_v23 = vadd.f32 %v664_v28, %v583_v55  ;;  %979 = vmatmul.f32.vlgmr.msra.gmra.mxu0 %v2631_v10  ;;  %v3064_v32 = vadd.f32 %v896_v38, %v750_v52 }
 0x110   :  { %1196 = vmatmul.f32.gmra.mxu2 %v2628_v9 }
 0x112   :  { %1278 = vmatmul.f32.gmra.mxu3 %v2628_v9  ;;  %v668_v5 = vpop.f32.mrf.mxu1 }
 0x113   :  { %v586_v49 = vpop.f32.mrf.mxu0  ;;  %v758_v45 = vpop.f32.mrf.mxu2 }
 0x114   :  { %v587_v37 = vadd.f32 %v586_v49, %v2960_v63 }
 0x115   :  { %v900_v17 = vpop.f32.mrf.mxu3  ;;  %1084 = vmatmul.f32.gmra.mxu1 %v2648_v18 }
 0x116   :  { %v3070_v34 = vadd.f32 %v668_v5, %v587_v37  ;;  %984 = vmatmul.f32.gmra.mxu0 %v2637_v13  ;;  %v3073_v44 = vadd.f32 %v900_v17, %v758_v45 }
 0x118   :  { %1200 = vmatmul.f32.gmra.mxu2 %v2650_v19 }
 0x11a   :  { %1282 = vmatmul.f32.gmra.mxu3 %v2650_v19  ;;  %v672_v9 = vpop.f32.mrf.mxu1 }
 0x11b   :  { %v590_v10 = vpop.f32.mrf.mxu0  ;;  %v766_v1 = vpop.f32.mrf.mxu2 }
 0x11c   :  { %v591_v15 = vadd.f32 %v590_v10, %v2966_v48 }
 0x11d   :  { %v904_v63 = vpop.f32.mrf.mxu3  ;;  %1090 = vmatmul.f32.gmra.mxu1 %v2670_v30 }
 0x11e   :  { %v3079_v28 = vadd.f32 %v672_v9, %v591_v15  ;;  %989 = vmatmul.f32.gmra.mxu0 %v2662_v25  ;;  %v3082_v55 = vadd.f32 %v904_v63, %v766_v1 }
 0x120   :  { %4059 = vst [vmem:[#allocation14_spill] sm:$0xff] %v3082_v55  ;;  %1204 = vmatmul.f32.gmra.mxu2 %v2672_v31 }
 0x122   :  { %1286 = vmatmul.f32.gmra.mxu3 %v2672_v31  ;;  %v676_v18 = vpop.f32.mrf.mxu1 }
 0x123   :  { %v594_v13 = vpop.f32.mrf.mxu0  ;;  %v774_v52 = vpop.f32.mrf.mxu2 }
 0x124   :  { %v595_v19 = vadd.f32 %v594_v13, %v2972_v29 }
 0x125   :  { %v908_v48 = vpop.f32.mrf.mxu3  ;;  %1096 = vmatmul.f32.gmra.mxu1 %v2690_v39 }
 0x126   :  { %v3088_v38 = vadd.f32 %v676_v18, %v595_v19  ;;  %994 = vmatmul.f32.gmra.mxu0 %v2682_v36  ;;  %v3091_v49 = vadd.f32 %v908_v48, %v774_v52 }
 0x128   :  { %4060 = vst [vmem:[#allocation15_spill] sm:$0xff] %v3091_v49  ;;  %1208 = vmatmul.f32.gmra.mxu2 %v2692_v40 }
 0x12a   :  { %1290 = vmatmul.f32.gmra.mxu3 %v2692_v40  ;;  %v680_v30 = vpop.f32.mrf.mxu1 }
 0x12b   :  { %v598_v25 = vpop.f32.mrf.mxu0  ;;  %v782_v5 = vpop.f32.mrf.mxu2 }
 0x12c   :  { %v599_v31 = vadd.f32 %v598_v25, %v2981_v33 }
 0x12d   :  { %v912_v29 = vpop.f32.mrf.mxu3  ;;  %1102 = vmatmul.f32.gmra.mxu1 %v2710_v46 }
 0x12e   :  { %v3097_v37 = vadd.f32 %v680_v30, %v599_v31  ;;  %999 = vmatmul.f32.gmra.mxu0 %v2702_v43  ;;  %v3100_v45 = vadd.f32 %v912_v29, %v782_v5  ;;  %v4066_v30 = vld [vmem:[#allocation3_spill] sm:$0xff]  ;;  %v4067_v5 = vld [vmem:[#allocation4_spill] sm:$0xff]  ;;  %v4068_v29 = vld [vmem:[#allocation5_spill] sm:$0xff] }
 0x130   :  { %4061 = vst [vmem:[#allocation16_spill] sm:$0xff] %v3100_v45  ;;  %1212 = vmatmul.f32.gmra.mxu2 %v2712_v47 }
 0x132   :  { %1294 = vmatmul.f32.gmra.mxu3 %v2712_v47  ;;  %v684_v39 = vpop.f32.mrf.mxu1 }
 0x133   :  { %v602_v36 = vpop.f32.mrf.mxu0  ;;  %v790_v17 = vpop.f32.mrf.mxu2 }
 0x134   :  { %v603_v40 = vadd.f32 %v602_v36, %v2993_v59 }
 0x135   :  { %v916_v33 = vpop.f32.mrf.mxu3  ;;  %1108 = vmatmul.f32.gmra.mxu1 %v2730_v53 }
 0x136   :  { %v3106_v10 = vadd.f32 %v684_v39, %v603_v40  ;;  %1004 = vmatmul.f32.gmra.mxu0 %v2722_v50  ;;  %v3109_v9 = vadd.f32 %v916_v33, %v790_v17 }
 0x138   :  { %4062 = vst [vmem:[#allocation17_spill] sm:$0xff] %v3109_v9  ;;  %1216 = vmatmul.f32.gmra.mxu2 %v2732_v54 }
 0x13a   :  { %1298 = vmatmul.f32.gmra.mxu3 %v2732_v54  ;;  %v688_v46 = vpop.f32.mrf.mxu1 }
 0x13b   :  { %v606_v43 = vpop.f32.mrf.mxu0  ;;  %v798_v15 = vpop.f32.mrf.mxu2 }
 0x13c   :  { %v607_v47 = vadd.f32 %v606_v43, %v3002_v62 }
 0x13d   :  { %v920_v59 = vpop.f32.mrf.mxu3  ;;  %1114 = vmatmul.f32.gmra.mxu1 %v2750_v60 }
 0x13e   :  { %v3115_v1 = vadd.f32 %v688_v46, %v607_v47  ;;  %1009 = vmatmul.f32.gmra.mxu0 %v2742_v57  ;;  %v3118_v63 = vadd.f32 %v920_v59, %v798_v15  ;;  %v4069_v47 = vld [vmem:[#allocation6_spill] sm:$0xff]  ;;  %v4070_v15 = vld [vmem:[#allocation7_spill] sm:$0xff] }
 0x140   :  { %4063 = vst [vmem:[#allocation18_spill] sm:$0xff] %v3118_v63  ;;  %1220 = vmatmul.f32.gmra.mxu2 %v2752_v61 }
 0x142   :  { %1302 = vmatmul.f32.gmra.mxu3 %v2752_v61  ;;  %v692_v53 = vpop.f32.mrf.mxu1 }
 0x143   :  { %v610_v50 = vpop.f32.mrf.mxu0  ;;  %v806_v13 = vpop.f32.mrf.mxu2 }
 0x144   :  { %v611_v54 = vadd.f32 %v610_v50, %v3008_v22 }
 0x145   :  { %v924_v62 = vpop.f32.mrf.mxu3  ;;  %1120 = vmatmul.f32.gmra.mxu1 %v2770_v3 }
 0x146   :  { %v3124_v18 = vadd.f32 %v692_v53, %v611_v54  ;;  %1014 = vmatmul.f32.gmra.mxu0 %v2762_v0  ;;  %v3127_v19 = vadd.f32 %v924_v62, %v806_v13 }
 0x148   :  { %4064 = vst [vmem:[#allocation19_spill] sm:$0xff] %v3127_v19  ;;  %1224 = vmatmul.f32.gmra.mxu2 %v2772_v4 }
 0x14a   :  { %1306 = vmatmul.f32.gmra.mxu3 %v2772_v4  ;;  %v696_v60 = vpop.f32.mrf.mxu1 }
 0x14b   :  { %v614_v57 = vpop.f32.mrf.mxu0  ;;  %v3132_v61 = vpop.f32.mrf.mxu2 }
 0x14c   :  { %v615_v36 = vadd.f32 %v614_v57, %v3014_v2 }
 0x14d   :  { %v3134_v52 = vpop.f32.mrf.mxu3  ;;  %1126 = vmatmul.f32.gmra.mxu1 %v2790_v14 }
 0x14e   :  { %1019 = vmatmul.f32.gmra.mxu0 %v2782_v8  ;;  %v697_v43 = vadd.f32 %v696_v60, %v615_v36 }
 0x150   :  { %1228 = vmatmul.f32.gmra.mxu2 %v2792_v16 }
 0x152   :  { %1310 = vmatmul.f32.gmra.mxu3 %v2792_v16  ;;  %v700_v3 = vpop.f32.mrf.mxu1  ;;  %v4065_v16 = vld [vmem:[#allocation2_spill] sm:$0xff] }
 0x153   :  { %v618_v0 = vpop.f32.mrf.mxu0  ;;  %v3140_v22 = vpop.f32.mrf.mxu2 }
 0x154   :  { %v619_v2 = vadd.f32 %v618_v0, %v3020_v7  ;;  %v4072_v7 = vld [vmem:[#allocation9_spill] sm:$0xff] }
 0x155   :  { %v3142_v48 = vpop.f32.mrf.mxu3  ;;  %1132 = vmatmul.f32.gmra.mxu1 %v2810_v26 }
 0x156   :  { %1024 = vmatmul.f32.gmra.mxu0 %v2802_v21 }
 0x158   :  { %1232 = vmatmul.f32.gmra.mxu2 %v2812_v27 }
 0x15a   :  { %1314 = vmatmul.f32.gmra.mxu3 %v2812_v27  ;;  %v704_v8 = vpop.f32.mrf.mxu1 }
 0x15b   :  { %v622_v4 = vpop.f32.mrf.mxu0  ;;  %v3148_v14 = vpop.f32.mrf.mxu2 }
 0x15d   :  { %v3150_v25 = vpop.f32.mrf.mxu3  ;;  %1138 = vmatmul.f32.gmra.mxu1 %v4066_v30 }
 0x15e   :  { %1029 = vmatmul.f32.gmra.mxu0 %v4065_v16  ;;  %v701_v16 = vadd.f32 %v700_v3, %v619_v2  ;;  %v4074_v2 = vld [vmem:[#allocation11_spill] sm:$0xff] }
 0x160   :  { %1236 = vmatmul.f32.gmra.mxu2 %v2832_v41 }
 0x162   :  { %1318 = vmatmul.f32.gmra.mxu3 %v2832_v41  ;;  %v3156_v26 = vpop.f32.mrf.mxu1 }
 0x163   :  { %v626_v21 = vpop.f32.mrf.mxu0  ;;  %v3158_v31 = vpop.f32.mrf.mxu2 }
 0x165   :  { %v3160_v27 = vpop.f32.mrf.mxu3  ;;  %1144 = vmatmul.f32.gmra.mxu1 %v4068_v29 }
 0x166   :  { %1034 = vmatmul.f32.gmra.mxu0 %v4067_v5  ;;  %v4071_v5 = vld [vmem:[#allocation8_spill] sm:$0xff] }
 0x168   :  { %1240 = vmatmul.f32.gmra.mxu2 %v2852_v56 }
 0x16a   :  { %1322 = vmatmul.f32.gmra.mxu3 %v2852_v56  ;;  %v712_v40 = vpop.f32.mrf.mxu1 }
 0x16b   :  { %v630_v39 = vpop.f32.mrf.mxu0  ;;  %v3168_v17 = vpop.f32.mrf.mxu2 }
 0x16c   :  { %v631_v41 = vadd.f32 %v630_v39, %v3038_v24 }
 0x16d   :  { %v3170_v33 = vpop.f32.mrf.mxu3  ;;  %1150 = vmatmul.f32.gmra.mxu1 %v4070_v15 }
 0x16e   :  { %v713_v46 = vadd.f32 %v712_v40, %v631_v41  ;;  %1039 = vmatmul.f32.gmra.mxu0 %v4069_v47 }
 0x170   :  { %v1402_v59 = vmax.f32 %v697_v43, %v713_v46  ;;  %1244 = vmatmul.f32.gmra.mxu2 %v2872_v11 }
 0x172   :  { %v1410_v56 = vsub.f32 %v697_v43, %v1402_v59  ;;  %v1418_v50 = vsub.f32 %v713_v46, %v1402_v59  ;;  %1326 = vmatmul.f32.gmra.mxu3 %v2872_v11  ;;  %v716_v53 = vpop.f32.mrf.mxu1  ;;  %v623_v11 = vadd.f32 %v622_v4, %v3026_v58  ;;  %v4073_v4 = vld [vmem:[#allocation10_spill] sm:$0xff] }
 0x173   :  { %v634_v24 = vpop.f32.mrf.mxu0  ;;  %v3178_v57 = vpop.f32.mrf.mxu2 }
 0x174   :  { %v1426_v54 = vmul.f32 1.442695, %v1410_v56  ;;  %v1442_v13 = vmul.f32 1.442695, %v1418_v50  ;;  %v635_v62 = vadd.f32 %v634_v24, %v3044_v35  ;;  %v705_v59 = vadd.f32 %v704_v8, %v623_v11  ;;  %v4075_v11 = vld [vmem:[#allocation12_spill] sm:$0xff] }
 0x175   :  { %v3180_v60 = vpop.f32.mrf.mxu3  ;;  %1156 = vmatmul.f32.gmra.mxu1 %v4072_v7 }
 0x176   :  { %2542 = vpow2.f32 %v1426_v54  ;;  %v717_v30 = vadd.f32 %v716_v53, %v635_v62  ;;  %1044 = vmatmul.f32.gmra.mxu0 %v4071_v5 }
 0x177   :  { %2544 = vpow2.f32 %v1442_v13 }
 0x178   :  { %v1404_v0 = vmax.f32 %v701_v16, %v717_v30  ;;  %1248 = vmatmul.f32.gmra.mxu2 %v2892_v42 }
 0x17a   :  { %v1412_v29 = vsub.f32 %v701_v16, %v1404_v0  ;;  %v1420_v36 = vsub.f32 %v717_v30, %v1404_v0  ;;  %1330 = vmatmul.f32.gmra.mxu3 %v2892_v42  ;;  %v720_v39 = vpop.f32.mrf.mxu1 }
 0x17b   :  { %v638_v35 = vpop.f32.mrf.mxu0  ;;  %v3190_v46 = vpop.f32.mrf.mxu2 }
 0x17c   :  { %v3187_v40 = vpop.eup %2542  ;;  %v1430_v3 = vmul.f32 1.442695, %v1412_v29  ;;  %v1446_v41 = vmul.f32 1.442695, %v1420_v36  ;;  %v639_v43 = vadd.f32 %v638_v35, %v3050_v51  ;;  %v627_v51 = vadd.f32 %v626_v21, %v3032_v12  ;;  %v4076_v29 = vld [vmem:[#allocation13_spill] sm:$0xff] }
 0x17d   :  { %v3192_v47 = vpop.eup %2544  ;;  %v3194_v15 = vpop.f32.mrf.mxu3  ;;  %1162 = vmatmul.f32.gmra.mxu1 %v4074_v2 }
 0x17e   :  { %v1458_v58 = vadd.f32 %v3192_v47, %v3187_v40  ;;  %2546 = vpow2.f32 %v1430_v3  ;;  %v721_v42 = vadd.f32 %v720_v39, %v639_v43  ;;  %1049 = vmatmul.f32.gmra.mxu0 %v4073_v4  ;;  %v709_v12 = vadd.f32 %v3156_v26, %v627_v51 }
 0x17f   :  { %2548 = vpow2.f32 %v1446_v41 }
 0x180   :  { %2550 = vrcp.f32 %v1458_v58  ;;  %v1406_v56 = vmax.f32 %v705_v59, %v721_v42  ;;  %1252 = vmatmul.f32.gmra.mxu2 %v2912_v20  ;;  %v1475_v51 = vand.u32 2147483647, %v1458_v58  ;;  %vm1471_vm2 = vweird.f32 %v1458_v58 }
 0x182   :  { %v1414_v50 = vsub.f32 %v705_v59, %v1406_v56  ;;  %v1422_v24 = vsub.f32 %v721_v42, %v1406_v56  ;;  %1334 = vmatmul.f32.gmra.mxu3 %v2912_v20  ;;  %v724_v53 = vpop.f32.mrf.mxu1  ;;  %v1477_v59 = vand.u32 2147483648, %v1458_v58  ;;  %vm1476_vm4 = vcmp.eq.f32.partialorder %v1475_v51, 8.507059e+37 }
 0x183   :  { %v642_v8 = vpop.f32.mrf.mxu0  ;;  %v3206_v30 = vpop.f32.mrf.mxu2 }
 0x184   :  { %v3203_v54 = vpop.eup %2546  ;;  %v1434_v13 = vmul.f32 1.442695, %v1414_v50  ;;  %v1450_v62 = vmul.f32 1.442695, %v1422_v24  ;;  %v643_v16 = vadd.f32 %v642_v8, %v3056_v6 }
 0x185   :  { %v3208_v5 = vpop.eup %2548  ;;  %v3210_v7 = vpop.f32.mrf.mxu3  ;;  %1168 = vmatmul.f32.gmra.mxu1 %v4076_v29 }
 0x186   :  { %v2551_v0 = vpop.eup %2550  ;;  %v1460_v20 = vadd.f32 %v3208_v5, %v3203_v54  ;;  %2552 = vpow2.f32 %v1434_v13  ;;  %v725_v21 = vadd.f32 %v724_v53, %v643_v16  ;;  %1054 = vmatmul.f32.gmra.mxu0 %v4075_v11 }
 0x187   :  { %2554 = vpow2.f32 %v1450_v62  ;;  %v1467_v6 = vmul.f32 %v2551_v0, %v1458_v58  ;;  %vm1472_vm1 = vweird.f32 %v2551_v0 }
 0x188   :  { %2556 = vrcp.f32 %v1460_v20  ;;  %v1408_v36 = vmax.f32 %v709_v12, %v725_v21  ;;  %vm1473_vm3 = vmor %vm1471_vm2, %vm1472_vm1  ;;  %vm1501_vm6 = vweird.f32 %v1460_v20 }
 0x189   :  { %v1468_v35 = vsub.f32 1.0, %v1467_v6 }
 0x18a   :  { %v1416_v39 = vsub.f32 %v709_v12, %v1408_v36  ;;  %v1424_v3 = vsub.f32 %v725_v21, %v1408_v36  ;;  %v3219_v43 = vpop.f32.mrf.mxu1  ;;  %v1478_v12 = vor.u32 1.1754944e-38, %v1477_v59 }
 0x18b   :  { %v3217_v41 = vpop.f32.mrf.mxu0  ;;  %v1469_v26 = vmul.f32 %v2551_v0, %v1468_v35  ;;  %v3223_v56 = vpop.f32.mrf.mxu2 }
 0x18c   :  { %v3221_v42 = vpop.eup %2552  ;;  %v1438_v4 = vmul.f32 1.442695, %v1416_v39  ;;  %v1454_v2 = vmul.f32 1.442695, %v1424_v3  ;;  %v1507_v39 = vand.u32 2147483648, %v1460_v20 }
 0x18d   :  { %v2555_v50 = vpop.eup %2554  ;;  %v3225_v24 = vpop.f32.mrf.mxu3  ;;  %v1470_v8 = vadd.f32 %v2551_v0, %v1469_v26  ;;  %v1505_v26 = vand.u32 2147483647, %v1460_v20 }
 0x18e   :  { %4077 = vst [vmem:[#allocation2_spill] sm:$0xff] %v3225_v24  ;;  %v2557_v53 = vpop.eup %2556  ;;  %v1462_v13 = vadd.f32 %v2555_v50, %v3221_v42  ;;  %2558 = vpow2.f32 %v1438_v4 }
 0x18f   :  { %2560 = vpow2.f32 %v1454_v2  ;;  %v1497_v62 = vmul.f32 %v2557_v53, %v1460_v20  ;;  %v1474_v16 = vsel %vm1473_vm3, %v2551_v0, %v1470_v8  ;;  %vm1502_vm5 = vweird.f32 %v2557_v53 }
 0x190   :  { %2562 = vrcp.f32 %v1462_v13  ;;  %v1479_v11 = vsel %vm1476_vm4, %v1478_v12, %v1474_v16  ;;  %vm1503_vm7 = vmor %vm1501_vm6, %vm1502_vm5  ;;  %vm1506_vm8 = vcmp.eq.f32.partialorder %v1505_v26, 8.507059e+37  ;;  %v1535_v20 = vand.u32 2147483647, %v1462_v13 }
 0x191   :  { %v1498_v21 = vsub.f32 1.0, %v1497_v62  ;;  %v3229_v29 = vmul.f32 %v3192_v47, %v1479_v11  ;;  %v3232_v6 = vmul.f32 %v3187_v40, %v1479_v11  ;;  %v1508_v62 = vor.u32 1.1754944e-38, %v1507_v39 }
 0x192   :  { %v3236_v36 = vpop.f32.mrf.mxu1  ;;  %vm1531_vm10 = vweird.f32 %v1462_v13  ;;  %vm1536_vm12 = vcmp.eq.f32.partialorder %v1535_v20, 8.507059e+37 }
 0x193   :  { %v3234_v58 = vpop.f32.mrf.mxu0  ;;  %4079 = vst [vmem:[#allocation4_spill] sm:$0xff] %v3236_v36  ;;  %v1499_v35 = vmul.f32 %v2557_v53, %v1498_v21  ;;  %v3238_v0 = vpop.f32.mrf.mxu2  ;;  %v1537_v21 = vand.u32 2147483648, %v1462_v13 }
 0x194   :  { %4078 = vst [vmem:[#allocation3_spill] sm:$0xff] %v3234_v58  ;;  %v2559_v3 = vpop.eup %2558  ;;  %v3438_v58 = vpop.permute.xlu2 %1368 }
 0x195   :  { %4080 = vst [vmem:[#allocation5_spill] sm:$0xff] %v3238_v0  ;;  %v2561_v59 = vpop.eup %2560  ;;  %v3240_v4 = vpop.f32.mrf.mxu3  ;;  %v1500_v2 = vadd.f32 %v2557_v53, %v1499_v35 }
 0x196   :  { %4081 = vst [vmem:[#allocation6_spill] sm:$0xff] %v3240_v4  ;;  %v2563_v47 = vpop.eup %2562  ;;  %v1464_v51 = vadd.f32 %v2561_v59, %v2559_v3 }
 0x197   :  { %v1527_v40 = vmul.f32 %v2563_v47, %v1462_v13  ;;  %v1504_v8 = vsel %vm1503_vm7, %v2557_v53, %v1500_v2  ;;  %vm1532_vm9 = vweird.f32 %v2563_v47  ;;  %v1538_v2 = vor.u32 1.1754944e-38, %v1537_v21 }
 0x198   :  { %2564 = vrcp.f32 %v1464_v51  ;;  %v1509_v12 = vsel %vm1506_vm8, %v1508_v62, %v1504_v8  ;;  %vm1533_vm11 = vmor %vm1531_vm10, %vm1532_vm9  ;;  %vm1561_vm14 = vweird.f32 %v1464_v51 }
 0x199   :  { %v1528_v16 = vsub.f32 1.0, %v1527_v40  ;;  %v1588_v11 = vmul.f32 %v3208_v5, %v1509_v12  ;;  %v3248_v35 = vmul.f32 %v3203_v54, %v1509_v12  ;;  %v1567_v54 = vand.u32 2147483648, %v1464_v51 }
 0x19a   :  { %v3245_v63 = vpop.f32.mrf.mxu1 }
 0x19b   :  { %v3243_v19 = vpop.f32.mrf.mxu0  ;;  %4083 = vst [vmem:[#allocation8_spill] sm:$0xff] %v3245_v63  ;;  %v1529_v9 = vmul.f32 %v2563_v47, %v1528_v16  ;;  %v3250_v45 = vpop.f32.mrf.mxu2  ;;  %v1568_v20 = vor.u32 1.1754944e-38, %v1567_v54 }
 0x19c   :  { %4082 = vst [vmem:[#allocation7_spill] sm:$0xff] %v3243_v19 }
 0x19d   :  { %4084 = vst [vmem:[#allocation9_spill] sm:$0xff] %v3250_v45  ;;  %v3252_v53 = vpop.f32.mrf.mxu3  ;;  %v1530_v39 = vadd.f32 %v2563_v47, %v1529_v9  ;;  %v1565_v9 = vand.u32 2147483647, %v1464_v51 }
 0x19e   :  { %4085 = vst [vmem:[#allocation10_spill] sm:$0xff] %v3252_v53  ;;  %v2565_v26 = vpop.eup %2564 }
 0x19f   :  { %v1557_v5 = vmul.f32 %v2565_v26, %v1464_v51  ;;  %v1534_v40 = vsel %vm1533_vm11, %v2563_v47, %v1530_v39  ;;  %vm1562_vm13 = vweird.f32 %v2565_v26  ;;  %vm1566_vm0 = vcmp.eq.f32.partialorder %v1565_v9, 8.507059e+37 }
 0x1a0   :  { %v1539_v8 = vsel %vm1536_vm12, %v1538_v2, %v1534_v40  ;;  %vm1563_vm15 = vmor %vm1561_vm14, %vm1562_vm13 }
 0x1a1   :  { %v1558_v62 = vsub.f32 1.0, %v1557_v5  ;;  %v1590_v16 = vmul.f32 %v2555_v50, %v1539_v8  ;;  %v3255_v49 = vmul.f32 %v3221_v42, %v1539_v8 }
 0x1a2   :  { %v3259_v45 = vpop.f32.mrf.mxu1 }
 0x1a3   :  { %v3257_v12 = vpop.f32.mrf.mxu0  ;;  %4087 = vst [vmem:[#allocation12_spill] sm:$0xff] %v3259_v45  ;;  %v1559_v53 = vmul.f32 %v2565_v26, %v1558_v62  ;;  %v3261_v13 = vpop.f32.mrf.mxu2  ;;  %v3265_v42 = vand.u32 4294901760, %v1590_v16 }
 0x1a4   :  { %4086 = vst [vmem:[#allocation11_spill] sm:$0xff] %v3257_v12 }
 0x1a5   :  { %4088 = vst [vmem:[#allocation13_spill] sm:$0xff] %v3261_v13  ;;  %v3263_v21 = vpop.f32.mrf.mxu3  ;;  %v1560_v47 = vadd.f32 %v2565_v26, %v1559_v53  ;;  %v3274_v13 = vsub.f32 %v1590_v16, %v3265_v42  ;;  %v3276_v53 = vand.u32 4294901760, %v1588_v11 }
 0x1a6   :  { %4089 = vst [vmem:[#allocation20_spill] sm:$0xff] %v3263_v21 }
 0x1a7   :  { %v1564_v50 = vsel %vm1563_vm15, %v2565_v26, %v1560_v47  ;;  %v3288_v26 = vand.u32 4294901760, %v3229_v29  ;;  %v3293_v54 = vsub.f32 %v1588_v11, %v3276_v53  ;;  %v4038_v9 = vand.u32 4294901760, %v3274_v13  ;;  %v3296_v47 = vpop.permute.xlu0 %1348 }
 0x1a8   :  { %v1569_v39 = vsel %vm1566_vm0, %v1568_v20, %v1564_v50  ;;  %4094 = vst [vmem:[#allocation25_spill] sm:$0xff] %v3296_v47 }
 0x1a9   :  { %v1592_v2 = vmul.f32 %v2561_v59, %v1569_v39  ;;  %v1570_v5 = vmul.f32 %v2559_v3, %v1569_v39  ;;  %v3305_v50 = vsub.f32 %v3229_v29, %v3288_v26 }
 0x1aa   :  { %v3271_v62 = vpop.f32.mrf.mxu1 }
 0x1ab   :  { %v3267_v40 = vpop.f32.mrf.mxu0  ;;  %v3269_v8 = vand.u32 4294901760, %v1592_v2  ;;  %4091 = vst [vmem:[#allocation22_spill] sm:$0xff] %v3271_v62  ;;  %v3278_v51 = vpop.f32.mrf.mxu2  ;;  %v4039_v62 = vand.u32 4294901760, %v3293_v54 }
 0x1ac   :  { %4090 = vst [vmem:[#allocation21_spill] sm:$0xff] %v3267_v40  ;;  %v3356_v40 = vand.u32 4294901760, %v3248_v35 }
 0x1ad   :  { %4092 = vst [vmem:[#allocation23_spill] sm:$0xff] %v3278_v51  ;;  %1611 = vmatpush.xpose.msrb.mxu0 %v3269_v8  ;;  %1862 = vmatpush.xpose.msrb.mxu3 %v3269_v8  ;;  %v3283_v59 = vsub.f32 %v1592_v2, %v3269_v8  ;;  %v3285_v3 = vpop.f32.mrf.mxu3  ;;  %v3315_v51 = vand.u32 4294901760, %v1570_v5 }
 0x1ae   :  { %4093 = vst [vmem:[#allocation24_spill] sm:$0xff] %v3285_v3  ;;  %v1708_v3 = vsub.f32 %v3274_v13, %v4038_v9 }
 0x1af   :  { %1790 = vmatpush.xpose.msrb.mxu2 %v3283_v59  ;;  %v4037_v16 = vand.u32 4294901760, %v3283_v59 }
 0x1b0   :  { %v1709_v9 = vand.u32 4294901760, %v1708_v3 }
 0x1b1   :  { %1613 = vmatpush.xpose.msrb.mxu0 %v3265_v42  ;;  %1864 = vmatpush.xpose.msrb.mxu3 %v3265_v42  ;;  %v1702_v20 = vsub.f32 %v3283_v59, %v4037_v16 }
 0x1b2   :  { %v3310_v2 = vpop.f32.mrf.mxu1 }
 0x1b3   :  { %1793 = vmatpush.xpose.msrb.mxu2 %v3274_v13  ;;  %v3308_v11 = vpop.f32.mrf.mxu0  ;;  %v1703_v39 = vand.u32 4294901760, %v1702_v20  ;;  %4096 = vst [vmem:[#allocation27_spill] sm:$0xff] %v3310_v2  ;;  %v3318_v16 = vpop.f32.mrf.mxu2  ;;  %v1386_v20 = vadd.f32 %v3296_v47, %v3061_v23  ;;  %v4040_v2 = vand.u32 4294901760, %v3305_v50 }
 0x1b4   :  { %4095 = vst [vmem:[#allocation26_spill] sm:$0xff] %v3308_v11  ;;  %v1714_v11 = vsub.f32 %v3293_v54, %v4039_v62 }
 0x1b5   :  { %4097 = vst [vmem:[#allocation28_spill] sm:$0xff] %v3318_v16  ;;  %1615 = vmatpush.xpose.msrb.mxu0 %v3276_v53  ;;  %1704 = vmatpush.xpose.msrb.mxu1 %v1703_v39  ;;  %v3321_v29 = vpop.f32.mrf.mxu3  ;;  %v3332_v16 = vsub.f32 %v1570_v5, %v3315_v51  ;;  %v3335_v39 = vand.u32 4294901760, %v3255_v49  ;;  %v3338_v23 = vand.u32 4294901760, %v1386_v20  ;;  %v1720_v3 = vsub.f32 %v3305_v50, %v4040_v2 }
 0x1b6   :  { %4098 = vst [vmem:[#allocation29_spill] sm:$0xff] %v3321_v29  ;;  %1866 = vmatpush.xpose.msrb.mxu3 %v3276_v53  ;;  %v3340_v29 = vpop.permute.xlu0 %1353  ;;  %v1715_v62 = vand.u32 4294901760, %v1714_v11 }
 0x1b7   :  { %1796 = vmatpush.xpose.msrb.mxu2 %v3293_v54  ;;  %4099 = vst [vmem:[#allocation30_spill] sm:$0xff] %v3340_v29  ;;  %v1627_v11 = vsub.f32 %v1386_v20, %v3338_v23  ;;  %v1721_v45 = vand.u32 4294901760, %v1720_v3 }
 0x1b9   :  { %1617 = vmatpush.xpose.msrb.mxu0 %v3288_v26  ;;  %1710 = vmatpush.xpose.msrb.mxu1 %v1709_v9  ;;  %v3353_v9 = vsub.f32 %v3255_v49, %v3335_v39  ;;  %v3369_v49 = vand.u32 4294901760, %v3232_v6 }
 0x1ba   :  { %1868 = vmatpush.xpose.msrb.mxu3 %v3288_v26  ;;  %v3349_v21 = vpop.f32.mrf.mxu1 }
 0x1bb   :  { %1799 = vmatpush.xpose.msrb.mxu2 %v3305_v50  ;;  %v3347_v5 = vpop.f32.mrf.mxu0  ;;  %4101 = vst [vmem:[#allocation32_spill] sm:$0xff] %v3349_v21  ;;  %v3359_v12 = vpop.f32.mrf.mxu2  ;;  %v1388_v21 = vadd.f32 %v3340_v29, %v3070_v34  ;;  %v4042_v20 = vand.u32 4294901760, %v3353_v9  ;;  %v1628_v34 = vand.u32 4294901760, %v1627_v11  ;;  %v3396_v4 = vsub.f32 %v3232_v6, %v3369_v49 }
 0x1bc   :  { %4100 = vst [vmem:[#allocation31_spill] sm:$0xff] %v3347_v5 }
 0x1bd   :  { %4102 = vst [vmem:[#allocation33_spill] sm:$0xff] %v3359_v12  ;;  %1619 = vmatpush.xpose.msrb.mxu0 %v3315_v51  ;;  %1716 = vmatpush.xpose.msrb.mxu1 %v1715_v62  ;;  %v3362_v2 = vpop.f32.mrf.mxu3  ;;  %v4104_v12 = vand.u32 4294901760, %v3332_v16  ;;  %v3377_v62 = vsub.f32 %v3248_v35, %v3356_v40  ;;  %v3383_v29 = vand.u32 4294901760, %v1388_v21  ;;  %v1732_v35 = vsub.f32 %v3353_v9, %v4042_v20 }
 0x1be   :  { %4103 = vst [vmem:[#allocation34_spill] sm:$0xff] %v3362_v2  ;;  %1870 = vmatpush.xpose.msrb.mxu3 %v3315_v51  ;;  %v3380_v2 = vpop.permute.xlu1 %1358 }
 0x1bf   :  { %1802 = vmatpush.xpose.msrb.mxu2 %v3332_v16  ;;  %v1726_v5 = vsub.f32 %v3332_v16, %v4104_v12  ;;  %4105 = vst [vmem:[#allocation35_spill] sm:$0xff] %v3380_v2  ;;  %v1733_v6 = vand.u32 4294901760, %v1732_v35 }
 0x1c1   :  { %1621 = vmatpush.xpose.msrb.mxu0 %v3335_v39  ;;  %1722 = vmatpush.xpose.msrb.mxu1 %v1721_v45  ;;  %v1727_v12 = vand.u32 4294901760, %v1726_v5  ;;  %v4044_v45 = vand.u32 4294901760, %v3377_v62  ;;  %v1629_v5 = vsub.f32 %v1627_v11, %v1628_v34 }
 0x1c2   :  { %1872 = vmatpush.xpose.msrb.mxu3 %v3335_v39  ;;  %v3389_v63 = vpop.f32.mrf.mxu1 }
 0x1c3   :  { %1805 = vmatpush.xpose.msrb.mxu2 %v3353_v9  ;;  %v3387_v3 = vpop.f32.mrf.mxu0  ;;  %4107 = vst [vmem:[#allocation37_spill] sm:$0xff] %v3389_v63  ;;  %v3399_v19 = vpop.f32.mrf.mxu2  ;;  %v1635_v63 = vsub.f32 %v1388_v21, %v3383_v29  ;;  %v1738_v20 = vsub.f32 %v3377_v62, %v4044_v45 }
 0x1c4   :  { %4106 = vst [vmem:[#allocation36_spill] sm:$0xff] %v3387_v3  ;;  %v1390_v3 = vadd.f32 %v3380_v2, %v3079_v28  ;;  %v4110_v28 = vand.u32 4294901760, %v3283_v59 }
 0x1c5   :  { %4108 = vst [vmem:[#allocation38_spill] sm:$0xff] %v3399_v19  ;;  %1623 = vmatpush.xpose.msrb.mxu0 %v3356_v40  ;;  %1728 = vmatpush.xpose.msrb.mxu1 %v1727_v12  ;;  %v3402_v55 = vpop.f32.mrf.mxu3  ;;  %v1630_v12 = vand.u32 4294901760, %v1629_v5  ;;  %v1636_v35 = vand.u32 4294901760, %v1635_v63  ;;  %v1739_v45 = vand.u32 4294901760, %v1738_v20  ;;  %v4112_v20 = vand.u32 4294901760, %v3274_v13 }
 0x1c6   :  { %4109 = vst [vmem:[#allocation39_spill] sm:$0xff] %v3402_v55  ;;  %1874 = vmatpush.xpose.msrb.mxu3 %v3356_v40  ;;  %v3414_v55 = vand.u32 4294901760, %v1390_v3  ;;  %v3416_v21 = vpop.permute.xlu1 %1363 }
 0x1c7   :  { %1808 = vmatpush.xpose.msrb.mxu2 %v3377_v62  ;;  %v1637_v36 = vsub.f32 %v1635_v63, %v1636_v35 }
 0x1c8   :  { %v1643_v59 = vsub.f32 %v1390_v3, %v3414_v55 }
 0x1c9   :  { %1625 = vmatpush.xpose.msrb.mxu0 %v3369_v49  ;;  %1734 = vmatpush.xpose.msrb.mxu1 %v1733_v6  ;;  %v4111_v6 = vand.u32 4294901760, %v3396_v4  ;;  %v1638_v3 = vand.u32 4294901760, %v1637_v36  ;;  %v4114_v36 = vand.u32 4294901760, %v3305_v50 }
 0x1ca   :  { %1876 = vmatpush.xpose.msrb.mxu3 %v3369_v49  ;;  %v3424_v19 = vpop.f32.mrf.mxu1 }
 0x1cb   :  { %1811 = vmatpush.xpose.msrb.mxu2 %v3396_v4  ;;  %v3422_v2 = vpop.f32.mrf.mxu0  ;;  %v1744_v5 = vsub.f32 %v3396_v4, %v4111_v6  ;;  %v3429_v0 = vpop.f32.mrf.mxu2 }
 0x1cc   :  { %1631 = vmatmul.f32.vlgmr.msrb.gmra.mxu0 %v1630_v12 }
 0x1cd   :  { %1937 = vmatpush.xpose.msra.mxu0 %v4110_v28  ;;  %1880 = vmatmul.f32.vlgmr.msrb.gmra.mxu3 %v1628_v34  ;;  %v3431_v47 = vpop.f32.mrf.mxu3  ;;  %v1392_v28 = vadd.f32 %v3416_v21, %v3088_v38  ;;  %v1745_v24 = vand.u32 4294901760, %v1744_v5  ;;  %v4113_v34 = vand.u32 4294901760, %v3293_v54  ;;  %v1394_v54 = vadd.f32 %v3438_v58, %v3097_v37 }
 0x1ce   :  { %1740 = vmatpush.xpose.msrb.mxu1 %v1739_v45  ;;  %1814 = vmatmul.f32.vlgmr.msrb.gmra.mxu2 %v1627_v11  ;;  %v1644_v45 = vand.u32 4294901760, %v1643_v59 }
 0x1cf   :  { %v3440_v12 = vand.u32 4294901760, %v1392_v28  ;;  %v3460_v5 = vand.u32 4294901760, %v1394_v54 }
 0x1d1   :  { %1941 = vmatpush.xpose.msra.mxu0 %v4112_v20  ;;  %v1651_v11 = vsub.f32 %v1392_v28, %v3440_v12  ;;  %v3462_v20 = vpop.permute.xlu2 %1373 }
 0x1d2   :  { %1746 = vmatpush.xpose.msrb.mxu1 %v1745_v24  ;;  %v3447_v38 = vpop.f32.mrf.mxu1  ;;  %4115 = vst [vmem:[#allocation40_spill] sm:$0xff] %v3462_v20 }
 0x1d3   :  { %v3445_v6 = vpop.f32.mrf.mxu0  ;;  %v3450_v13 = vpop.f32.mrf.mxu2 }
 0x1d4   :  { %1639 = vmatmul.f32.gmra.mxu0 %v1638_v3  ;;  %v1652_v3 = vand.u32 4294901760, %v1651_v11 }
 0x1d5   :  { %1945 = vmatpush.xpose.msra.mxu0 %v4113_v34  ;;  %1748 = vmatmul.f32.vlgmr.msrb.gmra.mxu1 %v3338_v23  ;;  %v3452_v24 = vpop.f32.mrf.mxu3 }
 0x1d6   :  { %2008 = vmatpush.xpose.msra.mxu1 %v3269_v8  ;;  %1886 = vmatmul.f32.gmra.mxu3 %v1636_v35  ;;  %v1645_v8 = vsub.f32 %v1643_v59, %v1644_v45  ;;  %v4116_v35 = vand.u32 4294901760, %v3332_v16  ;;  %v1659_v16 = vsub.f32 %v1394_v54, %v3460_v5 }
 0x1d7   :  { %1819 = vmatmul.f32.gmra.mxu2 %v1635_v63 }
 0x1d8   :  { %v1646_v34 = vand.u32 4294901760, %v1645_v8 }
 0x1d9   :  { %1949 = vmatpush.xpose.msra.mxu0 %v4114_v36  ;;  %v1653_v36 = vsub.f32 %v1651_v11, %v1652_v3 }
 0x1da   :  { %2010 = vmatpush.xpose.msra.mxu1 %v3265_v42  ;;  %v3469_v37 = vpop.f32.mrf.mxu1  ;;  %v1396_v42 = vadd.f32 %v3462_v20, %v3106_v10 }
 0x1db   :  { %v3467_v28 = vpop.f32.mrf.mxu0  ;;  %v3472_v63 = vpop.f32.mrf.mxu2  ;;  %v1654_v10 = vand.u32 4294901760, %v1653_v36  ;;  %v4119_v36 = vand.u32 4294901760, %v3396_v4  ;;  %v933_v4 = vadd.f32 %v3142_v48, %v3140_v22 }
 0x1dc   :  { %1647 = vmatmul.f32.gmra.mxu0 %v1646_v34  ;;  %v3482_v8 = vand.u32 4294901760, %v1396_v42  ;;  %v4118_v34 = vand.u32 4294901760, %v3377_v62 }
 0x1dd   :  { %1953 = vmatpush.xpose.msra.mxu0 %v4116_v35  ;;  %1752 = vmatmul.f32.gmra.mxu1 %v3383_v29  ;;  %v3476_v50 = vpop.f32.mrf.mxu3  ;;  %v3484_v35 = vpop.permute.xlu0 %1378 }
 0x1de   :  { %2012 = vmatpush.xpose.msra.mxu1 %v3276_v53  ;;  %1892 = vmatmul.f32.gmra.mxu3 %v1644_v45  ;;  %v4117_v53 = vand.u32 4294901760, %v3353_v9  ;;  %v1660_v45 = vand.u32 4294901760, %v1659_v16  ;;  %v929_v9 = vadd.f32 %v3134_v52, %v3132_v61  ;;  %v1667_v54 = vsub.f32 %v1396_v42, %v3482_v8 }
 0x1df   :  { %1824 = vmatmul.f32.gmra.mxu2 %v1643_v59  ;;  %v1398_v62 = vadd.f32 %v3484_v35, %v3115_v1  ;;  %v945_v1 = vadd.f32 %v3170_v33, %v3168_v17 }
 0x1e0   :  { %v1661_v61 = vsub.f32 %v1659_v16, %v1660_v45 }
 0x1e1   :  { %1957 = vmatpush.xpose.msra.mxu0 %v4117_v53  ;;  %v3507_v52 = vand.u32 4294901760, %v1398_v62 }
 0x1e2   :  { %2014 = vmatpush.xpose.msra.mxu1 %v3288_v26  ;;  %v3491_v59 = vpop.f32.mrf.mxu1  ;;  %v1662_v42 = vand.u32 4294901760, %v1661_v61 }
 0x1e3   :  { %v3489_v20 = vpop.f32.mrf.mxu0  ;;  %v3496_v26 = vpop.f32.mrf.mxu2 }
 0x1e4   :  { %1655 = vmatmul.f32.gmra.mxu0 %v1654_v10  ;;  %v3509_v10 = vpop.permute.xlu1 %1383 }
 0x1e5   :  { %1961 = vmatpush.xpose.msra.mxu0 %v4118_v34  ;;  %1756 = vmatmul.f32.gmra.mxu1 %v3414_v55  ;;  %v3501_v53 = vpop.f32.mrf.mxu3  ;;  %v1668_v34 = vand.u32 4294901760, %v1667_v54  ;;  %v1400_v17 = vadd.f32 %v3509_v10, %v3124_v18 }
 0x1e6   :  { %2016 = vmatpush.xpose.msra.mxu1 %v3315_v51  ;;  %1898 = vmatmul.f32.gmra.mxu3 %v1652_v3  ;;  %v1021_v51 = vadd.f32 %v3422_v2, %v929_v9 }
 0x1e7   :  { %1829 = vmatmul.f32.gmra.mxu2 %v1651_v11  ;;  %v1669_v33 = vsub.f32 %v1667_v54, %v1668_v34  ;;  %v3524_v48 = vand.u32 4294901760, %v1400_v17 }
 0x1e8   :  { %v1128_v3 = vadd.f32 %v3424_v19, %v1021_v51  ;;  %v1026_v51 = vadd.f32 %v3445_v6, %v933_v4 }
 0x1e9   :  { %1965 = vmatpush.xpose.msra.mxu0 %v4119_v36  ;;  %v1675_v36 = vsub.f32 %v1398_v62, %v3507_v52  ;;  %v949_v62 = vadd.f32 %v3180_v60, %v3178_v57  ;;  %v1683_v4 = vsub.f32 %v1400_v17, %v3524_v48 }
 0x1ea   :  { %2018 = vmatpush.xpose.msra.mxu1 %v3335_v39  ;;  %v1151_v11 = vpop.f32.mrf.mxu1 }
 0x1eb   :  { %v1040_v2 = vpop.f32.mrf.mxu0  ;;  %v1241_v39 = vpop.f32.mrf.mxu2 }
 0x1ec   :  { %v1041_v9 = vadd.f32 %v1040_v2, %v945_v1  ;;  %1663 = vmatmul.f32.gmra.mxu0 %v1662_v42  ;;  %v1670_v1 = vand.u32 4294901760, %v1669_v33  ;;  %v1676_v42 = vand.u32 4294901760, %v1675_v36  ;;  %v1684_v33 = vand.u32 4294901760, %v1683_v4 }
 0x1ed   :  { %1760 = vmatmul.f32.gmra.mxu1 %v3440_v12  ;;  %v1323_v19 = vpop.f32.mrf.mxu3 }
 0x1ee   :  { %2020 = vmatpush.xpose.msra.mxu1 %v3356_v40  ;;  %1904 = vmatmul.f32.gmra.mxu3 %v1660_v45  ;;  %v1226_v40 = vadd.f32 %v3429_v0, %v1128_v3  ;;  %v1152_v61 = vadd.f32 %v1151_v11, %v1041_v9  ;;  %v1134_v45 = vadd.f32 %v3447_v38, %v1026_v51 }
 0x1ef   :  { %1834 = vmatmul.f32.gmra.mxu2 %v1659_v16  ;;  %v937_v0 = vadd.f32 %v3150_v25, %v3148_v14  ;;  %v1677_v9 = vsub.f32 %v1675_v36, %v1676_v42 }
 0x1f0   :  { %v1242_v22 = vadd.f32 %v1241_v39, %v1152_v61  ;;  %v1308_v18 = vadd.f32 %v3431_v47, %v1226_v40  ;;  %v1230_v47 = vadd.f32 %v3450_v13, %v1134_v45  ;;  %v953_v40 = vadd.f32 %v3194_v15, %v3190_v46 }
 0x1f1   :  { %v1031_v57 = vadd.f32 %v3467_v28, %v937_v0  ;;  %v1678_v28 = vand.u32 4294901760, %v1677_v9  ;;  %v941_v13 = vadd.f32 %v3160_v27, %v3158_v31  ;;  %v1685_v15 = vsub.f32 %v1683_v4, %v1684_v33 }
 0x1f2   :  { %2022 = vmatpush.xpose.msra.mxu1 %v3369_v49  ;;  %v1324_v2 = vadd.f32 %v1323_v19, %v1242_v22  ;;  %v1157_v16 = vpop.f32.mrf.mxu1  ;;  %v1312_v17 = vadd.f32 %v3452_v24, %v1230_v47 }
 0x1f3   :  { %v1045_v6 = vpop.f32.mrf.mxu0  ;;  %v1245_v11 = vpop.f32.mrf.mxu2  ;;  %v1140_v39 = vadd.f32 %v3469_v37, %v1031_v57  ;;  %v1036_v24 = vadd.f32 %v3489_v20, %v941_v13 }
 0x1f4   :  { %v1403_v3 = vmax.f32 %v1308_v18, %v1324_v2  ;;  %v1046_v49 = vadd.f32 %v1045_v6, %v949_v62  ;;  %1671 = vmatmul.f32.gmra.mxu0 %v1670_v1 }
 0x1f5   :  { %1764 = vmatmul.f32.gmra.mxu1 %v3460_v5  ;;  %v1327_v60 = vpop.f32.mrf.mxu3  ;;  %v1234_v62 = vadd.f32 %v3472_v63, %v1140_v39 }
 0x1f6   :  { %1910 = vmatmul.f32.gmra.mxu3 %v1668_v34  ;;  %v1158_v38 = vadd.f32 %v1157_v16, %v1046_v49  ;;  %v1411_v14 = vsub.f32 %v1308_v18, %v1403_v3  ;;  %v1419_v19 = vsub.f32 %v1324_v2, %v1403_v3  ;;  %v957_v16 = vadd.f32 %v3210_v7, %v3206_v30 }
 0x1f7   :  { %1839 = vmatmul.f32.gmra.mxu2 %v1667_v54  ;;  %v1686_v3 = vand.u32 4294901760, %v1685_v15  ;;  %v1316_v63 = vadd.f32 %v3476_v50, %v1234_v62 }
 0x1f8   :  { %v1246_v25 = vadd.f32 %v1245_v11, %v1158_v38  ;;  %v1428_v54 = vmul.f32 1.442695, %v1411_v14  ;;  %v1444_v18 = vmul.f32 1.442695, %v1419_v19 }
 0x1fa   :  { %v1328_v51 = vadd.f32 %v1327_v60, %v1246_v25  ;;  %v1163_v61 = vpop.f32.mrf.mxu1  ;;  %2566 = vpow2.f32 %v1428_v54 }
 0x1fb   :  { %v1050_v34 = vpop.f32.mrf.mxu0  ;;  %v1249_v37 = vpop.f32.mrf.mxu2  ;;  %2568 = vpow2.f32 %v1444_v18 }
 0x1fc   :  { %v1405_v22 = vmax.f32 %v1312_v17, %v1328_v51  ;;  %v1051_v1 = vadd.f32 %v1050_v34, %v953_v40  ;;  %1679 = vmatmul.f32.gmra.mxu0 %v1678_v28 }
 0x1fd   :  { %1768 = vmatmul.f32.gmra.mxu1 %v3482_v8  ;;  %v1331_v46 = vpop.f32.mrf.mxu3 }
 0x1fe   :  { %1916 = vmatmul.f32.gmra.mxu3 %v1676_v42  ;;  %v1413_v45 = vsub.f32 %v1312_v17, %v1405_v22  ;;  %v1421_v2 = vsub.f32 %v1328_v51, %v1405_v22  ;;  %v1164_v0 = vadd.f32 %v1163_v61, %v1051_v1  ;;  %v1146_v42 = vadd.f32 %v3491_v59, %v1036_v24 }
 0x1ff   :  { %1844 = vmatmul.f32.gmra.mxu2 %v1675_v36 }
 0x200   :  { %v1432_v31 = vmul.f32 1.442695, %v1413_v45  ;;  %v1448_v27 = vmul.f32 1.442695, %v1421_v2  ;;  %v1250_v6 = vadd.f32 %v1249_v37, %v1164_v0  ;;  %v3550_v47 = vpop.eup %2566  ;;  %v1238_v30 = vadd.f32 %v3496_v26, %v1146_v42 }
 0x201   :  { %v3553_v59 = vpop.eup %2568 }
 0x202   :  { %2570 = vpow2.f32 %v1432_v31  ;;  %v1332_v49 = vadd.f32 %v1331_v46, %v1250_v6  ;;  %v1169_v11 = vpop.f32.mrf.mxu1 }
 0x203   :  { %2572 = vpow2.f32 %v1448_v27  ;;  %v1055_v20 = vpop.f32.mrf.mxu0  ;;  %v1253_v60 = vpop.f32.mrf.mxu2 }
 0x204   :  { %v1407_v57 = vmax.f32 %v1316_v63, %v1332_v49  ;;  %v1056_v36 = vadd.f32 %v1055_v20, %v957_v16  ;;  %1687 = vmatmul.f32.gmra.mxu0 %v1686_v3 }
 0x205   :  { %1772 = vmatmul.f32.gmra.mxu1 %v3507_v52  ;;  %v1335_v9 = vpop.f32.mrf.mxu3 }
 0x206   :  { %1922 = vmatmul.f32.gmra.mxu3 %v1684_v33  ;;  %v1415_v7 = vsub.f32 %v1316_v63, %v1407_v57  ;;  %v1423_v50 = vsub.f32 %v1332_v49, %v1407_v57  ;;  %v1170_v38 = vadd.f32 %v1169_v11, %v1056_v36  ;;  %v1320_v33 = vadd.f32 %v3501_v53, %v1238_v30  ;;  %v4128_v30 = vld [vmem:[#allocation7_spill] sm:$0xff] }
 0x207   :  { %1849 = vmatmul.f32.gmra.mxu2 %v1683_v4  ;;  %v3566_v4 = vadd.f32 %v3553_v59, %v3550_v47 }
 0x208   :  { %v3555_v14 = vpop.eup %2570  ;;  %v1436_v25 = vmul.f32 1.442695, %v1415_v7  ;;  %v1452_v39 = vmul.f32 1.442695, %v1423_v50  ;;  %v1254_v19 = vadd.f32 %v1253_v60, %v1170_v38 }
 0x209   :  { %v3557_v40 = vpop.eup %2572  ;;  %vm1486_vm9 = vweird.f32 %v3566_v4 }
 0x20a   :  { %v3562_v17 = vadd.f32 %v3557_v40, %v3555_v14  ;;  %2574 = vpow2.f32 %v1436_v25  ;;  %v1336_v26 = vadd.f32 %v1335_v9, %v1254_v19 }
 0x20b   :  { %2576 = vpow2.f32 %v1452_v39  ;;  %v1492_v39 = vand.u32 2147483648, %v3566_v4 }
 0x20c   :  { %2578 = vrcp.f32 %v3562_v17  ;;  %v1409_v51 = vmax.f32 %v1320_v33, %v1336_v26  ;;  %1967 = vmatmul.f32.vlgmr.msra.gmra.mxu0 %v3338_v23  ;;  %v1522_v20 = vand.u32 2147483648, %v3562_v17  ;;  %vm1516_vm5 = vweird.f32 %v3562_v17 }
 0x20d   :  { %1776 = vmatmul.f32.gmra.mxu1 %v3524_v48  ;;  %2580 = vrcp.f32 %v3566_v4 }
 0x20e   :  { %v1417_v28 = vsub.f32 %v1320_v33, %v1409_v51  ;;  %v1425_v53 = vsub.f32 %v1336_v26, %v1409_v51  ;;  %v1523_v25 = vor.u32 1.1754944e-38, %v1522_v20 }
 0x210   :  { %v3572_v34 = vpop.eup %2574  ;;  %v1440_v61 = vmul.f32 1.442695, %v1417_v28  ;;  %v1456_v13 = vmul.f32 1.442695, %v1425_v53  ;;  %v981_v53 = vadd.f32 %v3217_v41, %v3064_v32 }
 0x211   :  { %v2577_v54 = vpop.eup %2576 }
 0x212   :  { %v2579_v22 = vpop.eup %2578  ;;  %v1463_v1 = vadd.f32 %v2577_v54, %v3572_v34  ;;  %2582 = vpow2.f32 %v1440_v61  ;;  %v1080_v32 = vadd.f32 %v3219_v43, %v981_v53  ;;  %v4122_v43 = vld [vmem:[#allocation3_spill] sm:$0xff] }
 0x213   :  { %2584 = vpow2.f32 %v1456_v13  ;;  %v1512_v37 = vmul.f32 %v2579_v22, %v3562_v17  ;;  %v3578_v62 = vpop.eup %2580  ;;  %vm1517_vm2 = vweird.f32 %v2579_v22  ;;  %v1493_v13 = vor.u32 1.1754944e-38, %v1492_v39 }
 0x214   :  { %2586 = vrcp.f32 %v1463_v1  ;;  %1971 = vmatmul.f32.gmra.mxu0 %v3383_v29  ;;  %v1482_v15 = vmul.f32 %v3578_v62, %v3566_v4  ;;  %v1552_v6 = vand.u32 2147483648, %v1463_v1  ;;  %v1550_v3 = vand.u32 2147483647, %v1463_v1  ;;  %vm3594_vm7 = vmor %vm1516_vm5, %vm1517_vm2 }
 0x215   :  { %2024 = vmatmul.f32.vlgmr.msra.gmra.mxu1 %v3338_v23  ;;  %v1513_v46 = vsub.f32 1.0, %v1512_v37  ;;  %vm1546_vm3 = vweird.f32 %v1463_v1  ;;  %vm1487_vm8 = vweird.f32 %v3578_v62 }
 0x216   :  { %v1483_v31 = vsub.f32 1.0, %v1482_v15  ;;  %v1553_v57 = vor.u32 1.1754944e-38, %v1552_v6  ;;  %vm1551_vm6 = vcmp.eq.f32.partialorder %v1550_v3, 8.507059e+37  ;;  %vm1488_vm12 = vmor %vm1486_vm9, %vm1487_vm8 }
 0x217   :  { %v1514_v23 = vmul.f32 %v2579_v22, %v1513_v46 }
 0x218   :  { %v3580_v18 = vpop.eup %2582  ;;  %v1484_v42 = vmul.f32 %v3578_v62, %v1483_v31 }
 0x219   :  { %v3584_v24 = vpop.eup %2584  ;;  %v1515_v63 = vadd.f32 %v2579_v22, %v1514_v23 }
 0x21a   :  { %v2587_v45 = vpop.eup %2586  ;;  %v1465_v2 = vadd.f32 %v3584_v24, %v3580_v18  ;;  %v1485_v38 = vadd.f32 %v3578_v62, %v1484_v42 }
 0x21b   :  { %v1542_v0 = vmul.f32 %v2587_v45, %v1463_v1  ;;  %vm1547_vm1 = vweird.f32 %v2587_v45  ;;  %v1519_v50 = vsel %vm3594_vm7, %v2579_v22, %v1515_v63 }
 0x21c   :  { %2588 = vrcp.f32 %v1465_v2  ;;  %1975 = vmatmul.f32.gmra.mxu0 %v3414_v55  ;;  %vm1548_vm4 = vmor %vm1546_vm3, %vm1547_vm1  ;;  %v1580_v19 = vand.u32 2147483647, %v1465_v2  ;;  %v1582_v33 = vand.u32 2147483648, %v1465_v2  ;;  %v1489_v28 = vsel %vm1488_vm12, %v3578_v62, %v1485_v38 }
 0x21d   :  { %2028 = vmatmul.f32.gmra.mxu1 %v3383_v29  ;;  %v1543_v27 = vsub.f32 1.0, %v1542_v0  ;;  %v1520_v29 = vand.u32 2147483647, %v3562_v17  ;;  %vm1576_vm13 = vweird.f32 %v1465_v2  ;;  %vm40_vm1 = vcmask 523264  }
 0x21e   :  { %v1583_v22 = vor.u32 1.1754944e-38, %v1582_v33  ;;  %vm1581_vm0 = vcmp.eq.f32.partialorder %v1580_v19, 8.507059e+37 }
 0x21f   :  { %v1544_v16 = vmul.f32 %v2587_v45, %v1543_v27  ;;  %vm1521_vm10 = vcmp.eq.f32.partialorder %v1520_v29, 8.507059e+37  ;;  %v4123_v27 = vld [vmem:[#allocation2_spill] sm:$0xff]  ;;  %v4126_v29 = vld [vmem:[#allocation5_spill] sm:$0xff] }
 0x220   :  { %v1524_v51 = vsel %vm1521_vm10, %v1523_v25, %v1519_v50 }
 0x221   :  { %v1545_v49 = vadd.f32 %v2587_v45, %v1544_v16  ;;  %v1589_v1 = vmul.f32 %v3557_v40, %v1524_v51  ;;  %v4124_v16 = vld [vmem:[#allocation4_spill] sm:$0xff] }
 0x222   :  { %v2589_v11 = vpop.eup %2588 }
 0x223   :  { %v1572_v36 = vmul.f32 %v2589_v11, %v1465_v2  ;;  %v1549_v60 = vsel %vm1548_vm4, %v2587_v45, %v1545_v49  ;;  %vm1577_vm11 = vweird.f32 %v2589_v11  ;;  %v3620_v46 = vand.u32 4294901760, %v1589_v1 }
 0x224   :  { %1979 = vmatmul.f32.gmra.mxu0 %v3440_v12  ;;  %v3600_v7 = vsel %vm1551_vm6, %v1553_v57, %v1549_v60  ;;  %vm1578_vm14 = vmor %vm1576_vm13, %vm1577_vm11  ;;  %v1194_v2 = vadd.f32 %v3223_v56, %v1080_v32  ;;  %v4127_v60 = vld [vmem:[#allocation14_spill] sm:$0xff] }
 0x225   :  { %2032 = vmatmul.f32.gmra.mxu1 %v3414_v55  ;;  %v1573_v9 = vsub.f32 1.0, %v1572_v36  ;;  %v1490_v55 = vand.u32 2147483647, %v3566_v4  ;;  %v1591_v26 = vmul.f32 %v2577_v54, %v3600_v7  ;;  %v3637_v0 = vsub.f32 %v1589_v1, %v3620_v46 }
 0x226   :  { %v1276_v6 = vadd.f32 %v4123_v27, %v1194_v2  ;;  %v1555_v20 = vmul.f32 %v3572_v34, %v3600_v7  ;;  %v991_v50 = vadd.f32 %v4128_v30, %v4127_v60 }
 0x227   :  { %v1574_v17 = vmul.f32 %v2589_v11, %v1573_v9  ;;  %vm1491_vm15 = vcmp.eq.f32.partialorder %v1490_v55, 8.507059e+37  ;;  %v3614_v37 = vand.u32 4294901760, %v1591_v26  ;;  %v1525_v9 = vmul.f32 %v3555_v14, %v1524_v51  ;;  %v4129_v14 = vld [vmem:[#allocation6_spill] sm:$0xff]  ;;  %v4130_v55 = vld [vmem:[#allocation8_spill] sm:$0xff] }
 0x228   :  { %v1494_v54 = vsel %vm1491_vm15, %v1493_v13, %v1489_v28  ;;  %v3681_v39 = vand.u32 4294901760, %v1555_v20  ;;  %v4131_v13 = vld [vmem:[#allocation15_spill] sm:$0xff] }
 0x229   :  { %v1575_v61 = vadd.f32 %v2589_v11, %v1574_v17  ;;  %v1587_v15 = vmul.f32 %v3553_v59, %v1494_v54  ;;  %v3626_v45 = vsub.f32 %v1591_v26, %v3614_v37  ;;  %v1092_v17 = vadd.f32 %v4130_v55, %v991_v50 }
 0x22a   :  { %v1495_v51 = vmul.f32 %v3550_v47, %v1494_v54  ;;  %v3697_v28 = vsub.f32 %v1555_v20, %v3681_v39  ;;  %v3699_v53 = vand.u32 4294901760, %v1525_v9  ;;  %v4133_v47 = vld [vmem:[#allocation30_spill] sm:$0xff] }
 0x22b   :  { %v1579_v4 = vsel %vm1578_vm14, %v2589_v11, %v1575_v61  ;;  %v3639_v59 = vand.u32 4294901760, %v1587_v15  ;;  %v2161_v56 = vand.u32 4294901760, %v3626_v45  ;;  %v4125_v11 = vld [vmem:[#allocation25_spill] sm:$0xff] }
 0x22c   :  { %1983 = vmatmul.f32.gmra.mxu0 %v3460_v5  ;;  %v1584_v62 = vsel %vm1581_vm0, %v1583_v22, %v1579_v4  ;;  %v1387_v57 = vadd.f32 %v4125_v11, %v1276_v6  ;;  %v4132_v22 = vld [vmem:[#allocation11_spill] sm:$0xff]  ;;  %v4137_v11 = vld [vmem:[#allocation13_spill] sm:$0xff] }
 0x22d   :  { %2036 = vmatmul.f32.gmra.mxu1 %v3440_v12  ;;  %v1593_v41 = vmul.f32 %v3584_v24, %v1584_v62  ;;  %v986_v24 = vadd.f32 %v4122_v43, %v3073_v44  ;;  %v1585_v31 = vmul.f32 %v3580_v18, %v1584_v62  ;;  %v3655_v63 = vsub.f32 %v1587_v15, %v3639_v59  ;;  %v4134_v62 = vld [vmem:[#allocation9_spill] sm:$0xff] }
 0x22e   :  { %v2167_v18 = vand.u32 4294901760, %v3637_v0  ;;  %v2162_v42 = vsub.f32 %v3626_v45, %v2161_v56  ;;  %v3685_v19 = vand.u32 4294901760, %v1387_v57  ;;  %v996_v1 = vadd.f32 %v4132_v22, %v4131_v13 }
 0x22f   :  { %v3623_v40 = vand.u32 4294901760, %v1593_v41  ;;  %v1086_v3 = vadd.f32 %v4124_v16, %v986_v24  ;;  %v3662_v49 = vand.u32 4294901760, %v1585_v31  ;;  %v2173_v38 = vand.u32 4294901760, %v3655_v63  ;;  %v4136_v16 = vld [vmem:[#allocation10_spill] sm:$0xff] }
 0x230   :  { %v2163_v25 = vand.u32 4294901760, %v2162_v42  ;;  %v2168_v34 = vsub.f32 %v3637_v0, %v2167_v18  ;;  %v3706_v4 = vsub.f32 %v1387_v57, %v3685_v19  ;;  %v1202_v32 = vadd.f32 %v4134_v62, %v1092_v17  ;;  %v4141_v17 = vld [vmem:[#allocation20_spill] sm:$0xff] }
 0x231   :  { %2065 = vmatpush.xpose.msra.mxu2 %v3623_v40  ;;  %2316 = vmatpush.xpose.msrb.mxu1 %v3623_v40  ;;  %v3632_v12 = vsub.f32 %v1593_v41, %v3623_v40  ;;  %v1198_v36 = vadd.f32 %v4126_v29, %v1086_v3  ;;  %v3679_v7 = vsub.f32 %v1585_v31, %v3662_v49  ;;  %v3711_v41 = vand.u32 4294901760, %v1495_v51  ;;  %v4135_v31 = vld [vmem:[#allocation12_spill] sm:$0xff] }
 0x232   :  { %v2174_v26 = vsub.f32 %v3655_v63, %v2173_v38  ;;  %v3718_v43 = vsub.f32 %v1525_v9, %v3699_v53  ;;  %v2185_v24 = vand.u32 4294901760, %v3697_v28  ;;  %v1098_v27 = vadd.f32 %v4135_v31, %v996_v1  ;;  %v4138_v29 = vld [vmem:[#allocation16_spill] sm:$0xff]  ;;  %v4145_v31 = vld [vmem:[#allocation26_spill] sm:$0xff] }
 0x233   :  { %2244 = vmatpush.xpose.msrb.mxu0 %v3632_v12  ;;  %v2155_v23 = vand.u32 4294901760, %v3632_v12  ;;  %v1280_v33 = vadd.f32 %v4129_v14, %v1198_v36  ;;  %v2179_v61 = vand.u32 4294901760, %v3679_v7  ;;  %v2082_v6 = vand.u32 4294901760, %v3706_v4  ;;  %v4139_v36 = vld [vmem:[#allocation21_spill] sm:$0xff] }
 0x234   :  { %1987 = vmatmul.f32.gmra.mxu0 %v3482_v8  ;;  %v2175_v15 = vand.u32 4294901760, %v2174_v26  ;;  %v1284_v3 = vadd.f32 %v4136_v16, %v1202_v32  ;;  %v3735_v42 = vsub.f32 %v1495_v51, %v3711_v41  ;;  %v2191_v20 = vand.u32 4294901760, %v3718_v43  ;;  %v4142_v51 = vld [vmem:[#allocation22_spill] sm:$0xff]  ;;  %v4143_v32 = vld [vmem:[#allocation23_spill] sm:$0xff] }
 0x235   :  { %2040 = vmatmul.f32.gmra.mxu1 %v3460_v5  ;;  %2067 = vmatpush.xpose.msra.mxu2 %v3614_v37  ;;  %v2156_v44 = vsub.f32 %v3632_v12, %v2155_v23  ;;  %v1389_v54 = vadd.f32 %v4133_v47, %v1280_v33  ;;  %v2180_v2 = vsub.f32 %v3679_v7, %v2179_v61 }
 0x236   :  { %2318 = vmatpush.xpose.msrb.mxu1 %v3614_v37  ;;  %v1206_v57 = vadd.f32 %v4137_v11, %v1098_v27  ;;  %v1001_v60 = vadd.f32 %v4139_v36, %v4138_v29  ;;  %v2083_v50 = vsub.f32 %v3706_v4, %v2082_v6  ;;  %v2192_v33 = vsub.f32 %v3718_v43, %v2191_v20  ;;  %v4146_v29 = vld [vmem:[#allocation24_spill] sm:$0xff] }
 0x237   :  { %2247 = vmatpush.xpose.msrb.mxu0 %v3626_v45  ;;  %v2157_v5 = vand.u32 4294901760, %v2156_v44  ;;  %v3726_v44 = vand.u32 4294901760, %v1389_v54  ;;  %v2197_v55 = vand.u32 4294901760, %v3735_v42 }
 0x238   :  { %v1288_v26 = vadd.f32 %v4141_v17, %v1206_v57  ;;  %v2084_v13 = vand.u32 4294901760, %v2083_v50  ;;  %v2193_v47 = vand.u32 4294901760, %v2192_v33 }
 0x239   :  { %2069 = vmatpush.xpose.msra.mxu2 %v3620_v46  ;;  %2158 = vmatpush.xpose.msra.mxu3 %v2157_v5  ;;  %v2181_v5 = vand.u32 4294901760, %v2180_v2  ;;  %v2089_v9 = vsub.f32 %v1389_v54, %v3726_v44  ;;  %v4144_v2 = vld [vmem:[#allocation17_spill] sm:$0xff] }
 0x23a   :  { %2320 = vmatpush.xpose.msrb.mxu1 %v3620_v46  ;;  %v1393_v62 = vadd.f32 %v3416_v21, %v1288_v26  ;;  %v1006_v27 = vadd.f32 %v4145_v31, %v4144_v2 }
 0x23b   :  { %2250 = vmatpush.xpose.msrb.mxu0 %v3637_v0  ;;  %v2090_v1 = vand.u32 4294901760, %v2089_v9  ;;  %v4149_v0 = vld [vmem:[#allocation18_spill] sm:$0xff] }
 0x23c   :  { %1991 = vmatmul.f32.gmra.mxu0 %v3507_v52  ;;  %v3772_v57 = vand.u32 4294901760, %v1393_v62 }
 0x23d   :  { %2044 = vmatmul.f32.gmra.mxu1 %v3482_v8  ;;  %2071 = vmatpush.xpose.msra.mxu2 %v3639_v59  ;;  %v2169_v8 = vand.u32 4294901760, %v2168_v34 }
 0x23e   :  { %2164 = vmatpush.xpose.msra.mxu3 %v2163_v25  ;;  %2322 = vmatpush.xpose.msrb.mxu1 %v3639_v59  ;;  %v4140_v25 = vld [vmem:[#allocation35_spill] sm:$0xff] }
 0x23f   :  { %2253 = vmatpush.xpose.msrb.mxu0 %v3655_v63  ;;  %v1391_v34 = vadd.f32 %v4140_v25, %v1284_v3 }
 0x241   :  { %2073 = vmatpush.xpose.msra.mxu2 %v3662_v49  ;;  %v3755_v22 = vand.u32 4294901760, %v1391_v34 }
 0x242   :  { %2170 = vmatpush.xpose.msra.mxu3 %v2169_v8  ;;  %2324 = vmatpush.xpose.msrb.mxu1 %v3662_v49  ;;  %v1104_v8 = vadd.f32 %v4142_v51, %v1001_v60  ;;  %v4147_v60 = vld [vmem:[#allocation27_spill] sm:$0xff] }
 0x243   :  { %2256 = vmatpush.xpose.msrb.mxu0 %v3679_v7  ;;  %v1110_v50 = vadd.f32 %v4147_v60, %v1006_v27  ;;  %v4155_v7 = vld [vmem:[#allocation19_spill] sm:$0xff]  ;;  %v4158_v60 = vld [vmem:[#allocation37_spill] sm:$0xff] }
 0x244   :  { %1995 = vmatmul.f32.gmra.mxu0 %v3524_v48 }
 0x245   :  { %2048 = vmatmul.f32.gmra.mxu1 %v3507_v52  ;;  %2075 = vmatpush.xpose.msra.mxu2 %v3681_v39  ;;  %v2186_v52 = vsub.f32 %v3697_v28, %v2185_v24 }
 0x246   :  { %2176 = vmatpush.xpose.msra.mxu3 %v2175_v15  ;;  %2326 = vmatpush.xpose.msrb.mxu1 %v3681_v39  ;;  %v1210_v15 = vadd.f32 %v4143_v32, %v1104_v8 }
 0x247   :  { %2259 = vmatpush.xpose.msrb.mxu0 %v3697_v28  ;;  %v2187_v14 = vand.u32 4294901760, %v2186_v52  ;;  %v2091_v52 = vsub.f32 %v2089_v9, %v2090_v1 }
 0x248   :  { %v1292_v36 = vadd.f32 %v4146_v29, %v1210_v15  ;;  %v4157_v29 = vld [vmem:[#allocation34_spill] sm:$0xff] }
 0x249   :  { %v1632_v30 = vpop.f32.mrf.mxu0  ;;  %2077 = vmatpush.xpose.msra.mxu2 %v3699_v53 }
 0x24a   :  { %2182 = vmatpush.xpose.msra.mxu3 %v2181_v5  ;;  %2328 = vmatpush.xpose.msrb.mxu1 %v3699_v53  ;;  %v1395_v25 = vadd.f32 %v3438_v58, %v1292_v36  ;;  %v4151_v58 = vld [vmem:[#allocation29_spill] sm:$0xff] }
 0x24b   :  { %2262 = vmatpush.xpose.msrb.mxu0 %v3718_v43 }
 0x24d   :  { %2052 = vmatmul.f32.gmra.mxu1 %v3524_v48  ;;  %2079 = vmatpush.xpose.msra.mxu2 %v3711_v41  ;;  %v2198_v48 = vsub.f32 %v3735_v42, %v2197_v55 }
 0x24e   :  { %2188 = vmatpush.xpose.msra.mxu3 %v2187_v14  ;;  %2330 = vmatpush.xpose.msrb.mxu1 %v3711_v41 }
 0x24f   :  { %2265 = vmatpush.xpose.msrb.mxu0 %v3735_v42  ;;  %v2199_v11 = vand.u32 4294901760, %v2198_v48 }
 0x250   :  { %v1881_v54 = vpop.f32.mrf.mxu3  ;;  %2085 = vmatmul.f32.vlgmr.msra.gmra.mxu2 %v2084_v13 }
 0x251   :  { %2391 = vmatpush.xpose.msrb.mxu2 %v2155_v23  ;;  %v1640_v16 = vpop.f32.mrf.mxu0  ;;  %v2097_v23 = vsub.f32 %v1391_v34, %v3755_v22  ;;  %v1815_v5 = vpop.f32.mrf.mxu2  ;;  %v4148_v34 = vld [vmem:[#allocation28_spill] sm:$0xff] }
 0x252   :  { %v1749_v12 = vpop.f32.mrf.mxu1  ;;  %2194 = vmatpush.xpose.msra.mxu3 %v2193_v47  ;;  %2268 = vmatmul.f32.vlgmr.msrb.gmra.mxu0 %v3706_v4  ;;  %v2092_v4 = vand.u32 4294901760, %v2091_v52  ;;  %v1214_v14 = vadd.f32 %v4148_v34, %v1110_v50  ;;  %v3790_v47 = vand.u32 4294901760, %v1395_v25 }
 0x253   :  { %v1750_v3 = vadd.f32 %v1749_v12, %v1632_v30  ;;  %v2098_v30 = vand.u32 4294901760, %v2097_v23 }
 0x254   :  { %v1296_v48 = vadd.f32 %v4151_v58, %v1214_v14 }
 0x255   :  { %2395 = vmatpush.xpose.msrb.mxu2 %v2161_v56  ;;  %v1816_v21 = vadd.f32 %v1815_v5, %v1750_v3  ;;  %2334 = vmatmul.f32.vlgmr.msrb.gmra.mxu1 %v2082_v6  ;;  %v2105_v6 = vsub.f32 %v1393_v62, %v3772_v57  ;;  %v2099_v8 = vsub.f32 %v2097_v23, %v2098_v30  ;;  %v4152_v62 = vld [vmem:[#allocation32_spill] sm:$0xff] }
 0x256   :  { %2200 = vmatpush.xpose.msra.mxu3 %v2199_v11 }
 0x257   :  { %v3779_v45 = vadd.f32 %v1881_v54, %v1816_v21  ;;  %v2106_v54 = vand.u32 4294901760, %v2105_v6  ;;  %v2100_v15 = vand.u32 4294901760, %v2099_v8 }
 0x258   :  { %2093 = vmatmul.f32.gmra.mxu2 %v2092_v4 }
 0x259   :  { %2399 = vmatpush.xpose.msrb.mxu2 %v2167_v18  ;;  %v1887_v56 = vpop.f32.mrf.mxu3  ;;  %2202 = vmatmul.f32.vlgmr.msra.gmra.mxu3 %v3685_v19  ;;  %v1648_v33 = vpop.f32.mrf.mxu0  ;;  %v4150_v18 = vld [vmem:[#allocation31_spill] sm:$0xff]  ;;  %v2107_v27 = vsub.f32 %v2105_v6, %v2106_v54 }
 0x25a   :  { %2462 = vmatpush.xpose.msrb.mxu3 %v3623_v40  ;;  %v1753_v17 = vpop.f32.mrf.mxu1  ;;  %v1011_v26 = vadd.f32 %v4150_v18, %v4149_v0  ;;  %v1820_v51 = vpop.f32.mrf.mxu2  ;;  %2273 = vmatmul.f32.gmra.mxu0 %v2089_v9  ;;  %v4160_v0 = vld [vmem:[#allocation39_spill] sm:$0xff] }
 0x25b   :  { %v1754_v40 = vadd.f32 %v1753_v17, %v1640_v16  ;;  %v4154_v16 = vld [vmem:[#allocation33_spill] sm:$0xff]  ;;  %v2108_v4 = vand.u32 4294901760, %v2107_v27 }
 0x25c   :  { %v1116_v32 = vadd.f32 %v4152_v62, %v1011_v26 }
 0x25d   :  { %2403 = vmatpush.xpose.msrb.mxu2 %v2173_v38  ;;  %v1821_v13 = vadd.f32 %v1820_v51, %v1754_v40  ;;  %2340 = vmatmul.f32.gmra.mxu1 %v2090_v1  ;;  %v4153_v38 = vld [vmem:[#allocation40_spill] sm:$0xff] }
 0x25e   :  { %2464 = vmatpush.xpose.msrb.mxu3 %v3614_v37  ;;  %v2113_v37 = vsub.f32 %v1395_v25, %v3790_v47  ;;  %v1397_v1 = vadd.f32 %v4153_v38, %v1296_v48  ;;  %v1218_v12 = vadd.f32 %v4154_v16, %v1116_v32  ;;  %v4159_v25 = vld [vmem:[#allocation38_spill] sm:$0xff] }
 0x25f   :  { %v3796_v9 = vadd.f32 %v1887_v56, %v1821_v13 }
 0x260   :  { %2101 = vmatmul.f32.gmra.mxu2 %v2100_v15  ;;  %v3808_v11 = vand.u32 4294901760, %v1397_v1  ;;  %v2114_v21 = vand.u32 4294901760, %v2113_v37  ;;  %v1300_v36 = vadd.f32 %v4157_v29, %v1218_v12 }
 0x261   :  { %2407 = vmatpush.xpose.msrb.mxu2 %v2179_v61  ;;  %v1893_v63 = vpop.f32.mrf.mxu3  ;;  %2206 = vmatmul.f32.gmra.mxu3 %v3726_v44  ;;  %v1656_v2 = vpop.f32.mrf.mxu0  ;;  %v4156_v61 = vld [vmem:[#allocation36_spill] sm:$0xff] }
 0x262   :  { %2466 = vmatpush.xpose.msrb.mxu3 %v3620_v46  ;;  %v1757_v31 = vpop.f32.mrf.mxu1  ;;  %v1016_v3 = vadd.f32 %v4156_v61, %v4155_v7  ;;  %v1825_v52 = vpop.f32.mrf.mxu2  ;;  %2278 = vmatmul.f32.gmra.mxu0 %v2097_v23  ;;  %v2115_v23 = vsub.f32 %v2113_v37, %v2114_v21 }
 0x263   :  { %v1758_v5 = vadd.f32 %v1757_v31, %v1648_v33 }
 0x264   :  { %v1122_v50 = vadd.f32 %v4158_v60, %v1016_v3  ;;  %v2116_v33 = vand.u32 4294901760, %v2115_v23 }
 0x265   :  { %2411 = vmatpush.xpose.msrb.mxu2 %v2185_v24  ;;  %v1826_v46 = vadd.f32 %v1825_v52, %v1758_v5  ;;  %2346 = vmatmul.f32.gmra.mxu1 %v2098_v30  ;;  %v1399_v30 = vadd.f32 %v3484_v35, %v1300_v36 }
 0x266   :  { %2468 = vmatpush.xpose.msrb.mxu3 %v3639_v59  ;;  %v2121_v59 = vsub.f32 %v1397_v1, %v3808_v11  ;;  %v1222_v34 = vadd.f32 %v4159_v25, %v1122_v50 }
 0x267   :  { %v3814_v56 = vadd.f32 %v1893_v63, %v1826_v46  ;;  %v3824_v17 = vand.u32 4294901760, %v1399_v30 }
 0x268   :  { %2109 = vmatmul.f32.gmra.mxu2 %v2108_v4  ;;  %v1304_v18 = vadd.f32 %v4160_v0, %v1222_v34  ;;  %v2122_v26 = vand.u32 4294901760, %v2121_v59 }
 0x269   :  { %2415 = vmatpush.xpose.msrb.mxu2 %v2191_v20  ;;  %v1899_v28 = vpop.f32.mrf.mxu3  ;;  %2210 = vmatmul.f32.gmra.mxu3 %v3755_v22  ;;  %v1664_v20 = vpop.f32.mrf.mxu0 }
 0x26a   :  { %2470 = vmatpush.xpose.msrb.mxu3 %v3662_v49  ;;  %v1761_v24 = vpop.f32.mrf.mxu1  ;;  %v1830_v43 = vpop.f32.mrf.mxu2  ;;  %2283 = vmatmul.f32.gmra.mxu0 %v2105_v6  ;;  %v2129_v6 = vsub.f32 %v1399_v30, %v3824_v17  ;;  %v2123_v8 = vsub.f32 %v2121_v59, %v2122_v26 }
 0x26b   :  { %v1762_v14 = vadd.f32 %v1761_v24, %v1656_v2 }
 0x26d   :  { %2419 = vmatpush.xpose.msrb.mxu2 %v2197_v55  ;;  %v1831_v49 = vadd.f32 %v1830_v43, %v1762_v14  ;;  %2352 = vmatmul.f32.gmra.mxu1 %v2106_v54  ;;  %v2130_v54 = vand.u32 4294901760, %v2129_v6 }
 0x26e   :  { %2472 = vmatpush.xpose.msrb.mxu3 %v3681_v39  ;;  %v1401_v39 = vadd.f32 %v3509_v10, %v1304_v18 }
 0x26f   :  { %v3827_v35 = vadd.f32 %v1899_v28, %v1831_v49 }
 0x270   :  { %2117 = vmatmul.f32.gmra.mxu2 %v2116_v33  ;;  %v2136_v48 = vand.u32 4294901760, %v1401_v39 }
 0x271   :  { %2214 = vmatmul.f32.gmra.mxu3 %v3772_v57  ;;  %v1905_v42 = vpop.f32.mrf.mxu3  ;;  %v1672_v58 = vpop.f32.mrf.mxu0 }
 0x272   :  { %2474 = vmatpush.xpose.msrb.mxu3 %v3699_v53  ;;  %v1765_v55 = vpop.f32.mrf.mxu1  ;;  %v1835_v51 = vpop.f32.mrf.mxu2  ;;  %2288 = vmatmul.f32.gmra.mxu0 %v2113_v37  ;;  %v2124_v53 = vand.u32 4294901760, %v2123_v8  ;;  %v2137_v15 = vsub.f32 %v1401_v39, %v2136_v48  ;;  %v2131_v37 = vsub.f32 %v2129_v6, %v2130_v54  ;;  %v2591_v39 = vmov 0.0  }
 0x273   :  { %v1766_v40 = vadd.f32 %v1765_v55, %v1664_v20  ;;  %41 = vst.msk [vmem:[%s4024_s3] sm:$0xff] %vm40_vm1, %v2591_v39 }
 0x274   :  { %v2138_v2 = vand.u32 4294901760, %v2137_v15  ;;  %42 = vst.msk [vmem:[%s4024_s3 + $0x8] sm:$0xff] %vm40_vm1, %v2591_v39 }
 0x275   :  { %v1836_v13 = vadd.f32 %v1835_v51, %v1766_v40  ;;  %2358 = vmatmul.f32.gmra.mxu1 %v2114_v21  ;;  %43 = vst.msk [vmem:[%s4024_s3 + $0x10] sm:$0xff] %vm40_vm1, %v2591_v39 }
 0x276   :  { %2476 = vmatpush.xpose.msrb.mxu3 %v3711_v41  ;;  %v2132_v41 = vand.u32 4294901760, %v2131_v37  ;;  %v2139_v7 = vsub.f32 %v2137_v15, %v2138_v2  ;;  %44 = vst.msk [vmem:[%s4024_s3 + $0x18] sm:$0xff] %vm40_vm1, %v2591_v39 }
 0x277   :  { %v3834_v62 = vadd.f32 %v1905_v42, %v1836_v13  ;;  %45 = vst.msk [vmem:[%s4024_s3 + $0x20] sm:$0xff] %vm40_vm1, %v2591_v39 }
 0x278   :  { %2125 = vmatmul.f32.gmra.mxu2 %v2124_v53  ;;  %v2140_v52 = vand.u32 4294901760, %v2139_v7  ;;  %46 = vst.msk [vmem:[%s4024_s3 + $0x28] sm:$0xff] %vm40_vm1, %v2591_v39 }
 0x279   :  { %2218 = vmatmul.f32.gmra.mxu3 %v3790_v47  ;;  %v1911_v38 = vpop.f32.mrf.mxu3  ;;  %v1680_v27 = vpop.f32.mrf.mxu0  ;;  %47 = vst.msk [vmem:[%s4024_s3 + $0x30] sm:$0xff] %vm40_vm1, %v2591_v39 }
 0x27a   :  { %v1769_v32 = vpop.f32.mrf.mxu1  ;;  %v1840_v63 = vpop.f32.mrf.mxu2  ;;  %2293 = vmatmul.f32.gmra.mxu0 %v2121_v59  ;;  %48 = vst.msk [vmem:[%s4024_s3 + $0x38] sm:$0xff] %vm40_vm1, %v2591_v39 }
 0x27b   :  { %v1770_v10 = vadd.f32 %v1769_v32, %v1672_v58 }
 0x27d   :  { %v1841_v1 = vadd.f32 %v1840_v63, %v1770_v10  ;;  %2364 = vmatmul.f32.gmra.mxu1 %v2122_v26 }
 0x27f   :  { %v3837_v31 = vadd.f32 %v1911_v38, %v1841_v1 }
 0x280   :  { %2133 = vmatmul.f32.gmra.mxu2 %v2132_v41 }
 0x281   :  { %2222 = vmatmul.f32.gmra.mxu3 %v3808_v11  ;;  %v1917_v5 = vpop.f32.mrf.mxu3  ;;  %v1688_v21 = vpop.f32.mrf.mxu0 }
 0x282   :  { %v1773_v16 = vpop.f32.mrf.mxu1  ;;  %2298 = vmatmul.f32.gmra.mxu0 %v2129_v6  ;;  %v1845_v61 = vpop.f32.mrf.mxu2 }
 0x283   :  { %v1774_v12 = vadd.f32 %v1773_v16, %v1680_v27 }
 0x285   :  { %v1846_v3 = vadd.f32 %v1845_v61, %v1774_v12  ;;  %2370 = vmatmul.f32.gmra.mxu1 %v2130_v54 }
 0x287   :  { %v3840_v46 = vadd.f32 %v1917_v5, %v1846_v3 }
 0x288   :  { %2141 = vmatmul.f32.gmra.mxu2 %v2140_v52  ;;  %v1594_v52 = vld [vmem:[%s4024_s3] sm:$0xff] }
 0x289   :  { %2226 = vmatmul.f32.gmra.mxu3 %v3824_v17  ;;  %v1968_v60 = vpop.f32.mrf.mxu0 }
 0x28a   :  { %v1777_v29 = vpop.f32.mrf.mxu1  ;;  %2303 = vmatmul.f32.gmra.mxu0 %v2137_v15 }
 0x28b   :  { %v3843_v36 = vadd.f32 %v1777_v29, %v1688_v21 }
 0x28d   :  { %2376 = vmatmul.f32.gmra.mxu1 %v2138_v2 }
 0x290   :  { %2421 = vmatmul.f32.vlgmr.msrb.gmra.mxu2 %v3685_v19 }
 0x291   :  { %2230 = vmatmul.f32.gmra.mxu3 %v2136_v48  ;;  %v1972_v4 = vpop.f32.mrf.mxu0 }
 0x292   :  { %v2025_v50 = vpop.f32.mrf.mxu1  ;;  %v1973_v37 = vadd.f32 %v1972_v4, %v3796_v9 }
 0x298   :  { %2425 = vmatmul.f32.gmra.mxu2 %v3726_v44 }
 0x299   :  { %2478 = vmatmul.f32.vlgmr.msrb.gmra.mxu3 %v3685_v19 }
 0x29a   :  { %v2029_v19 = vpop.f32.mrf.mxu1 }
 0x29b   :  { %v2030_v2 = vadd.f32 %v2029_v19, %v1973_v37 }
 0x2a0   :  { %2429 = vmatmul.f32.gmra.mxu2 %v3755_v22 }
 0x2a1   :  { %2482 = vmatmul.f32.gmra.mxu3 %v3726_v44  ;;  %v1976_v44 = vpop.f32.mrf.mxu0 }
 0x2a2   :  { %v2033_v28 = vpop.f32.mrf.mxu1  ;;  %v1977_v61 = vadd.f32 %v1976_v44, %v3814_v56 }
 0x2a4   :  { %v2034_v9 = vadd.f32 %v2033_v28, %v1977_v61  ;;  %v1595_v28 = vld [vmem:[%s4024_s3 + $0x8] sm:$0xff] }
 0x2a8   :  { %2433 = vmatmul.f32.gmra.mxu2 %v3772_v57 }
 0x2a9   :  { %2486 = vmatmul.f32.gmra.mxu3 %v3755_v22  ;;  %v3859_v22 = vpop.f32.mrf.mxu2  ;;  %v3863_v24 = vpop.f32.mrf.mxu0 }
 0x2aa   :  { %v1981_v56 = vadd.f32 %v3863_v24, %v3827_v35 }
 0x2b0   :  { %2437 = vmatmul.f32.gmra.mxu2 %v3790_v47 }
 0x2b1   :  { %2490 = vmatmul.f32.gmra.mxu3 %v3772_v57  ;;  %v3861_v57 = vpop.f32.mrf.mxu3  ;;  %v3867_v25 = vpop.f32.mrf.mxu0 }
 0x2b2   :  { %v1985_v35 = vadd.f32 %v3867_v25, %v3834_v62 }
 0x2b8   :  { %2441 = vmatmul.f32.gmra.mxu2 %v3808_v11 }
 0x2b9   :  { %2494 = vmatmul.f32.gmra.mxu3 %v3790_v47  ;;  %v3865_v47 = vpop.f32.mrf.mxu1  ;;  %v3871_v43 = vpop.f32.mrf.mxu0 }
 0x2ba   :  { %v1989_v62 = vadd.f32 %v3871_v43, %v3837_v31 }
 0x2c0   :  { %2445 = vmatmul.f32.gmra.mxu2 %v3824_v17 }
 0x2c1   :  { %2498 = vmatmul.f32.gmra.mxu3 %v3808_v11  ;;  %v3869_v11 = vpop.f32.mrf.mxu1 }
 0x2c8   :  { %2449 = vmatmul.f32.gmra.mxu2 %v2136_v48 }
 0x2c9   :  { %2502 = vmatmul.f32.gmra.mxu3 %v3824_v17  ;;  %v3873_v20 = vpop.f32.mrf.mxu1  ;;  %v3877_v17 = vpop.f32.mrf.mxu0 }
 0x2ca   :  { %v2046_v61 = vadd.f32 %v3873_v20, %v1989_v62  ;;  %v1993_v31 = vadd.f32 %v3877_v17, %v3840_v46 }
 0x2d1   :  { %2506 = vmatmul.f32.gmra.mxu3 %v2136_v48  ;;  %v3883_v26 = vpop.f32.mrf.mxu1  ;;  %v3889_v6 = vpop.f32.mrf.mxu0  ;;  %v1969_v48 = vadd.f32 %v1968_v60, %v3779_v45 }
 0x2d3   :  { %v2086_v59 = vpop.f32.mrf.mxu2  ;;  %v2026_v32 = vadd.f32 %v2025_v50, %v1969_v48 }
 0x2d5   :  { %v2087_v15 = vadd.f32 %v2086_v59, %v2026_v32 }
 0x2d9   :  { %v3895_v40 = vpop.f32.mrf.mxu1  ;;  %v2269_v13 = vpop.f32.mrf.mxu0 }
 0x2db   :  { %v2094_v23 = vpop.f32.mrf.mxu2 }
 0x2dc   :  { %v2203_v30 = vpop.f32.mrf.mxu3  ;;  %v2095_v16 = vadd.f32 %v2094_v23, %v2030_v2 }
 0x2dd   :  { %v2204_v63 = vadd.f32 %v2203_v30, %v2087_v15 }
 0x2df   :  { %v2270_v27 = vadd.f32 %v2269_v13, %v2204_v63 }
 0x2e1   :  { %v2335_v58 = vpop.f32.mrf.mxu1  ;;  %v2274_v10 = vpop.f32.mrf.mxu0 }
 0x2e2   :  { %v2336_v45 = vadd.f32 %v2335_v58, %v2270_v27 }
 0x2e3   :  { %v2102_v34 = vpop.f32.mrf.mxu2 }
 0x2e4   :  { %v2207_v14 = vpop.f32.mrf.mxu3  ;;  %v2103_v4 = vadd.f32 %v2102_v34, %v2034_v9  ;;  %v2038_v34 = vadd.f32 %v3865_v47, %v1981_v56  ;;  %v1596_v47 = vld [vmem:[%s4024_s3 + $0x10] sm:$0xff] }
 0x2e5   :  { %v2208_v7 = vadd.f32 %v2207_v14, %v2095_v16 }
 0x2e7   :  { %v2275_v60 = vadd.f32 %v2274_v10, %v2208_v7 }
 0x2e9   :  { %v2341_v38 = vpop.f32.mrf.mxu1  ;;  %v2279_v12 = vpop.f32.mrf.mxu0 }
 0x2ea   :  { %v2342_v23 = vadd.f32 %v2341_v38, %v2275_v60 }
 0x2eb   :  { %v3875_v49 = vpop.f32.mrf.mxu2 }
 0x2ec   :  { %v2211_v33 = vpop.f32.mrf.mxu3  ;;  %v2111_v48 = vadd.f32 %v3875_v49, %v2038_v34  ;;  %v2042_v49 = vadd.f32 %v3869_v11, %v1985_v35 }
 0x2ed   :  { %v2212_v59 = vadd.f32 %v2211_v33, %v2103_v4  ;;  %v2050_v4 = vadd.f32 %v3883_v26, %v1993_v31  ;;  %v1599_v26 = vld [vmem:[%s4024_s3 + $0x28] sm:$0xff] }
 0x2ef   :  { %v2280_v33 = vadd.f32 %v2279_v12, %v2212_v59 }
 0x2f1   :  { %v2347_v29 = vpop.f32.mrf.mxu1  ;;  %v2284_v44 = vpop.f32.mrf.mxu0 }
 0x2f2   :  { %v2348_v10 = vadd.f32 %v2347_v29, %v2280_v33 }
 0x2f3   :  { %v3879_v0 = vpop.f32.mrf.mxu2 }
 0x2f4   :  { %v3881_v18 = vpop.f32.mrf.mxu3  ;;  %v2119_v2 = vadd.f32 %v3879_v0, %v2042_v49 }
 0x2f5   :  { %v2216_v15 = vadd.f32 %v3881_v18, %v2111_v48 }
 0x2f7   :  { %v2285_v38 = vadd.f32 %v2284_v44, %v2216_v15 }
 0x2f9   :  { %v2353_v58 = vpop.f32.mrf.mxu1 }
 0x2fa   :  { %v2354_v7 = vadd.f32 %v2353_v58, %v2285_v38 }
 0x2fb   :  { %v3885_v42 = vpop.f32.mrf.mxu2 }
 0x2fc   :  { %v3887_v55 = vpop.f32.mrf.mxu3 }
 0x2fd   :  { %v2220_v12 = vadd.f32 %v3887_v55, %v2119_v2 }
 0x301   :  { %v2359_v16 = vpop.f32.mrf.mxu1 }
 0x303   :  { %v3917_v51 = vpop.f32.mrf.mxu2 }
 0x304   :  { %v3919_v8 = vpop.f32.mrf.mxu3 }
 0x309   :  { %v2365_v43 = vpop.f32.mrf.mxu1 }
 0x30b   :  { %v3930_v53 = vpop.f32.mrf.mxu2 }
 0x30c   :  { %v3932_v54 = vpop.f32.mrf.mxu3 }
 0x313   :  { %v2422_v41 = vpop.f32.mrf.mxu2 }
 0x314   :  { %v3935_v1 = vpop.f32.mrf.mxu3  ;;  %v2423_v3 = vadd.f32 %v2422_v41, %v2336_v45  ;;  %v2289_v41 = vpop.f32.mrf.mxu0  ;;  %v1597_v45 = vld [vmem:[%s4024_s3 + $0x18] sm:$0xff] }
 0x31b   :  { %v2426_v5 = vpop.f32.mrf.mxu2 }
 0x31c   :  { %v2479_v21 = vpop.f32.mrf.mxu3  ;;  %v2427_v30 = vadd.f32 %v2426_v5, %v2342_v23  ;;  %v2127_v5 = vadd.f32 %v3885_v42, %v2046_v61  ;;  %v1598_v42 = vld [vmem:[%s4024_s3 + $0x20] sm:$0xff]  ;;  %v2135_v23 = vadd.f32 %v3917_v51, %v2050_v4 }
 0x31d   :  { %v2480_v50 = vadd.f32 %v2479_v21, %v2423_v3  ;;  %v2290_v3 = vadd.f32 %v2289_v41, %v2220_v12  ;;  %v2294_v21 = vpop.f32.mrf.mxu0 }
 0x31e   :  { %v2224_v9 = vadd.f32 %v3919_v8, %v2127_v5  ;;  %v1851_v8 = vadd.f32 %v3859_v22, %v3843_v36  ;;  %v2228_v17 = vadd.f32 %v3932_v54, %v2135_v23  ;;  %v2371_v54 = vpop.f32.mrf.mxu1 }
 0x31f   :  { %v2510_v19 = vadd.f32 %v2480_v50, %v1594_v52  ;;  %v2360_v29 = vadd.f32 %v2359_v16, %v2290_v3 }
 0x320   :  { %v1924_v46 = vadd.f32 %v3861_v57, %v1851_v8 }
 0x321   :  { %2519 = vst.msk [vmem:[%s4024_s3] sm:$0xff] %vm40_vm1, %v2510_v19  ;;  %v2295_v19 = vadd.f32 %v2294_v21, %v2224_v9 }
 0x322   :  { %v1997_v36 = vadd.f32 %v3889_v6, %v1924_v46 }
 0x323   :  { %v2430_v14 = vpop.f32.mrf.mxu2  ;;  %v2366_v44 = vadd.f32 %v2365_v43, %v2295_v19 }
 0x324   :  { %v2483_v39 = vpop.f32.mrf.mxu3  ;;  %v2431_v24 = vadd.f32 %v2430_v14, %v2348_v10  ;;  %v2054_v14 = vadd.f32 %v3895_v40, %v1997_v36  ;;  %v1600_v40 = vld [vmem:[%s4024_s3 + $0x30] sm:$0xff] }
 0x325   :  { %v2484_v13 = vadd.f32 %v2483_v39, %v2427_v30  ;;  %v2299_v30 = vpop.f32.mrf.mxu0 }
 0x326   :  { %v2300_v57 = vadd.f32 %v2299_v30, %v2228_v17  ;;  %v2143_v34 = vadd.f32 %v3930_v53, %v2054_v14  ;;  %v2377_v53 = vpop.f32.mrf.mxu1 }
 0x327   :  { %v2511_v32 = vadd.f32 %v2484_v13, %v1595_v28 }
 0x328   :  { %v2232_v13 = vadd.f32 %v3935_v1, %v2143_v34  ;;  %v2372_v58 = vadd.f32 %v2371_v54, %v2300_v57 }
 0x329   :  { %2520 = vst.msk [vmem:[%s4024_s3 + $0x8] sm:$0xff] %vm40_vm1, %v2511_v32 }
 0x32b   :  { %v2434_v63 = vpop.f32.mrf.mxu2 }
 0x32c   :  { %v2487_v37 = vpop.f32.mrf.mxu3  ;;  %v2435_v25 = vadd.f32 %v2434_v63, %v2354_v7 }
 0x32d   :  { %v2488_v18 = vadd.f32 %v2487_v37, %v2431_v24  ;;  %v2304_v48 = vpop.f32.mrf.mxu0 }
 0x32e   :  { %v2305_v15 = vadd.f32 %v2304_v48, %v2232_v13 }
 0x32f   :  { %v2512_v27 = vadd.f32 %v2488_v18, %v1596_v47  ;;  %v1601_v47 = vld [vmem:[%s4024_s3 + $0x38] sm:$0xff] }
 0x330   :  { %v2378_v63 = vadd.f32 %v2377_v53, %v2305_v15 }
 0x331   :  { %2521 = vst.msk [vmem:[%s4024_s3 + $0x10] sm:$0xff] %vm40_vm1, %v2512_v27 }
 0x333   :  { %v2438_v11 = vpop.f32.mrf.mxu2 }
 0x334   :  { %v2491_v0 = vpop.f32.mrf.mxu3  ;;  %v2439_v60 = vadd.f32 %v2438_v11, %v2360_v29 }
 0x335   :  { %v2492_v55 = vadd.f32 %v2491_v0, %v2435_v25 }
 0x337   :  { %v2513_v52 = vadd.f32 %v2492_v55, %v1597_v45 }
 0x339   :  { %2522 = vst.msk [vmem:[%s4024_s3 + $0x18] sm:$0xff] %vm40_vm1, %v2513_v52 }
 0x33b   :  { %v2442_v20 = vpop.f32.mrf.mxu2 }
 0x33c   :  { %v2495_v50 = vpop.f32.mrf.mxu3  ;;  %v2443_v22 = vadd.f32 %v2442_v20, %v2366_v44 }
 0x33d   :  { %v2496_v59 = vadd.f32 %v2495_v50, %v2439_v60 }
 0x33f   :  { %v2514_v56 = vadd.f32 %v2496_v59, %v1598_v42 }
 0x341   :  { %2523 = vst.msk [vmem:[%s4024_s3 + $0x20] sm:$0xff] %vm40_vm1, %v2514_v56 }
 0x343   :  { %v2446_v39 = vpop.f32.mrf.mxu2 }
 0x344   :  { %v2499_v51 = vpop.f32.mrf.mxu3  ;;  %v2447_v6 = vadd.f32 %v2446_v39, %v2372_v58 }
 0x345   :  { %v2500_v28 = vadd.f32 %v2499_v51, %v2443_v22 }
 0x347   :  { %v2515_v33 = vadd.f32 %v2500_v28, %v1599_v26 }
 0x349   :  { %2524 = vst.msk [vmem:[%s4024_s3 + $0x28] sm:$0xff] %vm40_vm1, %v2515_v33 }
 0x34b   :  { %v2450_v24 = vpop.f32.mrf.mxu2 }
 0x34c   :  { %v2503_v32 = vpop.f32.mrf.mxu3  ;;  %v2451_v1 = vadd.f32 %v2450_v24, %v2378_v63 }
 0x34d   :  { %v2504_v10 = vadd.f32 %v2503_v32, %v2447_v6 }
 0x34f   :  { %v2516_v35 = vadd.f32 %v2504_v10, %v1600_v40 }
 0x351   :  { %2525 = vst.msk [vmem:[%s4024_s3 + $0x30] sm:$0xff] %vm40_vm1, %v2516_v35 }
 0x354   :  { %v2507_v37 = vpop.f32.mrf.mxu3 }
 0x355   :  { %v2508_v49 = vadd.f32 %v2507_v37, %v2451_v1 }
 0x357   :  { %v2517_v38 = vadd.f32 %v2508_v49, %v1601_v47 }
 0x359   :  { %2526 = vst.msk [vmem:[%s4024_s3 + $0x38] sm:$0xff] %vm40_vm1, %v2517_v38 }

</bundles_post_ra>
